<compile_context>
chip_gen: v7x
topology: tpu7x:2x2x1
jax: 0.10.0
libtpu: 0.0.40
codegen_flags: <defaults>
</compile_context>

<pallas_src>
import functools

import jax
import jax.numpy as jnp
from jax.experimental import pallas as pl
from jax.experimental.pallas import tpu as pltpu

_VMEM_LIMIT = 48 * 1024 * 1024  # explicit scoped-VMEM budget (v5e default is 16 MiB; v7x phys 64 MiB)


def _fs(shape):
    """Full-array BlockSpec (block == whole array)."""
    return pl.BlockSpec(shape, lambda *_: (0,) * len(shape))


# ------------------- fused 2-layer GNN + mean readout (one kernel) -------------------

def _gnn_kernel(x_ref, adj_ref, ro_ref, w1_ref, b1_ref, w2_ref, b2_ref, o_ref):
    # TODO(synk): true DGL GAT/GIN message passing replaced by normalized-adjacency matmuls;
    # TODO(synk): tile over (row, k) with an f32 accumulator for production-scale N (here N is tiny).
    bf16, f32 = jnp.bfloat16, jnp.float32
    adj = adj_ref[...]                                       # bf16 resident
    h = jnp.dot(adj, x_ref[...], preferred_element_type=f32)
    h = jnp.maximum(jnp.dot(h.astype(bf16), w1_ref[...],
                            preferred_element_type=f32) + b1_ref[...], 0.0)
    h = jnp.dot(adj, h.astype(bf16), preferred_element_type=f32)
    h = jnp.maximum(jnp.dot(h.astype(bf16), w2_ref[...],
                            preferred_element_type=f32) + b2_ref[...], 0.0)
    o_ref[...] = jnp.dot(ro_ref[...], h.astype(bf16), preferred_element_type=f32)


def pallas_gnn2(x, adj, readout, w1, b1, w2, b2):
    N, Din = x.shape
    H1, H2 = w1.shape[1], w2.shape[1]
    G = readout.shape[0]
    bf16, f32 = jnp.bfloat16, jnp.float32
    return pl.pallas_call(
        _gnn_kernel,
        out_shape=jax.ShapeDtypeStruct((G, H2), f32),
        grid=(1,),
        in_specs=[_fs((N, Din)), _fs((N, N)), _fs((G, N)),
                  _fs((Din, H1)), _fs((1, H1)), _fs((H1, H2)), _fs((1, H2))],
        out_specs=_fs((G, H2)),
        compiler_params=pltpu.CompilerParams(dimension_semantics=("arbitrary",),
                                             vmem_limit_bytes=_VMEM_LIMIT),
    )(x.astype(bf16), adj.astype(bf16), readout.astype(bf16),
      w1.astype(bf16), b1.reshape(1, -1).astype(f32),
      w2.astype(bf16), b2.reshape(1, -1).astype(f32))


# ------------------- length-masked GRU (split matmuls, TT steps / grid step) ----------

def _gru_kernel(x_ref, len_ref, h0_ref, wih_ref, whh_ref, bih_ref, bhh_ref,
                out_ref, hfin_ref, h_scr, *, H, TT):
    step = pl.program_id(0)
    f32, bf16 = jnp.float32, jnp.bfloat16

    @pl.when(step == 0)
    def _():
        h_scr[...] = h0_ref[...]

    def body(i, h):
        t = step * TT + i
        # split matmuls: no lane concat, no zero-padded stacked weights
        gi = jnp.dot(x_ref[i], wih_ref[...], preferred_element_type=f32) + bih_ref[...]
        gh = jnp.dot(h.astype(bf16), whh_ref[...], preferred_element_type=f32) + bhh_ref[...]
        r = jax.nn.sigmoid(gi[:, :H] + gh[:, :H])
        z = jax.nn.sigmoid(gi[:, H:2 * H] + gh[:, H:2 * H])
        n = jnp.tanh(gi[:, 2 * H:] + r * gh[:, 2 * H:])
        h_new = (1.0 - z) * n + z * h
        m = (len_ref[...] > t.astype(f32)).astype(f32)       # [B,1]; pack_padded semantics
        h_out = m * h_new + (1.0 - m) * h
        out_ref[i] = h_out
        return h_out

    h = jax.lax.fori_loop(0, TT, body, h_scr[...], unroll=True)
    h_scr[...] = h

    @pl.when(step == pl.num_programs(0) - 1)                 # single final-hidden store (v5e vst)
    def _():
        hfin_ref[...] = h


def pallas_gru(x_seq, lengths, h0, wih, whh, bih, bhh, *, tt=4):
    """x_seq [T,B,D], lengths [B] int, h0 [B,H] -> (outputs [T,B,H] f32, final hidden [B,H] f32)."""
    T, B, D = x_seq.shape
    H = h0.shape[1]
    bf16, f32 = jnp.bfloat16, jnp.float32
    tt = min(tt, T)
    T_pad = ((T + tt - 1) // tt) * tt
    if T_pad != T:
        x_seq = jnp.concatenate([x_seq, jnp.zeros((T_pad - T, B, D), x_seq.dtype)], axis=0)
    kern = functools.partial(_gru_kernel, H=H, TT=tt)
    out, hfin = pl.pallas_call(
        kern,
        out_shape=(jax.ShapeDtypeStruct((T_pad, B, H), f32),
                   jax.ShapeDtypeStruct((B, H), f32)),
        grid=(T_pad // tt,),
        in_specs=[pl.BlockSpec((tt, B, D), lambda t: (t, 0, 0)),
                  pl.BlockSpec((B, 1), lambda t: (0, 0)),
                  pl.BlockSpec((B, H), lambda t: (0, 0)),
                  pl.BlockSpec((D, 3 * H), lambda t: (0, 0)),
                  pl.BlockSpec((H, 3 * H), lambda t: (0, 0)),
                  pl.BlockSpec((1, 3 * H), lambda t: (0, 0)),
                  pl.BlockSpec((1, 3 * H), lambda t: (0, 0))],
        out_specs=(pl.BlockSpec((tt, B, H), lambda t: (t, 0, 0)),
                   pl.BlockSpec((B, H), lambda t: (0, 0))),
        scratch_shapes=[pltpu.VMEM((B, H), f32)],
        compiler_params=pltpu.CompilerParams(dimension_semantics=("arbitrary",),
                                             vmem_limit_bytes=_VMEM_LIMIT),
    )(x_seq.astype(bf16), lengths.reshape(B, 1).astype(f32), h0.astype(f32),
      wih.astype(bf16), whh.astype(bf16),
      bih.reshape(1, -1).astype(f32), bhh.reshape(1, -1).astype(f32))
    return out[:T], hfin


# -------------------- fused attention-GRU decoder loop (one kernel) ------------------

def _dec_loop_kernel(tf_ref, h0_ref, road_ref, enc_ref, mask_ref, idt_ref, ratet_ref,
                     cons_ref, wie_ref, wrate_ref, wic_ref, whh_ref, bih_ref, bhh_ref,
                     widh_ref, widc_ref, bid_ref, wrh_ref, wrc_ref, br_ref,
                     pid_ref, prate_ref, h_scr, sel_scr, rate_scr, *, H, ID, T):
    s = pl.program_id(0)
    B = h_scr.shape[0]
    bf16, f32 = jnp.bfloat16, jnp.float32
    ids_iota = jax.lax.broadcasted_iota(jnp.int32, (B, ID), 1).astype(f32)

    @pl.when(s == 0)
    def _():
        h_scr[...] = h0_ref[...]
        sel_scr[...] = (ids_iota == idt_ref[:, 0:1]).astype(bf16)
        rate_scr[...] = ratet_ref[:, 0:1]

    h = h_scr[...]                                           # [B, H] f32
    h_b = h.astype(bf16)
    enc = enc_ref[...]                                       # [B, S, H] bf16 resident

    # --- dot attention on the MXU (flash-style batched einsums) ---
    hq = h_b.reshape(B, 1, H)                                # [B,1,H]
    scores = jnp.einsum('bqh,bsh->bqs', hq, enc,
                        preferred_element_type=f32)          # [B,1,S]
    scores = jnp.where(mask_ref[...] > 0, scores, -1e9)
    scores = scores - jnp.max(scores, axis=-1, keepdims=True)
    e = jnp.exp(scores)
    a = e * pl.reciprocal(jnp.sum(e, axis=-1, keepdims=True), approx=True)
    ctx = jnp.einsum('bqs,bsh->bqh', a.astype(bf16), enc,
                     preferred_element_type=f32).reshape(B, H)  # [B,H]
    ctx_b = ctx.astype(bf16)

    # --- road embedding gather of current input id via one-hot matmul ---
    # TODO(synk): switch to a per-row DMA gather for large ID; one-hot matmul is fine at small ID.
    emb = jnp.dot(sel_scr[...], road_ref[...], preferred_element_type=f32)   # [B, H]

    # --- GRU cell with split matmuls (no lane concats, rate column handled on VPU) ---
    gi = (jnp.dot(emb.astype(bf16), wie_ref[...], preferred_element_type=f32)
          + rate_scr[...] * wrate_ref[...]
          + jnp.dot(ctx_b, wic_ref[...], preferred_element_type=f32)
          + bih_ref[...])
    gh = jnp.dot(h_b, whh_ref[...], preferred_element_type=f32) + bhh_ref[...]
    r = jax.nn.sigmoid(gi[:, :H] + gh[:, :H])
    z = jax.nn.sigmoid(gi[:, H:2 * H] + gh[:, H:2 * H])
    n = jnp.tanh(gi[:, 2 * H:] + r * gh[:, 2 * H:])
    h_new = (1.0 - z) * n + z * h
    h_new_b = h_new.astype(bf16)

    # --- id / rate heads as split matmuls; lane-dense separate outputs ---
    logits = (jnp.dot(h_new_b, widh_ref[...], preferred_element_type=f32)
              + jnp.dot(ctx_b, widc_ref[...], preferred_element_type=f32)
              + bid_ref[...])
    logits = logits - jnp.max(logits, axis=-1, keepdims=True)
    pexp = jnp.exp(logits)
    pid = pexp * pl.reciprocal(jnp.sum(pexp, axis=-1, keepdims=True), approx=True)
    pid = pid * cons_ref[0].astype(f32)                      # dis_prob_mask
    prate = jax.nn.sigmoid(
        jnp.dot(h_new_b, wrh_ref[...], preferred_element_type=f32)
        + jnp.dot(ctx_b, wrc_ref[...], preferred_element_type=f32)
        + br_ref[...])                                       # [B, 1]

    pid_ref[0] = pid
    prate_ref[0] = prate

    # --- next-step inputs (teacher forcing flag from SMEM scalar prefetch) ---
    mx = jnp.max(pid, axis=-1, keepdims=True)
    first_idx = jnp.min(jnp.where(pid >= mx, ids_iota, float(ID)), axis=-1, keepdims=True)
    oh_top1 = (ids_iota == first_idx).astype(f32)

    t_iota = jax.lax.broadcasted_iota(jnp.int32, (B, T), 1)
    col = (t_iota == (s + 1)).astype(f32)                    # select column t = s+1
    id_t = jnp.sum(idt_ref[...] * col, axis=1, keepdims=True)     # [B,1]
    rate_t = jnp.sum(ratet_ref[...] * col, axis=1, keepdims=True) # [B,1]
    oh_trg = (ids_iota == id_t).astype(f32)

    tff = (tf_ref[s] > 0).astype(f32)
    sel_scr[...] = (tff * oh_trg + (1.0 - tff) * oh_top1).astype(bf16)
    rate_scr[...] = tff * rate_t + (1.0 - tff) * prate
    h_scr[...] = h_new


def pallas_decoder_loop(tf_flags, enc_hidden, road_emb, enc_outputs, attn_mask_b1s,
                        trg_id, trg_rate, cons, dw):
    T, B, _ = trg_id.shape
    S = enc_outputs.shape[0]
    H = enc_hidden.shape[1]
    ID = road_emb.shape[0]
    bf16, f32 = jnp.bfloat16, jnp.float32

    enc_bsh = jnp.transpose(enc_outputs, (1, 0, 2)).astype(bf16)       # [B,S,H] bf16 resident
    idt_bt = jnp.transpose(trg_id[:, :, 0], (1, 0)).astype(f32)        # [B,T] resident
    ratet_bt = jnp.transpose(trg_rate[:, :, 0], (1, 0)).astype(f32)    # [B,T] resident

    kern = functools.partial(_dec_loop_kernel, H=H, ID=ID, T=T)
    grid_spec = pltpu.PrefetchScalarGridSpec(
        num_scalar_prefetch=1,
        grid=(T - 1,),
        in_specs=[
            pl.BlockSpec((B, H), lambda s, tf: (0, 0)),                # enc_hidden (init)
            pl.BlockSpec((ID, H), lambda s, tf: (0, 0)),               # road_emb (bf16 resident)
            pl.BlockSpec((B, S, H), lambda s, tf: (0, 0, 0)),          # encoder outputs [B,S,H]
            pl.BlockSpec((B, 1, S), lambda s, tf: (0, 0, 0)),          # attention mask
            pl.BlockSpec((B, T), lambda s, tf: (0, 0)),                # trg_id (resident)
            pl.BlockSpec((B, T), lambda s, tf: (0, 0)),                # trg_rate (resident)
            pl.BlockSpec((1, B, ID), lambda s, tf: (s + 1, 0, 0)),     # constraint_mat[t] (bf16 stream)
            pl.BlockSpec((H, 3 * H), lambda s, tf: (0, 0)),            # W_ih_emb
            pl.BlockSpec((1, 3 * H), lambda s, tf: (0, 0)),            # W_ih_rate row
            pl.BlockSpec((H, 3 * H), lambda s, tf: (0, 0)),            # W_ih_ctx
            pl.BlockSpec((H, 3 * H), lambda s, tf: (0, 0)),            # W_hh
            pl.BlockSpec((1, 3 * H), lambda s, tf: (0, 0)),            # b_ih
            pl.BlockSpec((1, 3 * H), lambda s, tf: (0, 0)),            # b_hh
            pl.BlockSpec((H, ID), lambda s, tf: (0, 0)),               # W_id(hidden)
            pl.BlockSpec((H, ID), lambda s, tf: (0, 0)),               # W_id(ctx)
            pl.BlockSpec((1, ID), lambda s, tf: (0, 0)),               # b_id
            pl.BlockSpec((H, 1), lambda s, tf: (0, 0)),                # W_rate(hidden)
            pl.BlockSpec((H, 1), lambda s, tf: (0, 0)),                # W_rate(ctx)
            pl.BlockSpec((1, 1), lambda s, tf: (0, 0)),                # b_rate
        ],
        out_specs=(pl.BlockSpec((1, B, ID), lambda s, tf: (s, 0, 0)),
                   pl.BlockSpec((1, B, 1), lambda s, tf: (s, 0, 0))),
        scratch_shapes=[pltpu.VMEM((B, H), f32),     # hidden
                        pltpu.VMEM((B, ID), bf16),   # one-hot current input id
                        pltpu.VMEM((B, 1), f32)],    # current input rate
    )
    return pl.pallas_call(
        kern,
        out_shape=(jax.ShapeDtypeStruct((T - 1, B, ID), f32),
                   jax.ShapeDtypeStruct((T - 1, B, 1), f32)),
        grid_spec=grid_spec,
        compiler_params=pltpu.CompilerParams(dimension_semantics=("arbitrary",),
                                             vmem_limit_bytes=_VMEM_LIMIT),
    )(tf_flags.astype(jnp.int32), enc_hidden.astype(f32), road_emb.astype(bf16),
      enc_bsh, attn_mask_b1s.astype(f32), idt_bt, ratet_bt, cons.astype(bf16),
      dw["wie"].astype(bf16), dw["wrate"].astype(f32), dw["wic"].astype(bf16),
      dw["whh"].astype(bf16), dw["bih"].astype(f32), dw["bhh"].astype(f32),
      dw["widh"].astype(bf16), dw["widc"].astype(bf16), dw["bid"].astype(f32),
      dw["wrh"].astype(bf16), dw["wrc"].astype(bf16), dw["br"].astype(f32))


# --------------------------------- forward pass ---------------------------------

def seq2seq_multi_forward(p, g, inp, rng, teacher_forcing_ratio=0.5):
    ID_SIZE, ID_EMB = p["emb_id"].shape
    HID = p["gnn_w2"].shape[1]
    src = inp["src"]                          # [S, B, 3]
    T = inp["trg_id"].shape[0]
    S, B, _ = src.shape
    tf_key, eps_key = jax.random.split(rng)

    # --- per-road grid-cell sequence -> GRU final hidden (self.grid) ---
    pad_rn_grid = g["pad_rn_grid"]            # [ID_SIZE, MAXG, 2]
    maxg = pad_rn_grid.shape[1]
    rn_flat = pad_rn_grid.reshape(-1, 2)
    grid_in = p["grid_id"][rn_flat[:, 0], rn_flat[:, 1], :]
    grid_in = jnp.transpose(grid_in.reshape(ID_SIZE, maxg, ID_EMB), (1, 0, 2))
    _, grid_emb_road = pallas_gru(grid_in, g["grid_len"],
                                  jnp.zeros((ID_SIZE, ID_EMB), jnp.float32),
                                  p["grid_wih"], p["grid_whh"], p["grid_bih"], p["grid_bhh"])

    # --- RoadGNN on subg (fused 2-layer GNN + mean readout) ---
    sub_ids = g["subg_ids"]
    input_emb = jax.nn.leaky_relu(p["emb_id"][sub_ids] + grid_emb_road[sub_ids],
                                  negative_slope=0.01)
    road_emb = pallas_gnn2(input_emb, g["subg_adj"], g["subg_readout"],
                           p["gnn_w1"], p["gnn_b1"], p["gnn_w2"], p["gnn_b2"])   # [ID, HID]

    # --- speed features path (speed_flag + noise_flag) ---
    # NOTE: speed_emb is unused downstream (as in the reference forward), so XLA may DCE it.
    speed_lin = jnp.dot(inp["speed"], p["speed_in_w"]) + p["speed_in_b"]
    input_speed = speed_lin[sub_ids]
    smask = (jnp.sum(input_speed, axis=1) != 0).astype(jnp.float32)
    input_speed = input_speed * smask[:, None]
    speed_emb = pallas_gnn2(input_speed, g["subg_adj"], g["subg_readout"],
                            p["sgnn_w1"], p["sgnn_b1"], p["sgnn_w2"], p["sgnn_b2"])
    hp = jax.nn.selu(jnp.dot(speed_emb, p["ps_fc1_w"]) + p["ps_fc1_b"])
    mu = jnp.dot(hp, p["ps_mu_w"]) + p["ps_mu_b"]
    logvar = jnp.dot(hp, p["ps_lv_w"]) + p["ps_lv_b"]
    eps = jax.random.normal(eps_key, mu.shape, dtype=jnp.float32)
    speed_emb = mu + eps * jnp.exp(0.5 * logvar)

    # --- constraint-graph weighted mean readout (dis_prob_mask_flag) ---
    input_cons = road_emb[g["cons_ids"]]
    cons_emb = jnp.dot(g["cons_readout"], input_cons)                 # [B*S, HID]
    cons_emb = jnp.transpose(cons_emb.reshape(B, S, HID), (1, 0, 2))

    # --- grid features for src (grid_flag) ---
    xy = src[:, :, :2].astype(jnp.int32).reshape(-1, 2)
    grid_feat = p["grid_id"][xy[:, 0], xy[:, 1], :].reshape(S, B, ID_EMB)
    src_cat = jnp.concatenate([cons_emb, grid_feat, src], axis=-1)

    # --- encoder (synthesized: projection + masked GRU, h0 from pro_features) ---
    # TODO(synk): reference encoder is an externally injected module; synthesized here.
    h0 = jnp.tanh(jnp.dot(inp["pro_features"], p["enc_pro_w"]) + p["enc_pro_b"])
    x_proj = jnp.tanh(jnp.dot(src_cat.reshape(S * B, -1), p["enc_in_w"])
                      + p["enc_in_b"]).reshape(S, B, HID)
    enc_outputs, enc_hidden = pallas_gru(x_proj, inp["src_len"], h0,
                                         p["enc_wih"], p["enc_whh"], p["enc_bih"], p["enc_bhh"])
    attn_mask_b1s = (jnp.arange(S)[None, None, :]
                     < inp["src_len"][:, None, None]).astype(jnp.float32)        # [B,1,S]

    # --- fused decoder loop (normal_step): one pallas_call, grid=(T-1,) ---
    # TODO(synk): reference decoder is an externally injected module; synthesized here.
    tf_flags = (jax.random.uniform(tf_key, (T - 1,)) < teacher_forcing_ratio).astype(jnp.int32)
    dw = dict(
        wie=p["dec_wih_e"][:HID], wrate=p["dec_wih_e"][HID:HID + 1].reshape(1, -1),
        wic=p["dec_wih_c"], whh=p["dec_whh"],
        bih=p["dec_bih"].reshape(1, -1), bhh=p["dec_bhh"].reshape(1, -1),
        widh=p["dec_wid_h"], widc=p["dec_wid_c"], bid=p["dec_bid"].reshape(1, -1),
        wrh=p["dec_wr_h"], wrc=p["dec_wr_c"], br=p["dec_br"].reshape(1, 1))
    pid_out, prate_out = pallas_decoder_loop(
        tf_flags, enc_hidden, road_emb, enc_outputs, attn_mask_b1s,
        inp["trg_id"], inp["trg_rate"], inp["constraint_mat_trg"], dw)          # [T-1,B,ID],[T-1,B,1]

    outputs_id = jnp.concatenate([jnp.zeros((1, B, ID_SIZE), jnp.float32), pid_out], axis=0)
    outputs_rate = jnp.concatenate([jnp.zeros((1, B, 1), jnp.float32), prate_out], axis=0)

    # mask positions past trg_len (matches normal_step post-processing)
    valid = jnp.arange(T)[:, None] < inp["trg_len"][None, :]             # [T, B]
    outputs_id = jnp.where(valid[:, :, None], outputs_id, -100.0)
    outputs_id = outputs_id.at[:, :, 0].set(jnp.where(valid, outputs_id[:, :, 0], 0.0))
    outputs_rate = jnp.where(valid[:, :, None], outputs_rate, 0.0)
    return outputs_id, outputs_rate, None


# --------------------------------- setup / main ---------------------------------

def init_params(key, cfg):
    ks = iter(jax.random.split(key, 64))

    def u(shape, lo=None, hi=None):
        if lo is None:
            s = 1.0 / (shape[0] ** 0.5)
            lo, hi = -s, s
        return jax.random.uniform(next(ks), shape, jnp.float32, lo, hi)

    ID, E, H = cfg["ID_SIZE"], cfg["ID_EMB"], cfg["HID"]
    SD, SH, H2 = cfg["SPEED_DIM"], cfg["SPEED_HID"], cfg["HID2"]
    PRO, ENC_IN = cfg["PRO"], cfg["HID"] + cfg["ID_EMB"] + 3
    DEC_E = H + 1
    p = {
        "emb_id": u((ID, E), 0.0, 1.0),
        "grid_id": u((cfg["G0"], cfg["G1"], E), 0.0, 1.0),
        "grid_wih": u((E, 3 * E)), "grid_whh": u((E, 3 * E)),
        "grid_bih": u((3 * E,)), "grid_bhh": u((3 * E,)),
        "gnn_w1": u((E, H)), "gnn_b1": u((H,)),
        "gnn_w2": u((H, H)), "gnn_b2": u((H,)),
        "speed_in_w": u((5, SD)), "speed_in_b": u((SD,)),
        "sgnn_w1": u((SD, SH)), "sgnn_b1": u((SH,)),
        "sgnn_w2": u((SH, SH)), "sgnn_b2": u((SH,)),
        "ps_fc1_w": u((SH, H2)), "ps_fc1_b": u((H2,)),
        "ps_mu_w": u((H2, SH)), "ps_mu_b": u((SH,)),
        "ps_lv_w": u((H2, SH)), "ps_lv_b": u((SH,)),
        "enc_pro_w": u((PRO, H)), "enc_pro_b": u((H,)),
        "enc_in_w": u((ENC_IN, H)), "enc_in_b": u((H,)),
        "enc_wih": u((H, 3 * H)), "enc_whh": u((H, 3 * H)),
        "enc_bih": u((3 * H,)), "enc_bhh": u((3 * H,)),
        "dec_wih_e": u((DEC_E, 3 * H)), "dec_wih_c": u((H, 3 * H)),
        "dec_whh": u((H, 3 * H)), "dec_bih": u((3 * H,)), "dec_bhh": u((3 * H,)),
        "dec_wid_h": u((H, ID)), "dec_wid_c": u((H, ID)), "dec_bid": u((ID,)),
        "dec_wr_h": u((H, 1)), "dec_wr_c": u((H, 1)), "dec_br": u((1,)),
    }
    return p


if __name__ == "__main__":
    cfg = dict(ID_SIZE=16, ID_EMB=16, HID=16, G0=8, G1=8, MAXG=4,
               SPEED_DIM=8, SPEED_HID=8, HID2=16, PRO=4, B=2, S=6, T=8)
    key = jax.random.PRNGKey(0)
    kp, kg, kd = jax.random.split(key, 3)
    params = init_params(kp, cfg)

    ID, B, S, T = cfg["ID_SIZE"], cfg["B"], cfg["S"], cfg["T"]

    # --- synthetic graph structures (deterministic) ---
    kg1, kg2, kg3, kg4 = jax.random.split(kg, 4)
    n_sub = 2 * ID
    seg = jnp.arange(n_sub) // 2
    subg_adj = (seg[:, None] == seg[None, :]).astype(jnp.float32)
    subg_adj = subg_adj / jnp.sum(subg_adj, axis=1, keepdims=True)
    subg_readout = (jnp.arange(ID)[:, None] == seg[None, :]).astype(jnp.float32)
    subg_readout = subg_readout / jnp.sum(subg_readout, axis=1, keepdims=True)
    subg_ids = jnp.where(jnp.arange(n_sub) % 2 == 0, seg, (seg + 1) % ID).astype(jnp.int32)

    NG, NPG = B * S, 3
    cons_seg = jnp.arange(NG * NPG) // NPG
    cons_ids = jax.random.randint(kg1, (NG * NPG,), 0, ID)
    cons_w = jax.random.uniform(kg2, (NG * NPG,), jnp.float32, 0.1, 1.0)
    cons_readout = ((jnp.arange(NG)[:, None] == cons_seg[None, :]).astype(jnp.float32)
                    * cons_w[None, :] / NPG)

    grid_len = jax.random.randint(kg3, (ID,), 1, cfg["MAXG"] + 1)
    coords = jax.random.randint(kg4, (ID, cfg["MAXG"], 2), 0, cfg["G0"])
    lm = (jnp.arange(cfg["MAXG"])[None, :] < grid_len[:, None])[:, :, None]
    pad_rn_grid = jnp.where(lm, coords, 0).astype(jnp.int32)

    graphs = dict(subg_adj=subg_adj, subg_readout=subg_readout, subg_ids=subg_ids,
                  cons_ids=cons_ids, cons_readout=cons_readout,
                  grid_len=grid_len, pad_rn_grid=pad_rn_grid)

    # --- synthetic model inputs (deterministic) ---
    k1, k2, k3, k4, k5, k6 = jax.random.split(kd, 6)
    sxy = jax.random.randint(k1, (S, B, 2), 0, cfg["G0"]).astype(jnp.float32)
    st = jnp.tile(jnp.arange(S, dtype=jnp.float32)[:, None, None], (1, B, 1))
    inputs = dict(
        src=jnp.concatenate([sxy, st], axis=-1),                     # [S, B, 3]
        src_len=jnp.array([S, S - 2], jnp.int32),
        speed=jax.random.uniform(k2, (ID, 5), jnp.float32),
        trg_id=jax.random.randint(k3, (T, B, 1), 0, ID),
        trg_rate=jax.random.uniform(k4, (T, B, 1), jnp.float32),
        trg_len=jnp.array([T, T - 2], jnp.int32),
        constraint_mat_trg=(jax.random.uniform(k5, (T, B, ID)) > 0.3).astype(jnp.float32),
        pro_features=jax.random.uniform(k6, (B, cfg["PRO"]), jnp.float32),
    )

    fwd = jax.jit(seq2seq_multi_forward)
    out_id, out_rate, _ = fwd(params, graphs, inputs, jax.random.PRNGKey(7), 0.5)
    jax.block_until_ready(out_id)
    jax.block_until_ready(out_rate)
    assert out_id.shape == (T, B, ID) and out_rate.shape == (T, B, 1)
    print("KERNEL_OK")
</pallas_src>

<mosaic_0001>
module attributes {stable_mosaic.version = 11 : i64} {
  func.func @_gru_kernel(%arg0: i32, %arg1: memref<4x16x16xbf16, #tpu.memory_space<vmem>>, %arg2: memref<16x1xf32, #tpu.memory_space<vmem>>, %arg3: memref<16x16xf32, #tpu.memory_space<vmem>>, %arg4: memref<16x48xbf16, #tpu.memory_space<vmem>>, %arg5: memref<16x48xbf16, #tpu.memory_space<vmem>>, %arg6: memref<1x48xf32, #tpu.memory_space<vmem>>, %arg7: memref<1x48xf32, #tpu.memory_space<vmem>>, %arg8: memref<4x16x16xf32, #tpu.memory_space<vmem>>, %arg9: memref<16x16xf32, #tpu.memory_space<vmem>>, %arg10: memref<16x16xf32, #tpu.memory_space<vmem>>) attributes {dimension_semantics = [#tpu.dimension_semantics<arbitrary>], iteration_bounds = array<i64: 1>, scalar_prefetch = 0 : i64, scratch_operands = 1 : i64, tpu.core_type = #tpu.core_type<tc>, window_params = [{transform_indices = @transform_0, window_bounds = array<i64: 4, 16, 16>}, {pipeline_mode = #tpu.pipeline_mode<synchronous>, transform_indices = @transform_1, window_bounds = array<i64: 16, 1>}, {pipeline_mode = #tpu.pipeline_mode<synchronous>, transform_indices = @transform_2, window_bounds = array<i64: 16, 16>}, {pipeline_mode = #tpu.pipeline_mode<synchronous>, transform_indices = @transform_3, window_bounds = array<i64: 16, 48>}, {pipeline_mode = #tpu.pipeline_mode<synchronous>, transform_indices = @transform_4, window_bounds = array<i64: 16, 48>}, {pipeline_mode = #tpu.pipeline_mode<synchronous>, transform_indices = @transform_5, window_bounds = array<i64: 1, 48>}, {pipeline_mode = #tpu.pipeline_mode<synchronous>, transform_indices = @transform_6, window_bounds = array<i64: 1, 48>}, {transform_indices = @transform_7, window_bounds = array<i64: 4, 16, 16>}, {pipeline_mode = #tpu.pipeline_mode<synchronous>, transform_indices = @transform_8, window_bounds = array<i64: 16, 16>}]} {
    %c0_i32 = arith.constant 0 : i32
    %0 = arith.cmpi eq, %arg0, %c0_i32 : i32
    %1 = arith.extui %0 : i1 to i32
    %c0_i32_0 = arith.constant 0 : i32
    %2 = arith.cmpi ne, %1, %c0_i32_0 : i32
    scf.if %2 {
      %c0_90 = arith.constant 0 : index
      %c0_91 = arith.constant 0 : index
      %244 = vector.load %arg3[%c0_90, %c0_91] : memref<16x16xf32, #tpu.memory_space<vmem>>, vector<16x16xf32>
      %c0_92 = arith.constant 0 : index
      %c0_93 = arith.constant 0 : index
      %245 = vector.load %arg10[%c0_92, %c0_93] : memref<16x16xf32, #tpu.memory_space<vmem>>, vector<16x16xf32>
      tpu.vector_store %arg10[%c0_92, %c0_93], %244 {strides = array<i32>} : memref<16x16xf32, #tpu.memory_space<vmem>>, vector<16x16xf32>,
    } else {
    }
    %c0 = arith.constant 0 : index
    %c0_1 = arith.constant 0 : index
    %3 = vector.load %arg10[%c0, %c0_1] : memref<16x16xf32, #tpu.memory_space<vmem>>, vector<16x16xf32>
    %c0_i32_2 = arith.constant 0 : i32
    %c4_i32 = arith.constant 4 : i32
    %4 = arith.muli %arg0, %c4_i32 : i32
    %5 = arith.addi %4, %c0_i32_2 : i32
    %6 = arith.index_cast %c0_i32_2 : i32 to index
    %c0_3 = arith.constant 0 : index
    %c0_4 = arith.constant 0 : index
    %7 = vector.load %arg1[%6, %c0_3, %c0_4] : memref<4x16x16xbf16, #tpu.memory_space<vmem>>, vector<1x16x16xbf16>
    %8 = vector.shape_cast %7 : vector<1x16x16xbf16> to vector<16x16xbf16>
    %c0_5 = arith.constant 0 : index
    %c0_6 = arith.constant 0 : index
    %9 = vector.load %arg4[%c0_5, %c0_6] : memref<16x48xbf16, #tpu.memory_space<vmem>>, vector<16x48xbf16>
    %cst = arith.constant dense<0.000000e+00> : vector<16x48xf32>
    %10 = tpu.matmul %8, %9, %cst {dimension_numbers = #tpu.dot_dimension_numbers<[1], [0], [0], [1], [0, 0, 1, 1], [], []>} : vector<16x16xbf16>, vector<16x48xbf16>, vector<16x48xf32> -> vector<16x48xf32>
    %c0_7 = arith.constant 0 : index
    %c0_8 = arith.constant 0 : index
    %11 = vector.load %arg6[%c0_7, %c0_8] : memref<1x48xf32, #tpu.memory_space<vmem>>, vector<1x48xf32>
    %12 = vector.broadcast %11 : vector<1x48xf32> to vector<16x48xf32>
    %13 = arith.addf %10, %12 : vector<16x48xf32>
    %14 = arith.truncf %3 : vector<16x16xf32> to vector<16x16xbf16>
    %c0_9 = arith.constant 0 : index
    %c0_10 = arith.constant 0 : index
    %15 = vector.load %arg5[%c0_9, %c0_10] : memref<16x48xbf16, #tpu.memory_space<vmem>>, vector<16x48xbf16>
    %cst_11 = arith.constant dense<0.000000e+00> : vector<16x48xf32>
    %16 = tpu.matmul %14, %15, %cst_11 {dimension_numbers = #tpu.dot_dimension_numbers<[1], [0], [0], [1], [0, 0, 1, 1], [], []>} : vector<16x16xbf16>, vector<16x48xbf16>, vector<16x48xf32> -> vector<16x48xf32>
    %c0_12 = arith.constant 0 : index
    %c0_13 = arith.constant 0 : index
    %17 = vector.load %arg7[%c0_12, %c0_13] : memref<1x48xf32, #tpu.memory_space<vmem>>, vector<1x48xf32>
    %18 = vector.broadcast %17 : vector<1x48xf32> to vector<16x48xf32>
    %19 = arith.addf %16, %18 : vector<16x48xf32>
    %20 = vector.extract_strided_slice %13 {offsets = [0, 0], sizes = [16, 16], strides = [1, 1]} : vector<16x48xf32> to vector<16x16xf32>
    %21 = vector.extract_strided_slice %19 {offsets = [0, 0], sizes = [16, 16], strides = [1, 1]} : vector<16x48xf32> to vector<16x16xf32>
    %22 = arith.addf %20, %21 : vector<16x16xf32>
    %23 = arith.negf %22 : vector<16x16xf32>
    %24 = math.exp %23 : vector<16x16xf32>
    %cst_14 = arith.constant 1.000000e+00 : f32
    %25 = vector.broadcast %cst_14 : f32 to vector<16x16xf32>
    %26 = arith.addf %25, %24 : vector<16x16xf32>
    %27 = arith.divf %25, %26 : vector<16x16xf32>
    %28 = vector.extract_strided_slice %13 {offsets = [0, 16], sizes = [16, 16], strides = [1, 1]} : vector<16x48xf32> to vector<16x16xf32>
    %29 = vector.extract_strided_slice %19 {offsets = [0, 16], sizes = [16, 16], strides = [1, 1]} : vector<16x48xf32> to vector<16x16xf32>
    %30 = arith.addf %28, %29 : vector<16x16xf32>
    %31 = arith.negf %30 : vector<16x16xf32>
    %32 = math.exp %31 : vector<16x16xf32>
    %cst_15 = arith.constant 1.000000e+00 : f32
    %33 = vector.broadcast %cst_15 : f32 to vector<16x16xf32>
    %34 = arith.addf %33, %32 : vector<16x16xf32>
    %35 = arith.divf %33, %34 : vector<16x16xf32>
    %36 = vector.extract_strided_slice %13 {offsets = [0, 32], sizes = [16, 16], strides = [1, 1]} : vector<16x48xf32> to vector<16x16xf32>
    %37 = vector.extract_strided_slice %19 {offsets = [0, 32], sizes = [16, 16], strides = [1, 1]} : vector<16x48xf32> to vector<16x16xf32>
    %38 = arith.mulf %27, %37 : vector<16x16xf32>
    %39 = arith.addf %36, %38 : vector<16x16xf32>
    %40 = math.tanh %39 : vector<16x16xf32>
    %cst_16 = arith.constant 1.000000e+00 : f32
    %41 = vector.broadcast %cst_16 : f32 to vector<16x16xf32>
    %42 = arith.subf %41, %35 : vector<16x16xf32>
    %43 = arith.mulf %42, %40 : vector<16x16xf32>
    %44 = arith.mulf %35, %3 : vector<16x16xf32>
    %45 = arith.addf %43, %44 : vector<16x16xf32>
    %c0_17 = arith.constant 0 : index
    %c0_18 = arith.constant 0 : index
    %46 = vector.load %arg2[%c0_17, %c0_18] : memref<16x1xf32, #tpu.memory_space<vmem>>, vector<16x1xf32>
    %47 = arith.sitofp %5 : i32 to f32
    %48 = vector.broadcast %47 : f32 to vector<16x1xf32>
    %49 = arith.cmpf ogt, %46, %48 : vector<16x1xf32>
    %50 = arith.extui %49 : vector<16x1xi1> to vector<16x1xi32>
    %51 = arith.sitofp %50 : vector<16x1xi32> to vector<16x1xf32>
    %52 = vector.broadcast %51 : vector<16x1xf32> to vector<16x16xf32>
    %53 = arith.mulf %52, %45 : vector<16x16xf32>
    %cst_19 = arith.constant 1.000000e+00 : f32
    %54 = vector.broadcast %cst_19 : f32 to vector<16x1xf32>
    %55 = arith.subf %54, %51 : vector<16x1xf32>
    %56 = vector.broadcast %55 : vector<16x1xf32> to vector<16x16xf32>
    %57 = arith.mulf %56, %3 : vector<16x16xf32>
    %58 = arith.addf %53, %57 : vector<16x16xf32>
    %59 = arith.index_cast %c0_i32_2 : i32 to index
    %c0_20 = arith.constant 0 : index
    %c0_21 = arith.constant 0 : index
    %60 = vector.load %arg8[%59, %c0_20, %c0_21] : memref<4x16x16xf32, #tpu.memory_space<vmem>>, vector<1x16x16xf32>
    %61 = vector.shape_cast %60 : vector<1x16x16xf32> to vector<16x16xf32>
    %62 = vector.shape_cast %58 : vector<16x16xf32> to vector<1x16x16xf32>
    tpu.vector_store %arg8[%59, %c0_20, %c0_21], %62 {strides = array<i32>} : memref<4x16x16xf32, #tpu.memory_space<vmem>>, vector<1x16x16xf32>,
    %c1_i32 = arith.constant 1 : i32
    %c4_i32_22 = arith.constant 4 : i32
    %63 = arith.muli %arg0, %c4_i32_22 : i32
    %64 = arith.addi %63, %c1_i32 : i32
    %65 = arith.index_cast %c1_i32 : i32 to index
    %c0_23 = arith.constant 0 : index
    %c0_24 = arith.constant 0 : index
    %66 = vector.load %arg1[%65, %c0_23, %c0_24] : memref<4x16x16xbf16, #tpu.memory_space<vmem>>, vector<1x16x16xbf16>
    %67 = vector.shape_cast %66 : vector<1x16x16xbf16> to vector<16x16xbf16>
    %c0_25 = arith.constant 0 : index
    %c0_26 = arith.constant 0 : index
    %68 = vector.load %arg4[%c0_25, %c0_26] : memref<16x48xbf16, #tpu.memory_space<vmem>>, vector<16x48xbf16>
    %cst_27 = arith.constant dense<0.000000e+00> : vector<16x48xf32>
    %69 = tpu.matmul %67, %68, %cst_27 {dimension_numbers = #tpu.dot_dimension_numbers<[1], [0], [0], [1], [0, 0, 1, 1], [], []>} : vector<16x16xbf16>, vector<16x48xbf16>, vector<16x48xf32> -> vector<16x48xf32>
    %c0_28 = arith.constant 0 : index
    %c0_29 = arith.constant 0 : index
    %70 = vector.load %arg6[%c0_28, %c0_29] : memref<1x48xf32, #tpu.memory_space<vmem>>, vector<1x48xf32>
    %71 = vector.broadcast %70 : vector<1x48xf32> to vector<16x48xf32>
    %72 = arith.addf %69, %71 : vector<16x48xf32>
    %73 = arith.truncf %58 : vector<16x16xf32> to vector<16x16xbf16>
    %c0_30 = arith.constant 0 : index
    %c0_31 = arith.constant 0 : index
    %74 = vector.load %arg5[%c0_30, %c0_31] : memref<16x48xbf16, #tpu.memory_space<vmem>>, vector<16x48xbf16>
    %cst_32 = arith.constant dense<0.000000e+00> : vector<16x48xf32>
    %75 = tpu.matmul %73, %74, %cst_32 {dimension_numbers = #tpu.dot_dimension_numbers<[1], [0], [0], [1], [0, 0, 1, 1], [], []>} : vector<16x16xbf16>, vector<16x48xbf16>, vector<16x48xf32> -> vector<16x48xf32>
    %c0_33 = arith.constant 0 : index
    %c0_34 = arith.constant 0 : index
    %76 = vector.load %arg7[%c0_33, %c0_34] : memref<1x48xf32, #tpu.memory_space<vmem>>, vector<1x48xf32>
    %77 = vector.broadcast %76 : vector<1x48xf32> to vector<16x48xf32>
    %78 = arith.addf %75, %77 : vector<16x48xf32>
    %79 = vector.extract_strided_slice %72 {offsets = [0, 0], sizes = [16, 16], strides = [1, 1]} : vector<16x48xf32> to vector<16x16xf32>
    %80 = vector.extract_strided_slice %78 {offsets = [0, 0], sizes = [16, 16], strides = [1, 1]} : vector<16x48xf32> to vector<16x16xf32>
    %81 = arith.addf %79, %80 : vector<16x16xf32>
    %82 = arith.negf %81 : vector<16x16xf32>
    %83 = math.exp %82 : vector<16x16xf32>
    %cst_35 = arith.constant 1.000000e+00 : f32
    %84 = vector.broadcast %cst_35 : f32 to vector<16x16xf32>
    %85 = arith.addf %84, %83 : vector<16x16xf32>
    %86 = arith.divf %84, %85 : vector<16x16xf32>
    %87 = vector.extract_strided_slice %72 {offsets = [0, 16], sizes = [16, 16], strides = [1, 1]} : vector<16x48xf32> to vector<16x16xf32>
    %88 = vector.extract_strided_slice %78 {offsets = [0, 16], sizes = [16, 16], strides = [1, 1]} : vector<16x48xf32> to vector<16x16xf32>
    %89 = arith.addf %87, %88 : vector<16x16xf32>
    %90 = arith.negf %89 : vector<16x16xf32>
    %91 = math.exp %90 : vector<16x16xf32>
    %cst_36 = arith.constant 1.000000e+00 : f32
    %92 = vector.broadcast %cst_36 : f32 to vector<16x16xf32>
    %93 = arith.addf %92, %91 : vector<16x16xf32>
    %94 = arith.divf %92, %93 : vector<16x16xf32>
    %95 = vector.extract_strided_slice %72 {offsets = [0, 32], sizes = [16, 16], strides = [1, 1]} : vector<16x48xf32> to vector<16x16xf32>
    %96 = vector.extract_strided_slice %78 {offsets = [0, 32], sizes = [16, 16], strides = [1, 1]} : vector<16x48xf32> to vector<16x16xf32>
    %97 = arith.mulf %86, %96 : vector<16x16xf32>
    %98 = arith.addf %95, %97 : vector<16x16xf32>
    %99 = math.tanh %98 : vector<16x16xf32>
    %cst_37 = arith.constant 1.000000e+00 : f32
    %100 = vector.broadcast %cst_37 : f32 to vector<16x16xf32>
    %101 = arith.subf %100, %94 : vector<16x16xf32>
    %102 = arith.mulf %101, %99 : vector<16x16xf32>
    %103 = arith.mulf %94, %58 : vector<16x16xf32>
    %104 = arith.addf %102, %103 : vector<16x16xf32>
    %c0_38 = arith.constant 0 : index
    %c0_39 = arith.constant 0 : index
    %105 = vector.load %arg2[%c0_38, %c0_39] : memref<16x1xf32, #tpu.memory_space<vmem>>, vector<16x1xf32>
    %106 = arith.sitofp %64 : i32 to f32
    %107 = vector.broadcast %106 : f32 to vector<16x1xf32>
    %108 = arith.cmpf ogt, %105, %107 : vector<16x1xf32>
    %109 = arith.extui %108 : vector<16x1xi1> to vector<16x1xi32>
    %110 = arith.sitofp %109 : vector<16x1xi32> to vector<16x1xf32>
    %111 = vector.broadcast %110 : vector<16x1xf32> to vector<16x16xf32>
    %112 = arith.mulf %111, %104 : vector<16x16xf32>
    %cst_40 = arith.constant 1.000000e+00 : f32
    %113 = vector.broadcast %cst_40 : f32 to vector<16x1xf32>
    %114 = arith.subf %113, %110 : vector<16x1xf32>
    %115 = vector.broadcast %114 : vector<16x1xf32> to vector<16x16xf32>
    %116 = arith.mulf %115, %58 : vector<16x16xf32>
    %117 = arith.addf %112, %116 : vector<16x16xf32>
    %118 = arith.index_cast %c1_i32 : i32 to index
    %c0_41 = arith.constant 0 : index
    %c0_42 = arith.constant 0 : index
    %119 = vector.load %arg8[%118, %c0_41, %c0_42] : memref<4x16x16xf32, #tpu.memory_space<vmem>>, vector<1x16x16xf32>
    %120 = vector.shape_cast %119 : vector<1x16x16xf32> to vector<16x16xf32>
    %121 = vector.shape_cast %117 : vector<16x16xf32> to vector<1x16x16xf32>
    tpu.vector_store %arg8[%118, %c0_41, %c0_42], %121 {strides = array<i32>} : memref<4x16x16xf32, #tpu.memory_space<vmem>>, vector<1x16x16xf32>,
    %c2_i32 = arith.constant 2 : i32
    %c4_i32_43 = arith.constant 4 : i32
    %122 = arith.muli %arg0, %c4_i32_43 : i32
    %123 = arith.addi %122, %c2_i32 : i32
    %124 = arith.index_cast %c2_i32 : i32 to index
    %c0_44 = arith.constant 0 : index
    %c0_45 = arith.constant 0 : index
    %125 = vector.load %arg1[%124, %c0_44, %c0_45] : memref<4x16x16xbf16, #tpu.memory_space<vmem>>, vector<1x16x16xbf16>
    %126 = vector.shape_cast %125 : vector<1x16x16xbf16> to vector<16x16xbf16>
    %c0_46 = arith.constant 0 : index
    %c0_47 = arith.constant 0 : index
    %127 = vector.load %arg4[%c0_46, %c0_47] : memref<16x48xbf16, #tpu.memory_space<vmem>>, vector<16x48xbf16>
    %cst_48 = arith.constant dense<0.000000e+00> : vector<16x48xf32>
    %128 = tpu.matmul %126, %127, %cst_48 {dimension_numbers = #tpu.dot_dimension_numbers<[1], [0], [0], [1], [0, 0, 1, 1], [], []>} : vector<16x16xbf16>, vector<16x48xbf16>, vector<16x48xf32> -> vector<16x48xf32>
    %c0_49 = arith.constant 0 : index
    %c0_50 = arith.constant 0 : index
    %129 = vector.load %arg6[%c0_49, %c0_50] : memref<1x48xf32, #tpu.memory_space<vmem>>, vector<1x48xf32>
    %130 = vector.broadcast %129 : vector<1x48xf32> to vector<16x48xf32>
    %131 = arith.addf %128, %130 : vector<16x48xf32>
    %132 = arith.truncf %117 : vector<16x16xf32> to vector<16x16xbf16>
    %c0_51 = arith.constant 0 : index
    %c0_52 = arith.constant 0 : index
    %133 = vector.load %arg5[%c0_51, %c0_52] : memref<16x48xbf16, #tpu.memory_space<vmem>>, vector<16x48xbf16>
    %cst_53 = arith.constant dense<0.000000e+00> : vector<16x48xf32>
    %134 = tpu.matmul %132, %133, %cst_53 {dimension_numbers = #tpu.dot_dimension_numbers<[1], [0], [0], [1], [0, 0, 1, 1], [], []>} : vector<16x16xbf16>, vector<16x48xbf16>, vector<16x48xf32> -> vector<16x48xf32>
    %c0_54 = arith.constant 0 : index
    %c0_55 = arith.constant 0 : index
    %135 = vector.load %arg7[%c0_54, %c0_55] : memref<1x48xf32, #tpu.memory_space<vmem>>, vector<1x48xf32>
    %136 = vector.broadcast %135 : vector<1x48xf32> to vector<16x48xf32>
    %137 = arith.addf %134, %136 : vector<16x48xf32>
    %138 = vector.extract_strided_slice %131 {offsets = [0, 0], sizes = [16, 16], strides = [1, 1]} : vector<16x48xf32> to vector<16x16xf32>
    %139 = vector.extract_strided_slice %137 {offsets = [0, 0], sizes = [16, 16], strides = [1, 1]} : vector<16x48xf32> to vector<16x16xf32>
    %140 = arith.addf %138, %139 : vector<16x16xf32>
    %141 = arith.negf %140 : vector<16x16xf32>
    %142 = math.exp %141 : vector<16x16xf32>
    %cst_56 = arith.constant 1.000000e+00 : f32
    %143 = vector.broadcast %cst_56 : f32 to vector<16x16xf32>
    %144 = arith.addf %143, %142 : vector<16x16xf32>
    %145 = arith.divf %143, %144 : vector<16x16xf32>
    %146 = vector.extract_strided_slice %131 {offsets = [0, 16], sizes = [16, 16], strides = [1, 1]} : vector<16x48xf32> to vector<16x16xf32>
    %147 = vector.extract_strided_slice %137 {offsets = [0, 16], sizes = [16, 16], strides = [1, 1]} : vector<16x48xf32> to vector<16x16xf32>
    %148 = arith.addf %146, %147 : vector<16x16xf32>
    %149 = arith.negf %148 : vector<16x16xf32>
    %150 = math.exp %149 : vector<16x16xf32>
    %cst_57 = arith.constant 1.000000e+00 : f32
    %151 = vector.broadcast %cst_57 : f32 to vector<16x16xf32>
    %152 = arith.addf %151, %150 : vector<16x16xf32>
    %153 = arith.divf %151, %152 : vector<16x16xf32>
    %154 = vector.extract_strided_slice %131 {offsets = [0, 32], sizes = [16, 16], strides = [1, 1]} : vector<16x48xf32> to vector<16x16xf32>
    %155 = vector.extract_strided_slice %137 {offsets = [0, 32], sizes = [16, 16], strides = [1, 1]} : vector<16x48xf32> to vector<16x16xf32>
    %156 = arith.mulf %145, %155 : vector<16x16xf32>
    %157 = arith.addf %154, %156 : vector<16x16xf32>
    %158 = math.tanh %157 : vector<16x16xf32>
    %cst_58 = arith.constant 1.000000e+00 : f32
    %159 = vector.broadcast %cst_58 : f32 to vector<16x16xf32>
    %160 = arith.subf %159, %153 : vector<16x16xf32>
    %161 = arith.mulf %160, %158 : vector<16x16xf32>
    %162 = arith.mulf %153, %117 : vector<16x16xf32>
    %163 = arith.addf %161, %162 : vector<16x16xf32>
    %c0_59 = arith.constant 0 : index
    %c0_60 = arith.constant 0 : index
    %164 = vector.load %arg2[%c0_59, %c0_60] : memref<16x1xf32, #tpu.memory_space<vmem>>, vector<16x1xf32>
    %165 = arith.sitofp %123 : i32 to f32
    %166 = vector.broadcast %165 : f32 to vector<16x1xf32>
    %167 = arith.cmpf ogt, %164, %166 : vector<16x1xf32>
    %168 = arith.extui %167 : vector<16x1xi1> to vector<16x1xi32>
    %169 = arith.sitofp %168 : vector<16x1xi32> to vector<16x1xf32>
    %170 = vector.broadcast %169 : vector<16x1xf32> to vector<16x16xf32>
    %171 = arith.mulf %170, %163 : vector<16x16xf32>
    %cst_61 = arith.constant 1.000000e+00 : f32
    %172 = vector.broadcast %cst_61 : f32 to vector<16x1xf32>
    %173 = arith.subf %172, %169 : vector<16x1xf32>
    %174 = vector.broadcast %173 : vector<16x1xf32> to vector<16x16xf32>
    %175 = arith.mulf %174, %117 : vector<16x16xf32>
    %176 = arith.addf %171, %175 : vector<16x16xf32>
    %177 = arith.index_cast %c2_i32 : i32 to index
    %c0_62 = arith.constant 0 : index
    %c0_63 = arith.constant 0 : index
    %178 = vector.load %arg8[%177, %c0_62, %c0_63] : memref<4x16x16xf32, #tpu.memory_space<vmem>>, vector<1x16x16xf32>
    %179 = vector.shape_cast %178 : vector<1x16x16xf32> to vector<16x16xf32>
    %180 = vector.shape_cast %176 : vector<16x16xf32> to vector<1x16x16xf32>
    tpu.vector_store %arg8[%177, %c0_62, %c0_63], %180 {strides = array<i32>} : memref<4x16x16xf32, #tpu.memory_space<vmem>>, vector<1x16x16xf32>,
    %c3_i32 = arith.constant 3 : i32
    %c4_i32_64 = arith.constant 4 : i32
    %181 = arith.muli %arg0, %c4_i32_64 : i32
    %182 = arith.addi %181, %c3_i32 : i32
    %183 = arith.index_cast %c3_i32 : i32 to index
    %c0_65 = arith.constant 0 : index
    %c0_66 = arith.constant 0 : index
    %184 = vector.load %arg1[%183, %c0_65, %c0_66] : memref<4x16x16xbf16, #tpu.memory_space<vmem>>, vector<1x16x16xbf16>
    %185 = vector.shape_cast %184 : vector<1x16x16xbf16> to vector<16x16xbf16>
    %c0_67 = arith.constant 0 : index
    %c0_68 = arith.constant 0 : index
    %186 = vector.load %arg4[%c0_67, %c0_68] : memref<16x48xbf16, #tpu.memory_space<vmem>>, vector<16x48xbf16>
    %cst_69 = arith.constant dense<0.000000e+00> : vector<16x48xf32>
    %187 = tpu.matmul %185, %186, %cst_69 {dimension_numbers = #tpu.dot_dimension_numbers<[1], [0], [0], [1], [0, 0, 1, 1], [], []>} : vector<16x16xbf16>, vector<16x48xbf16>, vector<16x48xf32> -> vector<16x48xf32>
    %c0_70 = arith.constant 0 : index
    %c0_71 = arith.constant 0 : index
    %188 = vector.load %arg6[%c0_70, %c0_71] : memref<1x48xf32, #tpu.memory_space<vmem>>, vector<1x48xf32>
    %189 = vector.broadcast %188 : vector<1x48xf32> to vector<16x48xf32>
    %190 = arith.addf %187, %189 : vector<16x48xf32>
    %191 = arith.truncf %176 : vector<16x16xf32> to vector<16x16xbf16>
    %c0_72 = arith.constant 0 : index
    %c0_73 = arith.constant 0 : index
    %192 = vector.load %arg5[%c0_72, %c0_73] : memref<16x48xbf16, #tpu.memory_space<vmem>>, vector<16x48xbf16>
    %cst_74 = arith.constant dense<0.000000e+00> : vector<16x48xf32>
    %193 = tpu.matmul %191, %192, %cst_74 {dimension_numbers = #tpu.dot_dimension_numbers<[1], [0], [0], [1], [0, 0, 1, 1], [], []>} : vector<16x16xbf16>, vector<16x48xbf16>, vector<16x48xf32> -> vector<16x48xf32>
    %c0_75 = arith.constant 0 : index
    %c0_76 = arith.constant 0 : index
    %194 = vector.load %arg7[%c0_75, %c0_76] : memref<1x48xf32, #tpu.memory_space<vmem>>, vector<1x48xf32>
    %195 = vector.broadcast %194 : vector<1x48xf32> to vector<16x48xf32>
    %196 = arith.addf %193, %195 : vector<16x48xf32>
    %197 = vector.extract_strided_slice %190 {offsets = [0, 0], sizes = [16, 16], strides = [1, 1]} : vector<16x48xf32> to vector<16x16xf32>
    %198 = vector.extract_strided_slice %196 {offsets = [0, 0], sizes = [16, 16], strides = [1, 1]} : vector<16x48xf32> to vector<16x16xf32>
    %199 = arith.addf %197, %198 : vector<16x16xf32>
    %200 = arith.negf %199 : vector<16x16xf32>
    %201 = math.exp %200 : vector<16x16xf32>
    %cst_77 = arith.constant 1.000000e+00 : f32
    %202 = vector.broadcast %cst_77 : f32 to vector<16x16xf32>
    %203 = arith.addf %202, %201 : vector<16x16xf32>
    %204 = arith.divf %202, %203 : vector<16x16xf32>
    %205 = vector.extract_strided_slice %190 {offsets = [0, 16], sizes = [16, 16], strides = [1, 1]} : vector<16x48xf32> to vector<16x16xf32>
    %206 = vector.extract_strided_slice %196 {offsets = [0, 16], sizes = [16, 16], strides = [1, 1]} : vector<16x48xf32> to vector<16x16xf32>
    %207 = arith.addf %205, %206 : vector<16x16xf32>
    %208 = arith.negf %207 : vector<16x16xf32>
    %209 = math.exp %208 : vector<16x16xf32>
    %cst_78 = arith.constant 1.000000e+00 : f32
    %210 = vector.broadcast %cst_78 : f32 to vector<16x16xf32>
    %211 = arith.addf %210, %209 : vector<16x16xf32>
    %212 = arith.divf %210, %211 : vector<16x16xf32>
    %213 = vector.extract_strided_slice %190 {offsets = [0, 32], sizes = [16, 16], strides = [1, 1]} : vector<16x48xf32> to vector<16x16xf32>
    %214 = vector.extract_strided_slice %196 {offsets = [0, 32], sizes = [16, 16], strides = [1, 1]} : vector<16x48xf32> to vector<16x16xf32>
    %215 = arith.mulf %204, %214 : vector<16x16xf32>
    %216 = arith.addf %213, %215 : vector<16x16xf32>
    %217 = math.tanh %216 : vector<16x16xf32>
    %cst_79 = arith.constant 1.000000e+00 : f32
    %218 = vector.broadcast %cst_79 : f32 to vector<16x16xf32>
    %219 = arith.subf %218, %212 : vector<16x16xf32>
    %220 = arith.mulf %219, %217 : vector<16x16xf32>
    %221 = arith.mulf %212, %176 : vector<16x16xf32>
    %222 = arith.addf %220, %221 : vector<16x16xf32>
    %c0_80 = arith.constant 0 : index
    %c0_81 = arith.constant 0 : index
    %223 = vector.load %arg2[%c0_80, %c0_81] : memref<16x1xf32, #tpu.memory_space<vmem>>, vector<16x1xf32>
    %224 = arith.sitofp %182 : i32 to f32
    %225 = vector.broadcast %224 : f32 to vector<16x1xf32>
    %226 = arith.cmpf ogt, %223, %225 : vector<16x1xf32>
    %227 = arith.extui %226 : vector<16x1xi1> to vector<16x1xi32>
    %228 = arith.sitofp %227 : vector<16x1xi32> to vector<16x1xf32>
    %229 = vector.broadcast %228 : vector<16x1xf32> to vector<16x16xf32>
    %230 = arith.mulf %229, %222 : vector<16x16xf32>
    %cst_82 = arith.constant 1.000000e+00 : f32
    %231 = vector.broadcast %cst_82 : f32 to vector<16x1xf32>
    %232 = arith.subf %231, %228 : vector<16x1xf32>
    %233 = vector.broadcast %232 : vector<16x1xf32> to vector<16x16xf32>
    %234 = arith.mulf %233, %176 : vector<16x16xf32>
    %235 = arith.addf %230, %234 : vector<16x16xf32>
    %236 = arith.index_cast %c3_i32 : i32 to index
    %c0_83 = arith.constant 0 : index
    %c0_84 = arith.constant 0 : index
    %237 = vector.load %arg8[%236, %c0_83, %c0_84] : memref<4x16x16xf32, #tpu.memory_space<vmem>>, vector<1x16x16xf32>
    %238 = vector.shape_cast %237 : vector<1x16x16xf32> to vector<16x16xf32>
    %239 = vector.shape_cast %235 : vector<16x16xf32> to vector<1x16x16xf32>
    tpu.vector_store %arg8[%236, %c0_83, %c0_84], %239 {strides = array<i32>} : memref<4x16x16xf32, #tpu.memory_space<vmem>>, vector<1x16x16xf32>,
    %c4_i32_85 = arith.constant 4 : i32
    %c0_86 = arith.constant 0 : index
    %c0_87 = arith.constant 0 : index
    %240 = vector.load %arg10[%c0_86, %c0_87] : memref<16x16xf32, #tpu.memory_space<vmem>>, vector<16x16xf32>
    tpu.vector_store %arg10[%c0_86, %c0_87], %235 {strides = array<i32>} : memref<16x16xf32, #tpu.memory_space<vmem>>, vector<16x16xf32>,
    %c0_i32_88 = arith.constant 0 : i32
    %241 = arith.cmpi eq, %arg0, %c0_i32_88 : i32
    %242 = arith.extui %241 : i1 to i32
    %c0_i32_89 = arith.constant 0 : i32
    %243 = arith.cmpi ne, %242, %c0_i32_89 : i32
    scf.if %243 {
      %c0_90 = arith.constant 0 : index
      %c0_91 = arith.constant 0 : index
      %244 = vector.load %arg9[%c0_90, %c0_91] : memref<16x16xf32, #tpu.memory_space<vmem>>, vector<16x16xf32>
      tpu.vector_store %arg9[%c0_90, %c0_91], %235 {strides = array<i32>} : memref<16x16xf32, #tpu.memory_space<vmem>>, vector<16x16xf32>,
    } else {
    }
    return
  }
  func.func @transform_0(%arg0: i32) -> (i32, i32, i32) {
    %c0_i32 = arith.constant 0 : i32
    %c0_i32_0 = arith.constant 0 : i32
    %c0_i32_1 = arith.constant 0 : i32
    return %arg0, %c0_i32, %c0_i32_0 : i32, i32, i32
  }
  func.func @transform_1(%arg0: i32) -> (i32, i32) {
    %c0_i32 = arith.constant 0 : i32
    %c0_i32_0 = arith.constant 0 : i32
    %c0_i32_1 = arith.constant 0 : i32
    return %c0_i32, %c0_i32_0 : i32, i32
  }
  func.func @transform_2(%arg0: i32) -> (i32, i32) {
    %c0_i32 = arith.constant 0 : i32
    %c0_i32_0 = arith.constant 0 : i32
    %c0_i32_1 = arith.constant 0 : i32
    return %c0_i32, %c0_i32_0 : i32, i32
  }
  func.func @transform_3(%arg0: i32) -> (i32, i32) {
    %c0_i32 = arith.constant 0 : i32
    %c0_i32_0 = arith.constant 0 : i32
    %c0_i32_1 = arith.constant 0 : i32
    return %c0_i32, %c0_i32_0 : i32, i32
  }
  func.func @transform_4(%arg0: i32) -> (i32, i32) {
    %c0_i32 = arith.constant 0 : i32
    %c0_i32_0 = arith.constant 0 : i32
    %c0_i32_1 = arith.constant 0 : i32
    return %c0_i32, %c0_i32_0 : i32, i32
  }
  func.func @transform_5(%arg0: i32) -> (i32, i32) {
    %c0_i32 = arith.constant 0 : i32
    %c0_i32_0 = arith.constant 0 : i32
    %c0_i32_1 = arith.constant 0 : i32
    return %c0_i32, %c0_i32_0 : i32, i32
  }
  func.func @transform_6(%arg0: i32) -> (i32, i32) {
    %c0_i32 = arith.constant 0 : i32
    %c0_i32_0 = arith.constant 0 : i32
    %c0_i32_1 = arith.constant 0 : i32
    return %c0_i32, %c0_i32_0 : i32, i32
  }
  func.func @transform_7(%arg0: i32) -> (i32, i32, i32) {
    %c0_i32 = arith.constant 0 : i32
    %c0_i32_0 = arith.constant 0 : i32
    %c0_i32_1 = arith.constant 0 : i32
    return %arg0, %c0_i32, %c0_i32_0 : i32, i32, i32
  }
  func.func @transform_8(%arg0: i32) -> (i32, i32) {
    %c0_i32 = arith.constant 0 : i32
    %c0_i32_0 = arith.constant 0 : i32
    %c0_i32_1 = arith.constant 0 : i32
    return %c0_i32, %c0_i32_0 : i32, i32
  }
}

module attributes {stable_mosaic.version = 11 : i64} {
  func.func @_gnn_kernel(%arg0: i32, %arg1: memref<32x16xbf16, #tpu.memory_space<vmem>>, %arg2: memref<32x32xbf16, #tpu.memory_space<vmem>>, %arg3: memref<16x32xbf16, #tpu.memory_space<vmem>>, %arg4: memref<16x16xbf16, #tpu.memory_space<vmem>>, %arg5: memref<1x16xf32, #tpu.memory_space<vmem>>, %arg6: memref<16x16xbf16, #tpu.memory_space<vmem>>, %arg7: memref<1x16xf32, #tpu.memory_space<vmem>>, %arg8: memref<16x16xf32, #tpu.memory_space<vmem>>) attributes {dimension_semantics = [#tpu.dimension_semantics<arbitrary>], iteration_bounds = array<i64: 1>, scalar_prefetch = 0 : i64, scratch_operands = 0 : i64, tpu.core_type = #tpu.core_type<tc>, window_params = [{pipeline_mode = #tpu.pipeline_mode<synchronous>, transform_indices = @transform_0, window_bounds = array<i64: 32, 16>}, {pipeline_mode = #tpu.pipeline_mode<synchronous>, transform_indices = @transform_1, window_bounds = array<i64: 32, 32>}, {pipeline_mode = #tpu.pipeline_mode<synchronous>, transform_indices = @transform_2, window_bounds = array<i64: 16, 32>}, {pipeline_mode = #tpu.pipeline_mode<synchronous>, transform_indices = @transform_3, window_bounds = array<i64: 16, 16>}, {pipeline_mode = #tpu.pipeline_mode<synchronous>, transform_indices = @transform_4, window_bounds = array<i64: 1, 16>}, {pipeline_mode = #tpu.pipeline_mode<synchronous>, transform_indices = @transform_5, window_bounds = array<i64: 16, 16>}, {pipeline_mode = #tpu.pipeline_mode<synchronous>, transform_indices = @transform_6, window_bounds = array<i64: 1, 16>}, {pipeline_mode = #tpu.pipeline_mode<synchronous>, transform_indices = @transform_7, window_bounds = array<i64: 16, 16>}]} {
    %c0 = arith.constant 0 : index
    %c0_0 = arith.constant 0 : index
    %0 = vector.load %arg2[%c0, %c0_0] : memref<32x32xbf16, #tpu.memory_space<vmem>>, vector<32x32xbf16>
    %c0_1 = arith.constant 0 : index
    %c0_2 = arith.constant 0 : index
    %1 = vector.load %arg1[%c0_1, %c0_2] : memref<32x16xbf16, #tpu.memory_space<vmem>>, vector<32x16xbf16>
    %cst = arith.constant dense<0.000000e+00> : vector<32x16xf32>
    %2 = tpu.matmul %0, %1, %cst {dimension_numbers = #tpu.dot_dimension_numbers<[1], [0], [0], [1], [0, 0, 1, 1], [], []>} : vector<32x32xbf16>, vector<32x16xbf16>, vector<32x16xf32> -> vector<32x16xf32>
    %3 = arith.truncf %2 : vector<32x16xf32> to vector<32x16xbf16>
    %c0_3 = arith.constant 0 : index
    %c0_4 = arith.constant 0 : index
    %4 = vector.load %arg4[%c0_3, %c0_4] : memref<16x16xbf16, #tpu.memory_space<vmem>>, vector<16x16xbf16>
    %cst_5 = arith.constant dense<0.000000e+00> : vector<32x16xf32>
    %5 = tpu.matmul %3, %4, %cst_5 {dimension_numbers = #tpu.dot_dimension_numbers<[1], [0], [0], [1], [0, 0, 1, 1], [], []>} : vector<32x16xbf16>, vector<16x16xbf16>, vector<32x16xf32> -> vector<32x16xf32>
    %c0_6 = arith.constant 0 : index
    %c0_7 = arith.constant 0 : index
    %6 = vector.load %arg5[%c0_6, %c0_7] : memref<1x16xf32, #tpu.memory_space<vmem>>, vector<1x16xf32>
    %7 = vector.broadcast %6 : vector<1x16xf32> to vector<32x16xf32>
    %8 = arith.addf %5, %7 : vector<32x16xf32>
    %cst_8 = arith.constant 0.000000e+00 : f32
    %9 = vector.broadcast %cst_8 : f32 to vector<32x16xf32>
    %10 = arith.maximumf %8, %9 : vector<32x16xf32>
    %11 = arith.truncf %10 : vector<32x16xf32> to vector<32x16xbf16>
    %cst_9 = arith.constant dense<0.000000e+00> : vector<32x16xf32>
    %12 = tpu.matmul %0, %11, %cst_9 {dimension_numbers = #tpu.dot_dimension_numbers<[1], [0], [0], [1], [0, 0, 1, 1], [], []>} : vector<32x32xbf16>, vector<32x16xbf16>, vector<32x16xf32> -> vector<32x16xf32>
    %13 = arith.truncf %12 : vector<32x16xf32> to vector<32x16xbf16>
    %c0_10 = arith.constant 0 : index
    %c0_11 = arith.constant 0 : index
    %14 = vector.load %arg6[%c0_10, %c0_11] : memref<16x16xbf16, #tpu.memory_space<vmem>>, vector<16x16xbf16>
    %cst_12 = arith.constant dense<0.000000e+00> : vector<32x16xf32>
    %15 = tpu.matmul %13, %14, %cst_12 {dimension_numbers = #tpu.dot_dimension_numbers<[1], [0], [0], [1], [0, 0, 1, 1], [], []>} : vector<32x16xbf16>, vector<16x16xbf16>, vector<32x16xf32> -> vector<32x16xf32>
    %c0_13 = arith.constant 0 : index
    %c0_14 = arith.constant 0 : index
    %16 = vector.load %arg7[%c0_13, %c0_14] : memref<1x16xf32, #tpu.memory_space<vmem>>, vector<1x16xf32>
    %17 = vector.broadcast %16 : vector<1x16xf32> to vector<32x16xf32>
    %18 = arith.addf %15, %17 : vector<32x16xf32>
    %cst_15 = arith.constant 0.000000e+00 : f32
    %19 = vector.broadcast %cst_15 : f32 to vector<32x16xf32>
    %20 = arith.maximumf %18, %19 : vector<32x16xf32>
    %c0_16 = arith.constant 0 : index
    %c0_17 = arith.constant 0 : index
    %21 = vector.load %arg3[%c0_16, %c0_17] : memref<16x32xbf16, #tpu.memory_space<vmem>>, vector<16x32xbf16>
    %22 = arith.truncf %20 : vector<32x16xf32> to vector<32x16xbf16>
    %cst_18 = arith.constant dense<0.000000e+00> : vector<16x16xf32>
    %23 = tpu.matmul %21, %22, %cst_18 {dimension_numbers = #tpu.dot_dimension_numbers<[1], [0], [0], [1], [0, 0, 1, 1], [], []>} : vector<16x32xbf16>, vector<32x16xbf16>, vector<16x16xf32> -> vector<16x16xf32>
    %c0_19 = arith.constant 0 : index
    %c0_20 = arith.constant 0 : index
    %24 = vector.load %arg8[%c0_19, %c0_20] : memref<16x16xf32, #tpu.memory_space<vmem>>, vector<16x16xf32>
    tpu.vector_store %arg8[%c0_19, %c0_20], %23 {strides = array<i32>} : memref<16x16xf32, #tpu.memory_space<vmem>>, vector<16x16xf32>,
    return
  }
  func.func @transform_0(%arg0: i32) -> (i32, i32) {
    %c0_i32 = arith.constant 0 : i32
    %c0_i32_0 = arith.constant 0 : i32
    %c0_i32_1 = arith.constant 0 : i32
    return %c0_i32, %c0_i32_0 : i32, i32
  }
  func.func @transform_1(%arg0: i32) -> (i32, i32) {
    %c0_i32 = arith.constant 0 : i32
    %c0_i32_0 = arith.constant 0 : i32
    %c0_i32_1 = arith.constant 0 : i32
    return %c0_i32, %c0_i32_0 : i32, i32
  }
  func.func @transform_2(%arg0: i32) -> (i32, i32) {
    %c0_i32 = arith.constant 0 : i32
    %c0_i32_0 = arith.constant 0 : i32
    %c0_i32_1 = arith.constant 0 : i32
    return %c0_i32, %c0_i32_0 : i32, i32
  }
  func.func @transform_3(%arg0: i32) -> (i32, i32) {
    %c0_i32 = arith.constant 0 : i32
    %c0_i32_0 = arith.constant 0 : i32
    %c0_i32_1 = arith.constant 0 : i32
    return %c0_i32, %c0_i32_0 : i32, i32
  }
  func.func @transform_4(%arg0: i32) -> (i32, i32) {
    %c0_i32 = arith.constant 0 : i32
    %c0_i32_0 = arith.constant 0 : i32
    %c0_i32_1 = arith.constant 0 : i32
    return %c0_i32, %c0_i32_0 : i32, i32
  }
  func.func @transform_5(%arg0: i32) -> (i32, i32) {
    %c0_i32 = arith.constant 0 : i32
    %c0_i32_0 = arith.constant 0 : i32
    %c0_i32_1 = arith.constant 0 : i32
    return %c0_i32, %c0_i32_0 : i32, i32
  }
  func.func @transform_6(%arg0: i32) -> (i32, i32) {
    %c0_i32 = arith.constant 0 : i32
    %c0_i32_0 = arith.constant 0 : i32
    %c0_i32_1 = arith.constant 0 : i32
    return %c0_i32, %c0_i32_0 : i32, i32
  }
  func.func @transform_7(%arg0: i32) -> (i32, i32) {
    %c0_i32 = arith.constant 0 : i32
    %c0_i32_0 = arith.constant 0 : i32
    %c0_i32_1 = arith.constant 0 : i32
    return %c0_i32, %c0_i32_0 : i32, i32
  }
}

module attributes {stable_mosaic.version = 11 : i64} {
  func.func @_gru_kernel(%arg0: i32, %arg1: memref<4x2x16xbf16, #tpu.memory_space<vmem>>, %arg2: memref<2x1xf32, #tpu.memory_space<vmem>>, %arg3: memref<2x16xf32, #tpu.memory_space<vmem>>, %arg4: memref<16x48xbf16, #tpu.memory_space<vmem>>, %arg5: memref<16x48xbf16, #tpu.memory_space<vmem>>, %arg6: memref<1x48xf32, #tpu.memory_space<vmem>>, %arg7: memref<1x48xf32, #tpu.memory_space<vmem>>, %arg8: memref<4x2x16xf32, #tpu.memory_space<vmem>>, %arg9: memref<2x16xf32, #tpu.memory_space<vmem>>, %arg10: memref<2x16xf32, #tpu.memory_space<vmem>>) attributes {dimension_semantics = [#tpu.dimension_semantics<arbitrary>], iteration_bounds = array<i64: 2>, scalar_prefetch = 0 : i64, scratch_operands = 1 : i64, tpu.core_type = #tpu.core_type<tc>, window_params = [{transform_indices = @transform_0, window_bounds = array<i64: 4, 2, 16>}, {pipeline_mode = #tpu.pipeline_mode<synchronous>, transform_indices = @transform_1, window_bounds = array<i64: 2, 1>}, {pipeline_mode = #tpu.pipeline_mode<synchronous>, transform_indices = @transform_2, window_bounds = array<i64: 2, 16>}, {pipeline_mode = #tpu.pipeline_mode<synchronous>, transform_indices = @transform_3, window_bounds = array<i64: 16, 48>}, {pipeline_mode = #tpu.pipeline_mode<synchronous>, transform_indices = @transform_4, window_bounds = array<i64: 16, 48>}, {pipeline_mode = #tpu.pipeline_mode<synchronous>, transform_indices = @transform_5, window_bounds = array<i64: 1, 48>}, {pipeline_mode = #tpu.pipeline_mode<synchronous>, transform_indices = @transform_6, window_bounds = array<i64: 1, 48>}, {transform_indices = @transform_7, window_bounds = array<i64: 4, 2, 16>}, {pipeline_mode = #tpu.pipeline_mode<synchronous>, transform_indices = @transform_8, window_bounds = array<i64: 2, 16>}]} {
    %c0_i32 = arith.constant 0 : i32
    %0 = arith.cmpi eq, %arg0, %c0_i32 : i32
    %1 = arith.extui %0 : i1 to i32
    %c0_i32_0 = arith.constant 0 : i32
    %2 = arith.cmpi ne, %1, %c0_i32_0 : i32
    scf.if %2 {
      %c0_90 = arith.constant 0 : index
      %c0_91 = arith.constant 0 : index
      %244 = vector.load %arg3[%c0_90, %c0_91] : memref<2x16xf32, #tpu.memory_space<vmem>>, vector<2x16xf32>
      %c0_92 = arith.constant 0 : index
      %c0_93 = arith.constant 0 : index
      %245 = vector.load %arg10[%c0_92, %c0_93] : memref<2x16xf32, #tpu.memory_space<vmem>>, vector<2x16xf32>
      tpu.vector_store %arg10[%c0_92, %c0_93], %244 {strides = array<i32>} : memref<2x16xf32, #tpu.memory_space<vmem>>, vector<2x16xf32>,
    } else {
    }
    %c0 = arith.constant 0 : index
    %c0_1 = arith.constant 0 : index
    %3 = vector.load %arg10[%c0, %c0_1] : memref<2x16xf32, #tpu.memory_space<vmem>>, vector<2x16xf32>
    %c0_i32_2 = arith.constant 0 : i32
    %c4_i32 = arith.constant 4 : i32
    %4 = arith.muli %arg0, %c4_i32 : i32
    %5 = arith.addi %4, %c0_i32_2 : i32
    %6 = arith.index_cast %c0_i32_2 : i32 to index
    %c0_3 = arith.constant 0 : index
    %c0_4 = arith.constant 0 : index
    %7 = vector.load %arg1[%6, %c0_3, %c0_4] : memref<4x2x16xbf16, #tpu.memory_space<vmem>>, vector<1x2x16xbf16>
    %8 = vector.shape_cast %7 : vector<1x2x16xbf16> to vector<2x16xbf16>
    %c0_5 = arith.constant 0 : index
    %c0_6 = arith.constant 0 : index
    %9 = vector.load %arg4[%c0_5, %c0_6] : memref<16x48xbf16, #tpu.memory_space<vmem>>, vector<16x48xbf16>
    %cst = arith.constant dense<0.000000e+00> : vector<2x48xf32>
    %10 = tpu.matmul %8, %9, %cst {dimension_numbers = #tpu.dot_dimension_numbers<[1], [0], [0], [1], [0, 0, 1, 1], [], []>} : vector<2x16xbf16>, vector<16x48xbf16>, vector<2x48xf32> -> vector<2x48xf32>
    %c0_7 = arith.constant 0 : index
    %c0_8 = arith.constant 0 : index
    %11 = vector.load %arg6[%c0_7, %c0_8] : memref<1x48xf32, #tpu.memory_space<vmem>>, vector<1x48xf32>
    %12 = vector.broadcast %11 : vector<1x48xf32> to vector<2x48xf32>
    %13 = arith.addf %10, %12 : vector<2x48xf32>
    %14 = arith.truncf %3 : vector<2x16xf32> to vector<2x16xbf16>
    %c0_9 = arith.constant 0 : index
    %c0_10 = arith.constant 0 : index
    %15 = vector.load %arg5[%c0_9, %c0_10] : memref<16x48xbf16, #tpu.memory_space<vmem>>, vector<16x48xbf16>
    %cst_11 = arith.constant dense<0.000000e+00> : vector<2x48xf32>
    %16 = tpu.matmul %14, %15, %cst_11 {dimension_numbers = #tpu.dot_dimension_numbers<[1], [0], [0], [1], [0, 0, 1, 1], [], []>} : vector<2x16xbf16>, vector<16x48xbf16>, vector<2x48xf32> -> vector<2x48xf32>
    %c0_12 = arith.constant 0 : index
    %c0_13 = arith.constant 0 : index
    %17 = vector.load %arg7[%c0_12, %c0_13] : memref<1x48xf32, #tpu.memory_space<vmem>>, vector<1x48xf32>
    %18 = vector.broadcast %17 : vector<1x48xf32> to vector<2x48xf32>
    %19 = arith.addf %16, %18 : vector<2x48xf32>
    %20 = vector.extract_strided_slice %13 {offsets = [0, 0], sizes = [2, 16], strides = [1, 1]} : vector<2x48xf32> to vector<2x16xf32>
    %21 = vector.extract_strided_slice %19 {offsets = [0, 0], sizes = [2, 16], strides = [1, 1]} : vector<2x48xf32> to vector<2x16xf32>
    %22 = arith.addf %20, %21 : vector<2x16xf32>
    %23 = arith.negf %22 : vector<2x16xf32>
    %24 = math.exp %23 : vector<2x16xf32>
    %cst_14 = arith.constant 1.000000e+00 : f32
    %25 = vector.broadcast %cst_14 : f32 to vector<2x16xf32>
    %26 = arith.addf %25, %24 : vector<2x16xf32>
    %27 = arith.divf %25, %26 : vector<2x16xf32>
    %28 = vector.extract_strided_slice %13 {offsets = [0, 16], sizes = [2, 16], strides = [1, 1]} : vector<2x48xf32> to vector<2x16xf32>
    %29 = vector.extract_strided_slice %19 {offsets = [0, 16], sizes = [2, 16], strides = [1, 1]} : vector<2x48xf32> to vector<2x16xf32>
    %30 = arith.addf %28, %29 : vector<2x16xf32>
    %31 = arith.negf %30 : vector<2x16xf32>
    %32 = math.exp %31 : vector<2x16xf32>
    %cst_15 = arith.constant 1.000000e+00 : f32
    %33 = vector.broadcast %cst_15 : f32 to vector<2x16xf32>
    %34 = arith.addf %33, %32 : vector<2x16xf32>
    %35 = arith.divf %33, %34 : vector<2x16xf32>
    %36 = vector.extract_strided_slice %13 {offsets = [0, 32], sizes = [2, 16], strides = [1, 1]} : vector<2x48xf32> to vector<2x16xf32>
    %37 = vector.extract_strided_slice %19 {offsets = [0, 32], sizes = [2, 16], strides = [1, 1]} : vector<2x48xf32> to vector<2x16xf32>
    %38 = arith.mulf %27, %37 : vector<2x16xf32>
    %39 = arith.addf %36, %38 : vector<2x16xf32>
    %40 = math.tanh %39 : vector<2x16xf32>
    %cst_16 = arith.constant 1.000000e+00 : f32
    %41 = vector.broadcast %cst_16 : f32 to vector<2x16xf32>
    %42 = arith.subf %41, %35 : vector<2x16xf32>
    %43 = arith.mulf %42, %40 : vector<2x16xf32>
    %44 = arith.mulf %35, %3 : vector<2x16xf32>
    %45 = arith.addf %43, %44 : vector<2x16xf32>
    %c0_17 = arith.constant 0 : index
    %c0_18 = arith.constant 0 : index
    %46 = vector.load %arg2[%c0_17, %c0_18] : memref<2x1xf32, #tpu.memory_space<vmem>>, vector<2x1xf32>
    %47 = arith.sitofp %5 : i32 to f32
    %48 = vector.broadcast %47 : f32 to vector<2x1xf32>
    %49 = arith.cmpf ogt, %46, %48 : vector<2x1xf32>
    %50 = arith.extui %49 : vector<2x1xi1> to vector<2x1xi32>
    %51 = arith.sitofp %50 : vector<2x1xi32> to vector<2x1xf32>
    %52 = vector.broadcast %51 : vector<2x1xf32> to vector<2x16xf32>
    %53 = arith.mulf %52, %45 : vector<2x16xf32>
    %cst_19 = arith.constant 1.000000e+00 : f32
    %54 = vector.broadcast %cst_19 : f32 to vector<2x1xf32>
    %55 = arith.subf %54, %51 : vector<2x1xf32>
    %56 = vector.broadcast %55 : vector<2x1xf32> to vector<2x16xf32>
    %57 = arith.mulf %56, %3 : vector<2x16xf32>
    %58 = arith.addf %53, %57 : vector<2x16xf32>
    %59 = arith.index_cast %c0_i32_2 : i32 to index
    %c0_20 = arith.constant 0 : index
    %c0_21 = arith.constant 0 : index
    %60 = vector.load %arg8[%59, %c0_20, %c0_21] : memref<4x2x16xf32, #tpu.memory_space<vmem>>, vector<1x2x16xf32>
    %61 = vector.shape_cast %60 : vector<1x2x16xf32> to vector<2x16xf32>
    %62 = vector.shape_cast %58 : vector<2x16xf32> to vector<1x2x16xf32>
    tpu.vector_store %arg8[%59, %c0_20, %c0_21], %62 {strides = array<i32>} : memref<4x2x16xf32, #tpu.memory_space<vmem>>, vector<1x2x16xf32>,
    %c1_i32 = arith.constant 1 : i32
    %c4_i32_22 = arith.constant 4 : i32
    %63 = arith.muli %arg0, %c4_i32_22 : i32
    %64 = arith.addi %63, %c1_i32 : i32
    %65 = arith.index_cast %c1_i32 : i32 to index
    %c0_23 = arith.constant 0 : index
    %c0_24 = arith.constant 0 : index
    %66 = vector.load %arg1[%65, %c0_23, %c0_24] : memref<4x2x16xbf16, #tpu.memory_space<vmem>>, vector<1x2x16xbf16>
    %67 = vector.shape_cast %66 : vector<1x2x16xbf16> to vector<2x16xbf16>
    %c0_25 = arith.constant 0 : index
    %c0_26 = arith.constant 0 : index
    %68 = vector.load %arg4[%c0_25, %c0_26] : memref<16x48xbf16, #tpu.memory_space<vmem>>, vector<16x48xbf16>
    %cst_27 = arith.constant dense<0.000000e+00> : vector<2x48xf32>
    %69 = tpu.matmul %67, %68, %cst_27 {dimension_numbers = #tpu.dot_dimension_numbers<[1], [0], [0], [1], [0, 0, 1, 1], [], []>} : vector<2x16xbf16>, vector<16x48xbf16>, vector<2x48xf32> -> vector<2x48xf32>
    %c0_28 = arith.constant 0 : index
    %c0_29 = arith.constant 0 : index
    %70 = vector.load %arg6[%c0_28, %c0_29] : memref<1x48xf32, #tpu.memory_space<vmem>>, vector<1x48xf32>
    %71 = vector.broadcast %70 : vector<1x48xf32> to vector<2x48xf32>
    %72 = arith.addf %69, %71 : vector<2x48xf32>
    %73 = arith.truncf %58 : vector<2x16xf32> to vector<2x16xbf16>
    %c0_30 = arith.constant 0 : index
    %c0_31 = arith.constant 0 : index
    %74 = vector.load %arg5[%c0_30, %c0_31] : memref<16x48xbf16, #tpu.memory_space<vmem>>, vector<16x48xbf16>
    %cst_32 = arith.constant dense<0.000000e+00> : vector<2x48xf32>
    %75 = tpu.matmul %73, %74, %cst_32 {dimension_numbers = #tpu.dot_dimension_numbers<[1], [0], [0], [1], [0, 0, 1, 1], [], []>} : vector<2x16xbf16>, vector<16x48xbf16>, vector<2x48xf32> -> vector<2x48xf32>
    %c0_33 = arith.constant 0 : index
    %c0_34 = arith.constant 0 : index
    %76 = vector.load %arg7[%c0_33, %c0_34] : memref<1x48xf32, #tpu.memory_space<vmem>>, vector<1x48xf32>
    %77 = vector.broadcast %76 : vector<1x48xf32> to vector<2x48xf32>
    %78 = arith.addf %75, %77 : vector<2x48xf32>
    %79 = vector.extract_strided_slice %72 {offsets = [0, 0], sizes = [2, 16], strides = [1, 1]} : vector<2x48xf32> to vector<2x16xf32>
    %80 = vector.extract_strided_slice %78 {offsets = [0, 0], sizes = [2, 16], strides = [1, 1]} : vector<2x48xf32> to vector<2x16xf32>
    %81 = arith.addf %79, %80 : vector<2x16xf32>
    %82 = arith.negf %81 : vector<2x16xf32>
    %83 = math.exp %82 : vector<2x16xf32>
    %cst_35 = arith.constant 1.000000e+00 : f32
    %84 = vector.broadcast %cst_35 : f32 to vector<2x16xf32>
    %85 = arith.addf %84, %83 : vector<2x16xf32>
    %86 = arith.divf %84, %85 : vector<2x16xf32>
    %87 = vector.extract_strided_slice %72 {offsets = [0, 16], sizes = [2, 16], strides = [1, 1]} : vector<2x48xf32> to vector<2x16xf32>
    %88 = vector.extract_strided_slice %78 {offsets = [0, 16], sizes = [2, 16], strides = [1, 1]} : vector<2x48xf32> to vector<2x16xf32>
    %89 = arith.addf %87, %88 : vector<2x16xf32>
    %90 = arith.negf %89 : vector<2x16xf32>
    %91 = math.exp %90 : vector<2x16xf32>
    %cst_36 = arith.constant 1.000000e+00 : f32
    %92 = vector.broadcast %cst_36 : f32 to vector<2x16xf32>
    %93 = arith.addf %92, %91 : vector<2x16xf32>
    %94 = arith.divf %92, %93 : vector<2x16xf32>
    %95 = vector.extract_strided_slice %72 {offsets = [0, 32], sizes = [2, 16], strides = [1, 1]} : vector<2x48xf32> to vector<2x16xf32>
    %96 = vector.extract_strided_slice %78 {offsets = [0, 32], sizes = [2, 16], strides = [1, 1]} : vector<2x48xf32> to vector<2x16xf32>
    %97 = arith.mulf %86, %96 : vector<2x16xf32>
    %98 = arith.addf %95, %97 : vector<2x16xf32>
    %99 = math.tanh %98 : vector<2x16xf32>
    %cst_37 = arith.constant 1.000000e+00 : f32
    %100 = vector.broadcast %cst_37 : f32 to vector<2x16xf32>
    %101 = arith.subf %100, %94 : vector<2x16xf32>
    %102 = arith.mulf %101, %99 : vector<2x16xf32>
    %103 = arith.mulf %94, %58 : vector<2x16xf32>
    %104 = arith.addf %102, %103 : vector<2x16xf32>
    %c0_38 = arith.constant 0 : index
    %c0_39 = arith.constant 0 : index
    %105 = vector.load %arg2[%c0_38, %c0_39] : memref<2x1xf32, #tpu.memory_space<vmem>>, vector<2x1xf32>
    %106 = arith.sitofp %64 : i32 to f32
    %107 = vector.broadcast %106 : f32 to vector<2x1xf32>
    %108 = arith.cmpf ogt, %105, %107 : vector<2x1xf32>
    %109 = arith.extui %108 : vector<2x1xi1> to vector<2x1xi32>
    %110 = arith.sitofp %109 : vector<2x1xi32> to vector<2x1xf32>
    %111 = vector.broadcast %110 : vector<2x1xf32> to vector<2x16xf32>
    %112 = arith.mulf %111, %104 : vector<2x16xf32>
    %cst_40 = arith.constant 1.000000e+00 : f32
    %113 = vector.broadcast %cst_40 : f32 to vector<2x1xf32>
    %114 = arith.subf %113, %110 : vector<2x1xf32>
    %115 = vector.broadcast %114 : vector<2x1xf32> to vector<2x16xf32>
    %116 = arith.mulf %115, %58 : vector<2x16xf32>
    %117 = arith.addf %112, %116 : vector<2x16xf32>
    %118 = arith.index_cast %c1_i32 : i32 to index
    %c0_41 = arith.constant 0 : index
    %c0_42 = arith.constant 0 : index
    %119 = vector.load %arg8[%118, %c0_41, %c0_42] : memref<4x2x16xf32, #tpu.memory_space<vmem>>, vector<1x2x16xf32>
    %120 = vector.shape_cast %119 : vector<1x2x16xf32> to vector<2x16xf32>
    %121 = vector.shape_cast %117 : vector<2x16xf32> to vector<1x2x16xf32>
    tpu.vector_store %arg8[%118, %c0_41, %c0_42], %121 {strides = array<i32>} : memref<4x2x16xf32, #tpu.memory_space<vmem>>, vector<1x2x16xf32>,
    %c2_i32 = arith.constant 2 : i32
    %c4_i32_43 = arith.constant 4 : i32
    %122 = arith.muli %arg0, %c4_i32_43 : i32
    %123 = arith.addi %122, %c2_i32 : i32
    %124 = arith.index_cast %c2_i32 : i32 to index
    %c0_44 = arith.constant 0 : index
    %c0_45 = arith.constant 0 : index
    %125 = vector.load %arg1[%124, %c0_44, %c0_45] : memref<4x2x16xbf16, #tpu.memory_space<vmem>>, vector<1x2x16xbf16>
    %126 = vector.shape_cast %125 : vector<1x2x16xbf16> to vector<2x16xbf16>
    %c0_46 = arith.constant 0 : index
    %c0_47 = arith.constant 0 : index
    %127 = vector.load %arg4[%c0_46, %c0_47] : memref<16x48xbf16, #tpu.memory_space<vmem>>, vector<16x48xbf16>
    %cst_48 = arith.constant dense<0.000000e+00> : vector<2x48xf32>
    %128 = tpu.matmul %126, %127, %cst_48 {dimension_numbers = #tpu.dot_dimension_numbers<[1], [0], [0], [1], [0, 0, 1, 1], [], []>} : vector<2x16xbf16>, vector<16x48xbf16>, vector<2x48xf32> -> vector<2x48xf32>
    %c0_49 = arith.constant 0 : index
    %c0_50 = arith.constant 0 : index
    %129 = vector.load %arg6[%c0_49, %c0_50] : memref<1x48xf32, #tpu.memory_space<vmem>>, vector<1x48xf32>
    %130 = vector.broadcast %129 : vector<1x48xf32> to vector<2x48xf32>
    %131 = arith.addf %128, %130 : vector<2x48xf32>
    %132 = arith.truncf %117 : vector<2x16xf32> to vector<2x16xbf16>
    %c0_51 = arith.constant 0 : index
    %c0_52 = arith.constant 0 : index
    %133 = vector.load %arg5[%c0_51, %c0_52] : memref<16x48xbf16, #tpu.memory_space<vmem>>, vector<16x48xbf16>
    %cst_53 = arith.constant dense<0.000000e+00> : vector<2x48xf32>
    %134 = tpu.matmul %132, %133, %cst_53 {dimension_numbers = #tpu.dot_dimension_numbers<[1], [0], [0], [1], [0, 0, 1, 1], [], []>} : vector<2x16xbf16>, vector<16x48xbf16>, vector<2x48xf32> -> vector<2x48xf32>
    %c0_54 = arith.constant 0 : index
    %c0_55 = arith.constant 0 : index
    %135 = vector.load %arg7[%c0_54, %c0_55] : memref<1x48xf32, #tpu.memory_space<vmem>>, vector<1x48xf32>
    %136 = vector.broadcast %135 : vector<1x48xf32> to vector<2x48xf32>
    %137 = arith.addf %134, %136 : vector<2x48xf32>
    %138 = vector.extract_strided_slice %131 {offsets = [0, 0], sizes = [2, 16], strides = [1, 1]} : vector<2x48xf32> to vector<2x16xf32>
    %139 = vector.extract_strided_slice %137 {offsets = [0, 0], sizes = [2, 16], strides = [1, 1]} : vector<2x48xf32> to vector<2x16xf32>
    %140 = arith.addf %138, %139 : vector<2x16xf32>
    %141 = arith.negf %140 : vector<2x16xf32>
    %142 = math.exp %141 : vector<2x16xf32>
    %cst_56 = arith.constant 1.000000e+00 : f32
    %143 = vector.broadcast %cst_56 : f32 to vector<2x16xf32>
    %144 = arith.addf %143, %142 : vector<2x16xf32>
    %145 = arith.divf %143, %144 : vector<2x16xf32>
    %146 = vector.extract_strided_slice %131 {offsets = [0, 16], sizes = [2, 16], strides = [1, 1]} : vector<2x48xf32> to vector<2x16xf32>
    %147 = vector.extract_strided_slice %137 {offsets = [0, 16], sizes = [2, 16], strides = [1, 1]} : vector<2x48xf32> to vector<2x16xf32>
    %148 = arith.addf %146, %147 : vector<2x16xf32>
    %149 = arith.negf %148 : vector<2x16xf32>
    %150 = math.exp %149 : vector<2x16xf32>
    %cst_57 = arith.constant 1.000000e+00 : f32
    %151 = vector.broadcast %cst_57 : f32 to vector<2x16xf32>
    %152 = arith.addf %151, %150 : vector<2x16xf32>
    %153 = arith.divf %151, %152 : vector<2x16xf32>
    %154 = vector.extract_strided_slice %131 {offsets = [0, 32], sizes = [2, 16], strides = [1, 1]} : vector<2x48xf32> to vector<2x16xf32>
    %155 = vector.extract_strided_slice %137 {offsets = [0, 32], sizes = [2, 16], strides = [1, 1]} : vector<2x48xf32> to vector<2x16xf32>
    %156 = arith.mulf %145, %155 : vector<2x16xf32>
    %157 = arith.addf %154, %156 : vector<2x16xf32>
    %158 = math.tanh %157 : vector<2x16xf32>
    %cst_58 = arith.constant 1.000000e+00 : f32
    %159 = vector.broadcast %cst_58 : f32 to vector<2x16xf32>
    %160 = arith.subf %159, %153 : vector<2x16xf32>
    %161 = arith.mulf %160, %158 : vector<2x16xf32>
    %162 = arith.mulf %153, %117 : vector<2x16xf32>
    %163 = arith.addf %161, %162 : vector<2x16xf32>
    %c0_59 = arith.constant 0 : index
    %c0_60 = arith.constant 0 : index
    %164 = vector.load %arg2[%c0_59, %c0_60] : memref<2x1xf32, #tpu.memory_space<vmem>>, vector<2x1xf32>
    %165 = arith.sitofp %123 : i32 to f32
    %166 = vector.broadcast %165 : f32 to vector<2x1xf32>
    %167 = arith.cmpf ogt, %164, %166 : vector<2x1xf32>
    %168 = arith.extui %167 : vector<2x1xi1> to vector<2x1xi32>
    %169 = arith.sitofp %168 : vector<2x1xi32> to vector<2x1xf32>
    %170 = vector.broadcast %169 : vector<2x1xf32> to vector<2x16xf32>
    %171 = arith.mulf %170, %163 : vector<2x16xf32>
    %cst_61 = arith.constant 1.000000e+00 : f32
    %172 = vector.broadcast %cst_61 : f32 to vector<2x1xf32>
    %173 = arith.subf %172, %169 : vector<2x1xf32>
    %174 = vector.broadcast %173 : vector<2x1xf32> to vector<2x16xf32>
    %175 = arith.mulf %174, %117 : vector<2x16xf32>
    %176 = arith.addf %171, %175 : vector<2x16xf32>
    %177 = arith.index_cast %c2_i32 : i32 to index
    %c0_62 = arith.constant 0 : index
    %c0_63 = arith.constant 0 : index
    %178 = vector.load %arg8[%177, %c0_62, %c0_63] : memref<4x2x16xf32, #tpu.memory_space<vmem>>, vector<1x2x16xf32>
    %179 = vector.shape_cast %178 : vector<1x2x16xf32> to vector<2x16xf32>
    %180 = vector.shape_cast %176 : vector<2x16xf32> to vector<1x2x16xf32>
    tpu.vector_store %arg8[%177, %c0_62, %c0_63], %180 {strides = array<i32>} : memref<4x2x16xf32, #tpu.memory_space<vmem>>, vector<1x2x16xf32>,
    %c3_i32 = arith.constant 3 : i32
    %c4_i32_64 = arith.constant 4 : i32
    %181 = arith.muli %arg0, %c4_i32_64 : i32
    %182 = arith.addi %181, %c3_i32 : i32
    %183 = arith.index_cast %c3_i32 : i32 to index
    %c0_65 = arith.constant 0 : index
    %c0_66 = arith.constant 0 : index
    %184 = vector.load %arg1[%183, %c0_65, %c0_66] : memref<4x2x16xbf16, #tpu.memory_space<vmem>>, vector<1x2x16xbf16>
    %185 = vector.shape_cast %184 : vector<1x2x16xbf16> to vector<2x16xbf16>
    %c0_67 = arith.constant 0 : index
    %c0_68 = arith.constant 0 : index
    %186 = vector.load %arg4[%c0_67, %c0_68] : memref<16x48xbf16, #tpu.memory_space<vmem>>, vector<16x48xbf16>
    %cst_69 = arith.constant dense<0.000000e+00> : vector<2x48xf32>
    %187 = tpu.matmul %185, %186, %cst_69 {dimension_numbers = #tpu.dot_dimension_numbers<[1], [0], [0], [1], [0, 0, 1, 1], [], []>} : vector<2x16xbf16>, vector<16x48xbf16>, vector<2x48xf32> -> vector<2x48xf32>
    %c0_70 = arith.constant 0 : index
    %c0_71 = arith.constant 0 : index
    %188 = vector.load %arg6[%c0_70, %c0_71] : memref<1x48xf32, #tpu.memory_space<vmem>>, vector<1x48xf32>
    %189 = vector.broadcast %188 : vector<1x48xf32> to vector<2x48xf32>
    %190 = arith.addf %187, %189 : vector<2x48xf32>
    %191 = arith.truncf %176 : vector<2x16xf32> to vector<2x16xbf16>
    %c0_72 = arith.constant 0 : index
    %c0_73 = arith.constant 0 : index
    %192 = vector.load %arg5[%c0_72, %c0_73] : memref<16x48xbf16, #tpu.memory_space<vmem>>, vector<16x48xbf16>
    %cst_74 = arith.constant dense<0.000000e+00> : vector<2x48xf32>
    %193 = tpu.matmul %191, %192, %cst_74 {dimension_numbers = #tpu.dot_dimension_numbers<[1], [0], [0], [1], [0, 0, 1, 1], [], []>} : vector<2x16xbf16>, vector<16x48xbf16>, vector<2x48xf32> -> vector<2x48xf32>
    %c0_75 = arith.constant 0 : index
    %c0_76 = arith.constant 0 : index
    %194 = vector.load %arg7[%c0_75, %c0_76] : memref<1x48xf32, #tpu.memory_space<vmem>>, vector<1x48xf32>
    %195 = vector.broadcast %194 : vector<1x48xf32> to vector<2x48xf32>
    %196 = arith.addf %193, %195 : vector<2x48xf32>
    %197 = vector.extract_strided_slice %190 {offsets = [0, 0], sizes = [2, 16], strides = [1, 1]} : vector<2x48xf32> to vector<2x16xf32>
    %198 = vector.extract_strided_slice %196 {offsets = [0, 0], sizes = [2, 16], strides = [1, 1]} : vector<2x48xf32> to vector<2x16xf32>
    %199 = arith.addf %197, %198 : vector<2x16xf32>
    %200 = arith.negf %199 : vector<2x16xf32>
    %201 = math.exp %200 : vector<2x16xf32>
    %cst_77 = arith.constant 1.000000e+00 : f32
    %202 = vector.broadcast %cst_77 : f32 to vector<2x16xf32>
    %203 = arith.addf %202, %201 : vector<2x16xf32>
    %204 = arith.divf %202, %203 : vector<2x16xf32>
    %205 = vector.extract_strided_slice %190 {offsets = [0, 16], sizes = [2, 16], strides = [1, 1]} : vector<2x48xf32> to vector<2x16xf32>
    %206 = vector.extract_strided_slice %196 {offsets = [0, 16], sizes = [2, 16], strides = [1, 1]} : vector<2x48xf32> to vector<2x16xf32>
    %207 = arith.addf %205, %206 : vector<2x16xf32>
    %208 = arith.negf %207 : vector<2x16xf32>
    %209 = math.exp %208 : vector<2x16xf32>
    %cst_78 = arith.constant 1.000000e+00 : f32
    %210 = vector.broadcast %cst_78 : f32 to vector<2x16xf32>
    %211 = arith.addf %210, %209 : vector<2x16xf32>
    %212 = arith.divf %210, %211 : vector<2x16xf32>
    %213 = vector.extract_strided_slice %190 {offsets = [0, 32], sizes = [2, 16], strides = [1, 1]} : vector<2x48xf32> to vector<2x16xf32>
    %214 = vector.extract_strided_slice %196 {offsets = [0, 32], sizes = [2, 16], strides = [1, 1]} : vector<2x48xf32> to vector<2x16xf32>
    %215 = arith.mulf %204, %214 : vector<2x16xf32>
    %216 = arith.addf %213, %215 : vector<2x16xf32>
    %217 = math.tanh %216 : vector<2x16xf32>
    %cst_79 = arith.constant 1.000000e+00 : f32
    %218 = vector.broadcast %cst_79 : f32 to vector<2x16xf32>
    %219 = arith.subf %218, %212 : vector<2x16xf32>
    %220 = arith.mulf %219, %217 : vector<2x16xf32>
    %221 = arith.mulf %212, %176 : vector<2x16xf32>
    %222 = arith.addf %220, %221 : vector<2x16xf32>
    %c0_80 = arith.constant 0 : index
    %c0_81 = arith.constant 0 : index
    %223 = vector.load %arg2[%c0_80, %c0_81] : memref<2x1xf32, #tpu.memory_space<vmem>>, vector<2x1xf32>
    %224 = arith.sitofp %182 : i32 to f32
    %225 = vector.broadcast %224 : f32 to vector<2x1xf32>
    %226 = arith.cmpf ogt, %223, %225 : vector<2x1xf32>
    %227 = arith.extui %226 : vector<2x1xi1> to vector<2x1xi32>
    %228 = arith.sitofp %227 : vector<2x1xi32> to vector<2x1xf32>
    %229 = vector.broadcast %228 : vector<2x1xf32> to vector<2x16xf32>
    %230 = arith.mulf %229, %222 : vector<2x16xf32>
    %cst_82 = arith.constant 1.000000e+00 : f32
    %231 = vector.broadcast %cst_82 : f32 to vector<2x1xf32>
    %232 = arith.subf %231, %228 : vector<2x1xf32>
    %233 = vector.broadcast %232 : vector<2x1xf32> to vector<2x16xf32>
    %234 = arith.mulf %233, %176 : vector<2x16xf32>
    %235 = arith.addf %230, %234 : vector<2x16xf32>
    %236 = arith.index_cast %c3_i32 : i32 to index
    %c0_83 = arith.constant 0 : index
    %c0_84 = arith.constant 0 : index
    %237 = vector.load %arg8[%236, %c0_83, %c0_84] : memref<4x2x16xf32, #tpu.memory_space<vmem>>, vector<1x2x16xf32>
    %238 = vector.shape_cast %237 : vector<1x2x16xf32> to vector<2x16xf32>
    %239 = vector.shape_cast %235 : vector<2x16xf32> to vector<1x2x16xf32>
    tpu.vector_store %arg8[%236, %c0_83, %c0_84], %239 {strides = array<i32>} : memref<4x2x16xf32, #tpu.memory_space<vmem>>, vector<1x2x16xf32>,
    %c4_i32_85 = arith.constant 4 : i32
    %c0_86 = arith.constant 0 : index
    %c0_87 = arith.constant 0 : index
    %240 = vector.load %arg10[%c0_86, %c0_87] : memref<2x16xf32, #tpu.memory_space<vmem>>, vector<2x16xf32>
    tpu.vector_store %arg10[%c0_86, %c0_87], %235 {strides = array<i32>} : memref<2x16xf32, #tpu.memory_space<vmem>>, vector<2x16xf32>,
    %c1_i32_88 = arith.constant 1 : i32
    %241 = arith.cmpi eq, %arg0, %c1_i32_88 : i32
    %242 = arith.extui %241 : i1 to i32
    %c0_i32_89 = arith.constant 0 : i32
    %243 = arith.cmpi ne, %242, %c0_i32_89 : i32
    scf.if %243 {
      %c0_90 = arith.constant 0 : index
      %c0_91 = arith.constant 0 : index
      %244 = vector.load %arg9[%c0_90, %c0_91] : memref<2x16xf32, #tpu.memory_space<vmem>>, vector<2x16xf32>
      tpu.vector_store %arg9[%c0_90, %c0_91], %235 {strides = array<i32>} : memref<2x16xf32, #tpu.memory_space<vmem>>, vector<2x16xf32>,
    } else {
    }
    return
  }
  func.func @transform_0(%arg0: i32) -> (i32, i32, i32) {
    %c0_i32 = arith.constant 0 : i32
    %c0_i32_0 = arith.constant 0 : i32
    %c0_i32_1 = arith.constant 0 : i32
    return %arg0, %c0_i32, %c0_i32_0 : i32, i32, i32
  }
  func.func @transform_1(%arg0: i32) -> (i32, i32) {
    %c0_i32 = arith.constant 0 : i32
    %c0_i32_0 = arith.constant 0 : i32
    %c0_i32_1 = arith.constant 0 : i32
    return %c0_i32, %c0_i32_0 : i32, i32
  }
  func.func @transform_2(%arg0: i32) -> (i32, i32) {
    %c0_i32 = arith.constant 0 : i32
    %c0_i32_0 = arith.constant 0 : i32
    %c0_i32_1 = arith.constant 0 : i32
    return %c0_i32, %c0_i32_0 : i32, i32
  }
  func.func @transform_3(%arg0: i32) -> (i32, i32) {
    %c0_i32 = arith.constant 0 : i32
    %c0_i32_0 = arith.constant 0 : i32
    %c0_i32_1 = arith.constant 0 : i32
    return %c0_i32, %c0_i32_0 : i32, i32
  }
  func.func @transform_4(%arg0: i32) -> (i32, i32) {
    %c0_i32 = arith.constant 0 : i32
    %c0_i32_0 = arith.constant 0 : i32
    %c0_i32_1 = arith.constant 0 : i32
    return %c0_i32, %c0_i32_0 : i32, i32
  }
  func.func @transform_5(%arg0: i32) -> (i32, i32) {
    %c0_i32 = arith.constant 0 : i32
    %c0_i32_0 = arith.constant 0 : i32
    %c0_i32_1 = arith.constant 0 : i32
    return %c0_i32, %c0_i32_0 : i32, i32
  }
  func.func @transform_6(%arg0: i32) -> (i32, i32) {
    %c0_i32 = arith.constant 0 : i32
    %c0_i32_0 = arith.constant 0 : i32
    %c0_i32_1 = arith.constant 0 : i32
    return %c0_i32, %c0_i32_0 : i32, i32
  }
  func.func @transform_7(%arg0: i32) -> (i32, i32, i32) {
    %c0_i32 = arith.constant 0 : i32
    %c0_i32_0 = arith.constant 0 : i32
    %c0_i32_1 = arith.constant 0 : i32
    return %arg0, %c0_i32, %c0_i32_0 : i32, i32, i32
  }
  func.func @transform_8(%arg0: i32) -> (i32, i32) {
    %c0_i32 = arith.constant 0 : i32
    %c0_i32_0 = arith.constant 0 : i32
    %c0_i32_1 = arith.constant 0 : i32
    return %c0_i32, %c0_i32_0 : i32, i32
  }
}

module attributes {stable_mosaic.version = 11 : i64} {
  func.func @_dec_loop_kernel(%arg0: i32, %arg1: memref<7xi32, #tpu.memory_space<smem>>, %arg2: memref<2x16xf32, #tpu.memory_space<vmem>>, %arg3: memref<16x16xbf16, #tpu.memory_space<vmem>>, %arg4: memref<2x6x16xbf16, #tpu.memory_space<vmem>>, %arg5: memref<2x1x6xf32, #tpu.memory_space<vmem>>, %arg6: memref<2x8xf32, #tpu.memory_space<vmem>>, %arg7: memref<2x8xf32, #tpu.memory_space<vmem>>, %arg8: memref<1x2x16xbf16, #tpu.memory_space<vmem>>, %arg9: memref<16x48xbf16, #tpu.memory_space<vmem>>, %arg10: memref<1x48xf32, #tpu.memory_space<vmem>>, %arg11: memref<16x48xbf16, #tpu.memory_space<vmem>>, %arg12: memref<16x48xbf16, #tpu.memory_space<vmem>>, %arg13: memref<1x48xf32, #tpu.memory_space<vmem>>, %arg14: memref<1x48xf32, #tpu.memory_space<vmem>>, %arg15: memref<16x16xbf16, #tpu.memory_space<vmem>>, %arg16: memref<16x16xbf16, #tpu.memory_space<vmem>>, %arg17: memref<1x16xf32, #tpu.memory_space<vmem>>, %arg18: memref<16x1xbf16, #tpu.memory_space<vmem>>, %arg19: memref<16x1xbf16, #tpu.memory_space<vmem>>, %arg20: memref<1x1xf32, #tpu.memory_space<vmem>>, %arg21: memref<1x2x16xf32, #tpu.memory_space<vmem>>, %arg22: memref<1x2x1xf32, #tpu.memory_space<vmem>>, %arg23: memref<2x16xf32, #tpu.memory_space<vmem>>, %arg24: memref<2x16xbf16, #tpu.memory_space<vmem>>, %arg25: memref<2x1xf32, #tpu.memory_space<vmem>>) attributes {dimension_semantics = [#tpu.dimension_semantics<arbitrary>], iteration_bounds = array<i64: 7>, scalar_prefetch = 1 : i64, scratch_operands = 3 : i64, tpu.core_type = #tpu.core_type<tc>, window_params = [{pipeline_mode = #tpu.pipeline_mode<synchronous>, transform_indices = @transform_0, window_bounds = array<i64: 2, 16>}, {pipeline_mode = #tpu.pipeline_mode<synchronous>, transform_indices = @transform_1, window_bounds = array<i64: 16, 16>}, {pipeline_mode = #tpu.pipeline_mode<synchronous>, transform_indices = @transform_2, window_bounds = array<i64: 2, 6, 16>}, {pipeline_mode = #tpu.pipeline_mode<synchronous>, transform_indices = @transform_3, window_bounds = array<i64: 2, 1, 6>}, {pipeline_mode = #tpu.pipeline_mode<synchronous>, transform_indices = @transform_4, window_bounds = array<i64: 2, 8>}, {pipeline_mode = #tpu.pipeline_mode<synchronous>, transform_indices = @transform_5, window_bounds = array<i64: 2, 8>}, {transform_indices = @transform_6, window_bounds = array<i64: 1, 2, 16>}, {pipeline_mode = #tpu.pipeline_mode<synchronous>, transform_indices = @transform_7, window_bounds = array<i64: 16, 48>}, {pipeline_mode = #tpu.pipeline_mode<synchronous>, transform_indices = @transform_8, window_bounds = array<i64: 1, 48>}, {pipeline_mode = #tpu.pipeline_mode<synchronous>, transform_indices = @transform_9, window_bounds = array<i64: 16, 48>}, {pipeline_mode = #tpu.pipeline_mode<synchronous>, transform_indices = @transform_10, window_bounds = array<i64: 16, 48>}, {pipeline_mode = #tpu.pipeline_mode<synchronous>, transform_indices = @transform_11, window_bounds = array<i64: 1, 48>}, {pipeline_mode = #tpu.pipeline_mode<synchronous>, transform_indices = @transform_12, window_bounds = array<i64: 1, 48>}, {pipeline_mode = #tpu.pipeline_mode<synchronous>, transform_indices = @transform_13, window_bounds = array<i64: 16, 16>}, {pipeline_mode = #tpu.pipeline_mode<synchronous>, transform_indices = @transform_14, window_bounds = array<i64: 16, 16>}, {pipeline_mode = #tpu.pipeline_mode<synchronous>, transform_indices = @transform_15, window_bounds = array<i64: 1, 16>}, {pipeline_mode = #tpu.pipeline_mode<synchronous>, transform_indices = @transform_16, window_bounds = array<i64: 16, 1>}, {pipeline_mode = #tpu.pipeline_mode<synchronous>, transform_indices = @transform_17, window_bounds = array<i64: 16, 1>}, {pipeline_mode = #tpu.pipeline_mode<synchronous>, transform_indices = @transform_18, window_bounds = array<i64: 1, 1>}, {transform_indices = @transform_19, window_bounds = array<i64: 1, 2, 16>}, {transform_indices = @transform_20, window_bounds = array<i64: 1, 2, 1>}]} {
    %0 = tpu.iota {dimensions = array<i32: 1>} : vector<2x16xi32>
    %1 = arith.sitofp %0 : vector<2x16xi32> to vector<2x16xf32>
    %c0_i32 = arith.constant 0 : i32
    %2 = arith.cmpi eq, %arg0, %c0_i32 : i32
    %3 = arith.extui %2 : i1 to i32
    %c0_i32_0 = arith.constant 0 : i32
    %4 = arith.cmpi ne, %3, %c0_i32_0 : i32
    scf.if %4 {
      %c0_84 = arith.constant 0 : index
      %c0_85 = arith.constant 0 : index
      %171 = vector.load %arg2[%c0_84, %c0_85] : memref<2x16xf32, #tpu.memory_space<vmem>>, vector<2x16xf32>
      %c0_86 = arith.constant 0 : index
      %c0_87 = arith.constant 0 : index
      %172 = vector.load %arg23[%c0_86, %c0_87] : memref<2x16xf32, #tpu.memory_space<vmem>>, vector<2x16xf32>
      tpu.vector_store %arg23[%c0_86, %c0_87], %171 {strides = array<i32>} : memref<2x16xf32, #tpu.memory_space<vmem>>, vector<2x16xf32>,
      %c0_88 = arith.constant 0 : index
      %c0_89 = arith.constant 0 : index
      %173 = vector.load %arg6[%c0_88, %c0_89] : memref<2x8xf32, #tpu.memory_space<vmem>>, vector<2x1xf32>
      %174 = vector.broadcast %173 : vector<2x1xf32> to vector<2x16xf32>
      %175 = arith.cmpf oeq, %1, %174 : vector<2x16xf32>
      %176 = arith.extui %175 : vector<2x16xi1> to vector<2x16xi32>
      %177 = arith.sitofp %176 : vector<2x16xi32> to vector<2x16xf32>
      %178 = arith.truncf %177 : vector<2x16xf32> to vector<2x16xbf16>
      %c0_90 = arith.constant 0 : index
      %c0_91 = arith.constant 0 : index
      %179 = vector.load %arg24[%c0_90, %c0_91] : memref<2x16xbf16, #tpu.memory_space<vmem>>, vector<2x16xbf16>
      tpu.vector_store %arg24[%c0_90, %c0_91], %178 {strides = array<i32>} : memref<2x16xbf16, #tpu.memory_space<vmem>>, vector<2x16xbf16>,
      %c0_92 = arith.constant 0 : index
      %c0_93 = arith.constant 0 : index
      %180 = vector.load %arg7[%c0_92, %c0_93] : memref<2x8xf32, #tpu.memory_space<vmem>>, vector<2x1xf32>
      %c0_94 = arith.constant 0 : index
      %c0_95 = arith.constant 0 : index
      %181 = vector.load %arg25[%c0_94, %c0_95] : memref<2x1xf32, #tpu.memory_space<vmem>>, vector<2x1xf32>
      tpu.vector_store %arg25[%c0_94, %c0_95], %180 {strides = array<i32>} : memref<2x1xf32, #tpu.memory_space<vmem>>, vector<2x1xf32>,
    } else {
    }
    %c0 = arith.constant 0 : index
    %c0_1 = arith.constant 0 : index
    %5 = vector.load %arg23[%c0, %c0_1] : memref<2x16xf32, #tpu.memory_space<vmem>>, vector<2x16xf32>
    %6 = arith.truncf %5 : vector<2x16xf32> to vector<2x16xbf16>
    %c0_2 = arith.constant 0 : index
    %c0_3 = arith.constant 0 : index
    %c0_4 = arith.constant 0 : index
    %7 = vector.load %arg4[%c0_2, %c0_3, %c0_4] : memref<2x6x16xbf16, #tpu.memory_space<vmem>>, vector<2x6x16xbf16>
    %8 = vector.shape_cast %6 : vector<2x16xbf16> to vector<2x1x16xbf16>
    "tpu.trace_start"() <{level = 10 : i32, message = "bqh,bsh->bqs"}> : () -> ()
    %cst = arith.constant dense<0.000000e+00> : vector<2x1x6xf32>
    %9 = tpu.matmul %8, %7, %cst {dimension_numbers = #tpu.dot_dimension_numbers<[2], [2], [1], [1], [0, 0, 0, 1, 1, 1], [0], [0]>} : vector<2x1x16xbf16>, vector<2x6x16xbf16>, vector<2x1x6xf32> -> vector<2x1x6xf32>
    "tpu.trace_stop"() : () -> ()
    %c0_5 = arith.constant 0 : index
    %c0_6 = arith.constant 0 : index
    %c0_7 = arith.constant 0 : index
    %10 = vector.load %arg5[%c0_5, %c0_6, %c0_7] : memref<2x1x6xf32, #tpu.memory_space<vmem>>, vector<2x1x6xf32>
    %cst_8 = arith.constant 0.000000e+00 : f32
    %11 = vector.broadcast %cst_8 : f32 to vector<2x1x6xf32>
    %12 = arith.cmpf ogt, %10, %11 : vector<2x1x6xf32>
    %cst_9 = arith.constant -1.000000e+09 : f32
    %13 = vector.broadcast %cst_9 : f32 to vector<2x1x6xf32>
    %14 = arith.select %12, %9, %13 : vector<2x1x6xi1>, vector<2x1x6xf32>
    %cst_10 = arith.constant dense<0xFF800000> : vector<2x1xf32>
    %15 = vector.multi_reduction <maximumf>, %14, %cst_10 [2] : vector<2x1x6xf32> to vector<2x1xf32>
    %16 = vector.shape_cast %15 : vector<2x1xf32> to vector<2x1x1xf32>
    %17 = vector.broadcast %16 : vector<2x1x1xf32> to vector<2x1x6xf32>
    %18 = arith.subf %14, %17 : vector<2x1x6xf32>
    %19 = math.exp %18 : vector<2x1x6xf32>
    %cst_11 = arith.constant dense<0.000000e+00> : vector<2x1xf32>
    %20 = vector.multi_reduction <add>, %19, %cst_11 [2] : vector<2x1x6xf32> to vector<2x1xf32>
    %21 = vector.shape_cast %20 : vector<2x1xf32> to vector<2x1x1xf32>
    %22 = tpu.reciprocal %21 {approx = true} : vector<2x1x1xf32> -> vector<2x1x1xf32>
    %23 = vector.broadcast %22 : vector<2x1x1xf32> to vector<2x1x6xf32>
    %24 = arith.mulf %19, %23 : vector<2x1x6xf32>
    %25 = arith.truncf %24 : vector<2x1x6xf32> to vector<2x1x6xbf16>
    "tpu.trace_start"() <{level = 10 : i32, message = "bqs,bsh->bqh"}> : () -> ()
    %cst_12 = arith.constant dense<0.000000e+00> : vector<2x1x16xf32>
    %26 = tpu.matmul %25, %7, %cst_12 {dimension_numbers = #tpu.dot_dimension_numbers<[2], [1], [1], [2], [0, 0, 0, 1, 1, 2], [0], [0]>} : vector<2x1x6xbf16>, vector<2x6x16xbf16>, vector<2x1x16xf32> -> vector<2x1x16xf32>
    "tpu.trace_stop"() : () -> ()
    %27 = vector.shape_cast %26 : vector<2x1x16xf32> to vector<2x16xf32>
    %28 = arith.truncf %27 : vector<2x16xf32> to vector<2x16xbf16>
    %c0_13 = arith.constant 0 : index
    %c0_14 = arith.constant 0 : index
    %29 = vector.load %arg24[%c0_13, %c0_14] : memref<2x16xbf16, #tpu.memory_space<vmem>>, vector<2x16xbf16>
    %c0_15 = arith.constant 0 : index
    %c0_16 = arith.constant 0 : index
    %30 = vector.load %arg3[%c0_15, %c0_16] : memref<16x16xbf16, #tpu.memory_space<vmem>>, vector<16x16xbf16>
    %cst_17 = arith.constant dense<0.000000e+00> : vector<2x16xf32>
    %31 = tpu.matmul %29, %30, %cst_17 {dimension_numbers = #tpu.dot_dimension_numbers<[1], [0], [0], [1], [0, 0, 1, 1], [], []>} : vector<2x16xbf16>, vector<16x16xbf16>, vector<2x16xf32> -> vector<2x16xf32>
    %32 = arith.truncf %31 : vector<2x16xf32> to vector<2x16xbf16>
    %c0_18 = arith.constant 0 : index
    %c0_19 = arith.constant 0 : index
    %33 = vector.load %arg9[%c0_18, %c0_19] : memref<16x48xbf16, #tpu.memory_space<vmem>>, vector<16x48xbf16>
    %cst_20 = arith.constant dense<0.000000e+00> : vector<2x48xf32>
    %34 = tpu.matmul %32, %33, %cst_20 {dimension_numbers = #tpu.dot_dimension_numbers<[1], [0], [0], [1], [0, 0, 1, 1], [], []>} : vector<2x16xbf16>, vector<16x48xbf16>, vector<2x48xf32> -> vector<2x48xf32>
    %c0_21 = arith.constant 0 : index
    %c0_22 = arith.constant 0 : index
    %35 = vector.load %arg25[%c0_21, %c0_22] : memref<2x1xf32, #tpu.memory_space<vmem>>, vector<2x1xf32>
    %c0_23 = arith.constant 0 : index
    %c0_24 = arith.constant 0 : index
    %36 = vector.load %arg10[%c0_23, %c0_24] : memref<1x48xf32, #tpu.memory_space<vmem>>, vector<1x48xf32>
    %37 = vector.broadcast %35 : vector<2x1xf32> to vector<2x48xf32>
    %38 = vector.broadcast %36 : vector<1x48xf32> to vector<2x48xf32>
    %39 = arith.mulf %37, %38 : vector<2x48xf32>
    %40 = arith.addf %34, %39 : vector<2x48xf32>
    %c0_25 = arith.constant 0 : index
    %c0_26 = arith.constant 0 : index
    %41 = vector.load %arg11[%c0_25, %c0_26] : memref<16x48xbf16, #tpu.memory_space<vmem>>, vector<16x48xbf16>
    %cst_27 = arith.constant dense<0.000000e+00> : vector<2x48xf32>
    %42 = tpu.matmul %28, %41, %cst_27 {dimension_numbers = #tpu.dot_dimension_numbers<[1], [0], [0], [1], [0, 0, 1, 1], [], []>} : vector<2x16xbf16>, vector<16x48xbf16>, vector<2x48xf32> -> vector<2x48xf32>
    %43 = arith.addf %40, %42 : vector<2x48xf32>
    %c0_28 = arith.constant 0 : index
    %c0_29 = arith.constant 0 : index
    %44 = vector.load %arg13[%c0_28, %c0_29] : memref<1x48xf32, #tpu.memory_space<vmem>>, vector<1x48xf32>
    %45 = vector.broadcast %44 : vector<1x48xf32> to vector<2x48xf32>
    %46 = arith.addf %43, %45 : vector<2x48xf32>
    %c0_30 = arith.constant 0 : index
    %c0_31 = arith.constant 0 : index
    %47 = vector.load %arg12[%c0_30, %c0_31] : memref<16x48xbf16, #tpu.memory_space<vmem>>, vector<16x48xbf16>
    %cst_32 = arith.constant dense<0.000000e+00> : vector<2x48xf32>
    %48 = tpu.matmul %6, %47, %cst_32 {dimension_numbers = #tpu.dot_dimension_numbers<[1], [0], [0], [1], [0, 0, 1, 1], [], []>} : vector<2x16xbf16>, vector<16x48xbf16>, vector<2x48xf32> -> vector<2x48xf32>
    %c0_33 = arith.constant 0 : index
    %c0_34 = arith.constant 0 : index
    %49 = vector.load %arg14[%c0_33, %c0_34] : memref<1x48xf32, #tpu.memory_space<vmem>>, vector<1x48xf32>
    %50 = vector.broadcast %49 : vector<1x48xf32> to vector<2x48xf32>
    %51 = arith.addf %48, %50 : vector<2x48xf32>
    %52 = vector.extract_strided_slice %46 {offsets = [0, 0], sizes = [2, 16], strides = [1, 1]} : vector<2x48xf32> to vector<2x16xf32>
    %53 = vector.extract_strided_slice %51 {offsets = [0, 0], sizes = [2, 16], strides = [1, 1]} : vector<2x48xf32> to vector<2x16xf32>
    %54 = arith.addf %52, %53 : vector<2x16xf32>
    %55 = arith.negf %54 : vector<2x16xf32>
    %56 = math.exp %55 : vector<2x16xf32>
    %cst_35 = arith.constant 1.000000e+00 : f32
    %57 = vector.broadcast %cst_35 : f32 to vector<2x16xf32>
    %58 = arith.addf %57, %56 : vector<2x16xf32>
    %59 = arith.divf %57, %58 : vector<2x16xf32>
    %60 = vector.extract_strided_slice %46 {offsets = [0, 16], sizes = [2, 16], strides = [1, 1]} : vector<2x48xf32> to vector<2x16xf32>
    %61 = vector.extract_strided_slice %51 {offsets = [0, 16], sizes = [2, 16], strides = [1, 1]} : vector<2x48xf32> to vector<2x16xf32>
    %62 = arith.addf %60, %61 : vector<2x16xf32>
    %63 = arith.negf %62 : vector<2x16xf32>
    %64 = math.exp %63 : vector<2x16xf32>
    %cst_36 = arith.constant 1.000000e+00 : f32
    %65 = vector.broadcast %cst_36 : f32 to vector<2x16xf32>
    %66 = arith.addf %65, %64 : vector<2x16xf32>
    %67 = arith.divf %65, %66 : vector<2x16xf32>
    %68 = vector.extract_strided_slice %46 {offsets = [0, 32], sizes = [2, 16], strides = [1, 1]} : vector<2x48xf32> to vector<2x16xf32>
    %69 = vector.extract_strided_slice %51 {offsets = [0, 32], sizes = [2, 16], strides = [1, 1]} : vector<2x48xf32> to vector<2x16xf32>
    %70 = arith.mulf %59, %69 : vector<2x16xf32>
    %71 = arith.addf %68, %70 : vector<2x16xf32>
    %72 = math.tanh %71 : vector<2x16xf32>
    %cst_37 = arith.constant 1.000000e+00 : f32
    %73 = vector.broadcast %cst_37 : f32 to vector<2x16xf32>
    %74 = arith.subf %73, %67 : vector<2x16xf32>
    %75 = arith.mulf %74, %72 : vector<2x16xf32>
    %76 = arith.mulf %67, %5 : vector<2x16xf32>
    %77 = arith.addf %75, %76 : vector<2x16xf32>
    %78 = arith.truncf %77 : vector<2x16xf32> to vector<2x16xbf16>
    %c0_38 = arith.constant 0 : index
    %c0_39 = arith.constant 0 : index
    %79 = vector.load %arg15[%c0_38, %c0_39] : memref<16x16xbf16, #tpu.memory_space<vmem>>, vector<16x16xbf16>
    %cst_40 = arith.constant dense<0.000000e+00> : vector<2x16xf32>
    %80 = tpu.matmul %78, %79, %cst_40 {dimension_numbers = #tpu.dot_dimension_numbers<[1], [0], [0], [1], [0, 0, 1, 1], [], []>} : vector<2x16xbf16>, vector<16x16xbf16>, vector<2x16xf32> -> vector<2x16xf32>
    %c0_41 = arith.constant 0 : index
    %c0_42 = arith.constant 0 : index
    %81 = vector.load %arg16[%c0_41, %c0_42] : memref<16x16xbf16, #tpu.memory_space<vmem>>, vector<16x16xbf16>
    %cst_43 = arith.constant dense<0.000000e+00> : vector<2x16xf32>
    %82 = tpu.matmul %28, %81, %cst_43 {dimension_numbers = #tpu.dot_dimension_numbers<[1], [0], [0], [1], [0, 0, 1, 1], [], []>} : vector<2x16xbf16>, vector<16x16xbf16>, vector<2x16xf32> -> vector<2x16xf32>
    %83 = arith.addf %80, %82 : vector<2x16xf32>
    %c0_44 = arith.constant 0 : index
    %c0_45 = arith.constant 0 : index
    %84 = vector.load %arg17[%c0_44, %c0_45] : memref<1x16xf32, #tpu.memory_space<vmem>>, vector<1x16xf32>
    %85 = vector.broadcast %84 : vector<1x16xf32> to vector<2x16xf32>
    %86 = arith.addf %83, %85 : vector<2x16xf32>
    %cst_46 = arith.constant dense<0xFF800000> : vector<2xf32>
    %87 = vector.multi_reduction <maximumf>, %86, %cst_46 [1] : vector<2x16xf32> to vector<2xf32>
    %88 = vector.shape_cast %87 : vector<2xf32> to vector<2x1xf32>
    %89 = vector.broadcast %88 : vector<2x1xf32> to vector<2x16xf32>
    %90 = arith.subf %86, %89 : vector<2x16xf32>
    %91 = math.exp %90 : vector<2x16xf32>
    %cst_47 = arith.constant dense<0.000000e+00> : vector<2xf32>
    %92 = vector.multi_reduction <add>, %91, %cst_47 [1] : vector<2x16xf32> to vector<2xf32>
    %93 = vector.shape_cast %92 : vector<2xf32> to vector<2x1xf32>
    %94 = tpu.reciprocal %93 {approx = true} : vector<2x1xf32> -> vector<2x1xf32>
    %95 = vector.broadcast %94 : vector<2x1xf32> to vector<2x16xf32>
    %96 = arith.mulf %91, %95 : vector<2x16xf32>
    %c0_48 = arith.constant 0 : index
    %c0_49 = arith.constant 0 : index
    %c0_50 = arith.constant 0 : index
    %97 = vector.load %arg8[%c0_48, %c0_49, %c0_50] : memref<1x2x16xbf16, #tpu.memory_space<vmem>>, vector<1x2x16xbf16>
    %98 = vector.shape_cast %97 : vector<1x2x16xbf16> to vector<2x16xbf16>
    %99 = arith.extf %98 : vector<2x16xbf16> to vector<2x16xf32>
    %100 = arith.mulf %96, %99 : vector<2x16xf32>
    %c0_51 = arith.constant 0 : index
    %c0_52 = arith.constant 0 : index
    %101 = vector.load %arg18[%c0_51, %c0_52] : memref<16x1xbf16, #tpu.memory_space<vmem>>, vector<16x1xbf16>
    %cst_53 = arith.constant dense<0.000000e+00> : vector<2x1xf32>
    %102 = tpu.matmul %78, %101, %cst_53 {dimension_numbers = #tpu.dot_dimension_numbers<[1], [0], [0], [1], [0, 0, 1, 1], [], []>} : vector<2x16xbf16>, vector<16x1xbf16>, vector<2x1xf32> -> vector<2x1xf32>
    %c0_54 = arith.constant 0 : index
    %c0_55 = arith.constant 0 : index
    %103 = vector.load %arg19[%c0_54, %c0_55] : memref<16x1xbf16, #tpu.memory_space<vmem>>, vector<16x1xbf16>
    %cst_56 = arith.constant dense<0.000000e+00> : vector<2x1xf32>
    %104 = tpu.matmul %28, %103, %cst_56 {dimension_numbers = #tpu.dot_dimension_numbers<[1], [0], [0], [1], [0, 0, 1, 1], [], []>} : vector<2x16xbf16>, vector<16x1xbf16>, vector<2x1xf32> -> vector<2x1xf32>
    %105 = arith.addf %102, %104 : vector<2x1xf32>
    %c0_57 = arith.constant 0 : index
    %c0_58 = arith.constant 0 : index
    %106 = vector.load %arg20[%c0_57, %c0_58] : memref<1x1xf32, #tpu.memory_space<vmem>>, vector<1x1xf32>
    %107 = vector.broadcast %106 : vector<1x1xf32> to vector<2x1xf32>
    %108 = arith.addf %105, %107 : vector<2x1xf32>
    %109 = arith.negf %108 : vector<2x1xf32>
    %110 = math.exp %109 : vector<2x1xf32>
    %cst_59 = arith.constant 1.000000e+00 : f32
    %111 = vector.broadcast %cst_59 : f32 to vector<2x1xf32>
    %112 = arith.addf %111, %110 : vector<2x1xf32>
    %113 = arith.divf %111, %112 : vector<2x1xf32>
    %c0_60 = arith.constant 0 : index
    %c0_61 = arith.constant 0 : index
    %c0_62 = arith.constant 0 : index
    %114 = vector.load %arg21[%c0_60, %c0_61, %c0_62] : memref<1x2x16xf32, #tpu.memory_space<vmem>>, vector<1x2x16xf32>
    %115 = vector.shape_cast %114 : vector<1x2x16xf32> to vector<2x16xf32>
    %116 = vector.shape_cast %100 : vector<2x16xf32> to vector<1x2x16xf32>
    tpu.vector_store %arg21[%c0_60, %c0_61, %c0_62], %116 {strides = array<i32>} : memref<1x2x16xf32, #tpu.memory_space<vmem>>, vector<1x2x16xf32>,
    %c0_63 = arith.constant 0 : index
    %c0_64 = arith.constant 0 : index
    %c0_65 = arith.constant 0 : index
    %117 = vector.load %arg22[%c0_63, %c0_64, %c0_65] : memref<1x2x1xf32, #tpu.memory_space<vmem>>, vector<1x2x1xf32>
    %118 = vector.shape_cast %117 : vector<1x2x1xf32> to vector<2x1xf32>
    %119 = vector.shape_cast %113 : vector<2x1xf32> to vector<1x2x1xf32>
    tpu.vector_store %arg22[%c0_63, %c0_64, %c0_65], %119 {strides = array<i32>} : memref<1x2x1xf32, #tpu.memory_space<vmem>>, vector<1x2x1xf32>,
    %cst_66 = arith.constant dense<0xFF800000> : vector<2xf32>
    %120 = vector.multi_reduction <maximumf>, %100, %cst_66 [1] : vector<2x16xf32> to vector<2xf32>
    %121 = vector.shape_cast %120 : vector<2xf32> to vector<2x1xf32>
    %122 = vector.broadcast %121 : vector<2x1xf32> to vector<2x16xf32>
    %123 = arith.cmpf oge, %100, %122 : vector<2x16xf32>
    %cst_67 = arith.constant 1.600000e+01 : f32
    %124 = vector.broadcast %cst_67 : f32 to vector<2x16xf32>
    %125 = arith.select %123, %1, %124 : vector<2x16xi1>, vector<2x16xf32>
    %cst_68 = arith.constant dense<0x7F800000> : vector<2xf32>
    %126 = vector.multi_reduction <minimumf>, %125, %cst_68 [1] : vector<2x16xf32> to vector<2xf32>
    %127 = vector.shape_cast %126 : vector<2xf32> to vector<2x1xf32>
    %128 = vector.broadcast %127 : vector<2x1xf32> to vector<2x16xf32>
    %129 = arith.cmpf oeq, %1, %128 : vector<2x16xf32>
    %130 = arith.extui %129 : vector<2x16xi1> to vector<2x16xi32>
    %131 = arith.sitofp %130 : vector<2x16xi32> to vector<2x16xf32>
    %132 = tpu.iota {dimensions = array<i32: 1>} : vector<2x8xi32>
    %c1_i32 = arith.constant 1 : i32
    %133 = arith.addi %arg0, %c1_i32 : i32
    %134 = vector.broadcast %133 : i32 to vector<2x8xi32>
    %135 = arith.cmpi eq, %132, %134 : vector<2x8xi32>
    %136 = arith.extui %135 : vector<2x8xi1> to vector<2x8xi32>
    %137 = arith.sitofp %136 : vector<2x8xi32> to vector<2x8xf32>
    %c0_69 = arith.constant 0 : index
    %c0_70 = arith.constant 0 : index
    %138 = vector.load %arg6[%c0_69, %c0_70] : memref<2x8xf32, #tpu.memory_space<vmem>>, vector<2x8xf32>
    %139 = arith.mulf %138, %137 : vector<2x8xf32>
    %cst_71 = arith.constant dense<0.000000e+00> : vector<2xf32>
    %140 = vector.multi_reduction <add>, %139, %cst_71 [1] : vector<2x8xf32> to vector<2xf32>
    %141 = vector.shape_cast %140 : vector<2xf32> to vector<2x1xf32>
    %c0_72 = arith.constant 0 : index
    %c0_73 = arith.constant 0 : index
    %142 = vector.load %arg7[%c0_72, %c0_73] : memref<2x8xf32, #tpu.memory_space<vmem>>, vector<2x8xf32>
    %143 = arith.mulf %142, %137 : vector<2x8xf32>
    %cst_74 = arith.constant dense<0.000000e+00> : vector<2xf32>
    %144 = vector.multi_reduction <add>, %143, %cst_74 [1] : vector<2x8xf32> to vector<2xf32>
    %145 = vector.shape_cast %144 : vector<2xf32> to vector<2x1xf32>
    %146 = vector.broadcast %141 : vector<2x1xf32> to vector<2x16xf32>
    %147 = arith.cmpf oeq, %1, %146 : vector<2x16xf32>
    %148 = arith.extui %147 : vector<2x16xi1> to vector<2x16xi32>
    %149 = arith.sitofp %148 : vector<2x16xi32> to vector<2x16xf32>
    %150 = arith.index_cast %arg0 : i32 to index
    %151 = memref.load %arg1[%150] : memref<7xi32, #tpu.memory_space<smem>>
    %c0_i32_75 = arith.constant 0 : i32
    %152 = arith.cmpi sgt, %151, %c0_i32_75 : i32
    %153 = arith.extui %152 : i1 to i32
    %154 = arith.sitofp %153 : i32 to f32
    %155 = vector.broadcast %154 : f32 to vector<2x16xf32>
    %156 = arith.mulf %155, %149 : vector<2x16xf32>
    %cst_76 = arith.constant 1.000000e+00 : f32
    %157 = arith.subf %cst_76, %154 : f32
    %158 = vector.broadcast %157 : f32 to vector<2x16xf32>
    %159 = arith.mulf %158, %131 : vector<2x16xf32>
    %160 = arith.addf %156, %159 : vector<2x16xf32>
    %161 = arith.truncf %160 : vector<2x16xf32> to vector<2x16xbf16>
    %c0_77 = arith.constant 0 : index
    %c0_78 = arith.constant 0 : index
    %162 = vector.load %arg24[%c0_77, %c0_78] : memref<2x16xbf16, #tpu.memory_space<vmem>>, vector<2x16xbf16>
    tpu.vector_store %arg24[%c0_77, %c0_78], %161 {strides = array<i32>} : memref<2x16xbf16, #tpu.memory_space<vmem>>, vector<2x16xbf16>,
    %163 = vector.broadcast %154 : f32 to vector<2x1xf32>
    %164 = arith.mulf %163, %145 : vector<2x1xf32>
    %cst_79 = arith.constant 1.000000e+00 : f32
    %165 = arith.subf %cst_79, %154 : f32
    %166 = vector.broadcast %165 : f32 to vector<2x1xf32>
    %167 = arith.mulf %166, %113 : vector<2x1xf32>
    %168 = arith.addf %164, %167 : vector<2x1xf32>
    %c0_80 = arith.constant 0 : index
    %c0_81 = arith.constant 0 : index
    %169 = vector.load %arg25[%c0_80, %c0_81] : memref<2x1xf32, #tpu.memory_space<vmem>>, vector<2x1xf32>
    tpu.vector_store %arg25[%c0_80, %c0_81], %168 {strides = array<i32>} : memref<2x1xf32, #tpu.memory_space<vmem>>, vector<2x1xf32>,
    %c0_82 = arith.constant 0 : index
    %c0_83 = arith.constant 0 : index
    %170 = vector.load %arg23[%c0_82, %c0_83] : memref<2x16xf32, #tpu.memory_space<vmem>>, vector<2x16xf32>
    tpu.vector_store %arg23[%c0_82, %c0_83], %77 {strides = array<i32>} : memref<2x16xf32, #tpu.memory_space<vmem>>, vector<2x16xf32>,
    return
  }
  func.func @transform_0(%arg0: i32, %arg1: memref<7xi32, #tpu.memory_space<smem>>) -> (i32, i32) {
    %c0_i32 = arith.constant 0 : i32
    %c0_i32_0 = arith.constant 0 : i32
    %c0_i32_1 = arith.constant 0 : i32
    return %c0_i32, %c0_i32_0 : i32, i32
  }
  func.func @transform_1(%arg0: i32, %arg1: memref<7xi32, #tpu.memory_space<smem>>) -> (i32, i32) {
    %c0_i32 = arith.constant 0 : i32
    %c0_i32_0 = arith.constant 0 : i32
    %c0_i32_1 = arith.constant 0 : i32
    return %c0_i32, %c0_i32_0 : i32, i32
  }
  func.func @transform_2(%arg0: i32, %arg1: memref<7xi32, #tpu.memory_space<smem>>) -> (i32, i32, i32) {
    %c0_i32 = arith.constant 0 : i32
    %c0_i32_0 = arith.constant 0 : i32
    %c0_i32_1 = arith.constant 0 : i32
    %c0_i32_2 = arith.constant 0 : i32
    return %c0_i32, %c0_i32_0, %c0_i32_1 : i32, i32, i32
  }
  func.func @transform_3(%arg0: i32, %arg1: memref<7xi32, #tpu.memory_space<smem>>) -> (i32, i32, i32) {
    %c0_i32 = arith.constant 0 : i32
    %c0_i32_0 = arith.constant 0 : i32
    %c0_i32_1 = arith.constant 0 : i32
    %c0_i32_2 = arith.constant 0 : i32
    return %c0_i32, %c0_i32_0, %c0_i32_1 : i32, i32, i32
  }
  func.func @transform_4(%arg0: i32, %arg1: memref<7xi32, #tpu.memory_space<smem>>) -> (i32, i32) {
    %c0_i32 = arith.constant 0 : i32
    %c0_i32_0 = arith.constant 0 : i32
    %c0_i32_1 = arith.constant 0 : i32
    return %c0_i32, %c0_i32_0 : i32, i32
  }
  func.func @transform_5(%arg0: i32, %arg1: memref<7xi32, #tpu.memory_space<smem>>) -> (i32, i32) {
    %c0_i32 = arith.constant 0 : i32
    %c0_i32_0 = arith.constant 0 : i32
    %c0_i32_1 = arith.constant 0 : i32
    return %c0_i32, %c0_i32_0 : i32, i32
  }
  func.func @transform_6(%arg0: i32, %arg1: memref<7xi32, #tpu.memory_space<smem>>) -> (i32, i32, i32) {
    %c1_i32 = arith.constant 1 : i32
    %0 = arith.addi %arg0, %c1_i32 : i32
    %c0_i32 = arith.constant 0 : i32
    %c0_i32_0 = arith.constant 0 : i32
    %c0_i32_1 = arith.constant 0 : i32
    return %0, %c0_i32, %c0_i32_0 : i32, i32, i32
  }
  func.func @transform_7(%arg0: i32, %arg1: memref<7xi32, #tpu.memory_space<smem>>) -> (i32, i32) {
    %c0_i32 = arith.constant 0 : i32
    %c0_i32_0 = arith.constant 0 : i32
    %c0_i32_1 = arith.constant 0 : i32
    return %c0_i32, %c0_i32_0 : i32, i32
  }
  func.func @transform_8(%arg0: i32, %arg1: memref<7xi32, #tpu.memory_space<smem>>) -> (i32, i32) {
    %c0_i32 = arith.constant 0 : i32
    %c0_i32_0 = arith.constant 0 : i32
    %c0_i32_1 = arith.constant 0 : i32
    return %c0_i32, %c0_i32_0 : i32, i32
  }
  func.func @transform_9(%arg0: i32, %arg1: memref<7xi32, #tpu.memory_space<smem>>) -> (i32, i32) {
    %c0_i32 = arith.constant 0 : i32
    %c0_i32_0 = arith.constant 0 : i32
    %c0_i32_1 = arith.constant 0 : i32
    return %c0_i32, %c0_i32_0 : i32, i32
  }
  func.func @transform_10(%arg0: i32, %arg1: memref<7xi32, #tpu.memory_space<smem>>) -> (i32, i32) {
    %c0_i32 = arith.constant 0 : i32
    %c0_i32_0 = arith.constant 0 : i32
    %c0_i32_1 = arith.constant 0 : i32
    return %c0_i32, %c0_i32_0 : i32, i32
  }
  func.func @transform_11(%arg0: i32, %arg1: memref<7xi32, #tpu.memory_space<smem>>) -> (i32, i32) {
    %c0_i32 = arith.constant 0 : i32
    %c0_i32_0 = arith.constant 0 : i32
    %c0_i32_1 = arith.constant 0 : i32
    return %c0_i32, %c0_i32_0 : i32, i32
  }
  func.func @transform_12(%arg0: i32, %arg1: memref<7xi32, #tpu.memory_space<smem>>) -> (i32, i32) {
    %c0_i32 = arith.constant 0 : i32
    %c0_i32_0 = arith.constant 0 : i32
    %c0_i32_1 = arith.constant 0 : i32
    return %c0_i32, %c0_i32_0 : i32, i32
  }
  func.func @transform_13(%arg0: i32, %arg1: memref<7xi32, #tpu.memory_space<smem>>) -> (i32, i32) {
    %c0_i32 = arith.constant 0 : i32
    %c0_i32_0 = arith.constant 0 : i32
    %c0_i32_1 = arith.constant 0 : i32
    return %c0_i32, %c0_i32_0 : i32, i32
  }
  func.func @transform_14(%arg0: i32, %arg1: memref<7xi32, #tpu.memory_space<smem>>) -> (i32, i32) {
    %c0_i32 = arith.constant 0 : i32
    %c0_i32_0 = arith.constant 0 : i32
    %c0_i32_1 = arith.constant 0 : i32
    return %c0_i32, %c0_i32_0 : i32, i32
  }
  func.func @transform_15(%arg0: i32, %arg1: memref<7xi32, #tpu.memory_space<smem>>) -> (i32, i32) {
    %c0_i32 = arith.constant 0 : i32
    %c0_i32_0 = arith.constant 0 : i32
    %c0_i32_1 = arith.constant 0 : i32
    return %c0_i32, %c0_i32_0 : i32, i32
  }
  func.func @transform_16(%arg0: i32, %arg1: memref<7xi32, #tpu.memory_space<smem>>) -> (i32, i32) {
    %c0_i32 = arith.constant 0 : i32
    %c0_i32_0 = arith.constant 0 : i32
    %c0_i32_1 = arith.constant 0 : i32
    return %c0_i32, %c0_i32_0 : i32, i32
  }
  func.func @transform_17(%arg0: i32, %arg1: memref<7xi32, #tpu.memory_space<smem>>) -> (i32, i32) {
    %c0_i32 = arith.constant 0 : i32
    %c0_i32_0 = arith.constant 0 : i32
    %c0_i32_1 = arith.constant 0 : i32
    return %c0_i32, %c0_i32_0 : i32, i32
  }
  func.func @transform_18(%arg0: i32, %arg1: memref<7xi32, #tpu.memory_space<smem>>) -> (i32, i32) {
    %c0_i32 = arith.constant 0 : i32
    %c0_i32_0 = arith.constant 0 : i32
    %c0_i32_1 = arith.constant 0 : i32
    return %c0_i32, %c0_i32_0 : i32, i32
  }
  func.func @transform_19(%arg0: i32, %arg1: memref<7xi32, #tpu.memory_space<smem>>) -> (i32, i32, i32) {
    %c0_i32 = arith.constant 0 : i32
    %c0_i32_0 = arith.constant 0 : i32
    %c0_i32_1 = arith.constant 0 : i32
    return %arg0, %c0_i32, %c0_i32_0 : i32, i32, i32
  }
  func.func @transform_20(%arg0: i32, %arg1: memref<7xi32, #tpu.memory_space<smem>>) -> (i32, i32, i32) {
    %c0_i32 = arith.constant 0 : i32
    %c0_i32_0 = arith.constant 0 : i32
    %c0_i32_1 = arith.constant 0 : i32
    return %arg0, %c0_i32, %c0_i32_0 : i32, i32, i32
  }
}

</mosaic_0001>

<bundles_post_ra>
// kernel: seq2seq_multi_forward.5
= control target key start
LH: loop header
LB: loop body
LE: loop exit
PB: predicated region body
PF: predicated region fallthrough
CT: control target
= control target key end

     0   :  { %vm57_vm0 = vcmask 261120   ;;  %vm130_vm1 = vcmask 130048   ;;  %v456_v33 = vmov 0.0   ;;  %vm457_vm2 = vmmov 0   ;;  %s542_s0 = inlined_call_operand.vmem [shape: bf16[32,16], index: 0, kind: input, shape index: {}]   ;;  %s543_s1 = inlined_call_operand.vmem [shape: bf16[32,32], index: 1, kind: input, shape index: {}]   ;;  %s544_s3 = inlined_call_operand.vmem [shape: bf16[16,16], index: 3, kind: input, shape index: {}]   ;;  %s545_s5 = inlined_call_operand.vmem [shape: bf16[16,16], index: 5, kind: input, shape index: {}]   ;;  %s546_s4 = inlined_call_operand.vmem [shape: f32[1,16], index: 4, kind: input, shape index: {}]   ;;  %s547_s2 = inlined_call_operand.vmem [shape: bf16[16,32], index: 2, kind: input, shape index: {}]   ;;  %s548_s6 = inlined_call_operand.vmem [shape: f32[1,16], index: 6, kind: input, shape index: {}]   ;;  %s549_s7 = inlined_call_operand.vmem [shape: f32[16,16], index: 7, kind: output, shape index: {}]  }
   0x1   :  { %v449_v0 = vld [vmem:[%s542_s0] sm:$0xff]   ;;  %v450_v1 = vld [vmem:[%s542_s0 + $0x8] sm:$0xff]  }
   0x2   :  { %411 = vmatprep.subr.bf16.mxu0 %v449_v0  ;;  %v451_v2 = vld [vmem:[%s543_s1] sm:$0xff]   ;;  %v452_v3 = vld [vmem:[%s543_s1 + $0x8] sm:$0xff]  }
   0x3   :  { %412 = vmatpush3.bf16.msra.mxu0 %v449_v0  ;;  %415 = vmatprep.mubr.msk.bf16.mxu0 %vm57_vm0, %v451_v2  ;;  %v453_v4 = vld [vmem:[%s544_s3] sm:$0xff]  }
   0x4   :  { %413 = vmatprep.subr.bf16.mxu0 %v450_v1  ;;  %419 = vmatprep.subr.bf16.mxu1 %v453_v4  ;;  %v454_v11 = vld [vmem:[%s545_s5] sm:$0xff]  }
   0x5   :  { %420 = vmatpush3.bf16.msra.mxu1 %v453_v4  ;;  %v382_v12 = vld [vmem:[%s546_s4] ss:$0 sm:$0xff] }
   0x6   :  { %v388_v34 = vld [vmem:[%s548_s6] ss:$0 sm:$0xff] }
   0x7   :  { %414 = vmatpush3.bf16.msra.mxu0 %v450_v1  ;;  %v455_v49 = vld [vmem:[%s547_s2] sm:$0xff]  }
   0x8   :  { %433 = vmatprep.subr.bf16.mxu0 %v454_v11 }
   0xa   :  { %416 = vmatmul.mubr.msk.bf16.vlgmr.msra.gmra.mrb[0].mxu0 %vm57_vm0, %v452_v3 }
   0xb   :  { %434 = vmatpush3.bf16.msra.mxu0 %v454_v11 }
  0xdd   :  { %v417_v5 = vpop.f32.mrb[0].mxu0 }
  0xde   :  { %v98_v6 = vpop.f32.mrb[1].mxu0 }
  0xdf   :  { %v418_v7 = vpop.f32.mrb[2].mxu0 }
  0xe0   :  { %v114_v8 = vpack.c.bf16 %v418_v7, %v417_v5  ;;  %v101_v9 = vpop.f32.mrb[3].mxu0 }
  0xe1   :  { %v113_v10 = vpack.c.bf16 %v101_v9, %v98_v6 }
  0xe3   :  { %421 = vmatprep.mubr.msk.bf16.mxu1 %vm130_vm1, %v113_v10 }
  0xe4   :  { %422 = vmatmul.mubr.msk.bf16.vlgmr.msra.gmra.mrb[0].mxu1 %vm130_vm1, %v114_v8 }
  0xe5   :  { %429 = vmatprep.mubr.msk.bf16.mxu1 %vm57_vm0, %v451_v2 }
 0x1b7   :  { %v423_v13 = vpop.f32.mrb[0].mxu1 }
 0x1b8   :  { %v180_v14 = vadd.f32 %v423_v13, %v382_v12  ;;  %v171_v15 = vpop.f32.mrb[1].mxu1 }
 0x1b9   :  { %v172_v16 = vadd.f32 %v382_v12, %v171_v15  ;;  %v424_v17 = vpop.f32.mrb[2].mxu1 }
 0x1ba   :  { %v183_v18 = vadd.f32 %v424_v17, %v382_v12  ;;  %v174_v19 = vpop.f32.mrb[3].mxu1  ;;  %v188_v21 = vmax.f32 %v180_v14, 0.0 }
 0x1bb   :  { %v175_v20 = vadd.f32 %v382_v12, %v174_v19  ;;  %v186_v23 = vmax.f32 %v172_v16, 0.0 }
 0x1bc   :  { %v189_v22 = vmax.f32 %v183_v18, 0.0 }
 0x1bd   :  { %v187_v24 = vmax.f32 %v175_v20, 0.0 }
 0x1be   :  { %v191_v25 = vpack.c.bf16 %v189_v22, %v188_v21 }
 0x1bf   :  { %v190_v26 = vpack.c.bf16 %v187_v24, %v186_v23 }
 0x1c1   :  { %425 = vmatprep.subr.bf16.mxu1 %v190_v26 }
 0x1c2   :  { %426 = vmatpush3.bf16.msra.mxu1 %v190_v26 }
 0x1c3   :  { %427 = vmatprep.subr.bf16.mxu1 %v191_v25 }
 0x1c6   :  { %428 = vmatpush3.bf16.msra.mxu1 %v191_v25 }
 0x1c7   :  { %439 = vmatprep.subr.bf16.mxu1 %v456_v33 }
 0x1c9   :  { %430 = vmatmul.mubr.msk.bf16.vlgmr.msra.gmra.mrb[4].mxu1 %vm57_vm0, %v452_v3 }
 0x1ca   :  { %443 = vmatprep.mubr.msk.bf16.mxu1 %vm457_vm2, %v456_v33 }
 0x29c   :  { %v431_v27 = vpop.f32.mrb[4].mxu1 }
 0x29d   :  { %v226_v28 = vpop.f32.mrb[5].mxu1 }
 0x29e   :  { %v432_v29 = vpop.f32.mrb[6].mxu1 }
 0x29f   :  { %v242_v30 = vpack.c.bf16 %v432_v29, %v431_v27  ;;  %v229_v31 = vpop.f32.mrb[7].mxu1 }
 0x2a0   :  { %v241_v32 = vpack.c.bf16 %v229_v31, %v226_v28 }
 0x2a2   :  { %435 = vmatprep.mubr.msk.bf16.mxu0 %vm130_vm1, %v241_v32 }
 0x2a3   :  { %436 = vmatmul.mubr.msk.bf16.vlgmr.msra.gmra.mrb[4].mxu0 %vm130_vm1, %v242_v30 }
 0x376   :  { %v437_v35 = vpop.f32.mrb[4].mxu0 }
 0x377   :  { %v307_v36 = vadd.f32 %v437_v35, %v388_v34  ;;  %v298_v37 = vpop.f32.mrb[5].mxu0 }
 0x378   :  { %v299_v38 = vadd.f32 %v388_v34, %v298_v37  ;;  %v438_v39 = vpop.f32.mrb[6].mxu0 }
 0x379   :  { %v310_v40 = vadd.f32 %v438_v39, %v388_v34  ;;  %v301_v41 = vpop.f32.mrb[7].mxu0  ;;  %v315_v43 = vmax.f32 %v307_v36, 0.0 }
 0x37a   :  { %v302_v42 = vadd.f32 %v388_v34, %v301_v41  ;;  %v313_v45 = vmax.f32 %v299_v38, 0.0 }
 0x37b   :  { %v316_v44 = vmax.f32 %v310_v40, 0.0 }
 0x37c   :  { %v314_v46 = vmax.f32 %v302_v42, 0.0 }
 0x37d   :  { %v320_v47 = vpack.c.bf16 %v316_v44, %v315_v43 }
 0x37e   :  { %v319_v48 = vpack.c.bf16 %v314_v46, %v313_v45 }
 0x380   :  { %440 = vmatpush3.bf16.msra.mxu1 %v319_v48 }
 0x381   :  { %441 = vmatprep.subr.bf16.mxu1 %v456_v33 }
 0x384   :  { %442 = vmatpush3.bf16.msra.mxu1 %v320_v47 }
 0x387   :  { %444 = vmatmul.mubr.msk.bf16.vlgmr.msra.gmra.mrb[8].mxu1 %vm57_vm0, %v455_v49 }
 0x45a   :  { %v363_v50 = vpop.f32.mrb[8].mxu1 }
 0x45b   :  { %370 = vst.msk [vmem:[%s549_s7] sm:$0xff] %vm130_vm1, %v363_v50  ;;  %v445_v51 = vpop.f32.mrb[9].mxu1 }
 0x45c   :  { %v366_v52 = vpop.f32.mrb[10].mxu1 }
 0x45d   :  { %371 = vst.msk [vmem:[%s549_s7 + $0x8] sm:$0xff] %vm130_vm1, %v366_v52  ;;  %v446_v53 = vpop.f32.mrb[11].mxu1 }

// kernel: seq2seq_multi_forward.4
= control target key start
LH: loop header
LB: loop body
LE: loop exit
PB: predicated region body
PF: predicated region fallthrough
CT: control target
= control target key end

     0   :  { %v1238_v1 = vmov 0.0   ;;  %vm1239_vm0 = vmmov 0   ;;  %vm36_vm1 = vcmask 130048   ;;  %s1532_s0 = inlined_call_operand.vmem [shape: bf16[4,16,16], index: 0, kind: input, shape index: {}]   ;;  %s1533_s1 = inlined_call_operand.vmem [shape: f32[16,1], index: 1, kind: input, shape index: {}]   ;;  %s1534_s2 = inlined_call_operand.vmem [shape: f32[16,16], index: 2, kind: input, shape index: {}]   ;;  %s1535_s3 = inlined_call_operand.vmem [shape: bf16[16,48], index: 3, kind: input, shape index: {}]   ;;  %s1536_s4 = inlined_call_operand.vmem [shape: bf16[16,48], index: 4, kind: input, shape index: {}]   ;;  %s1537_s5 = inlined_call_operand.vmem [shape: f32[1,48], index: 5, kind: input, shape index: {}]   ;;  %s1538_s6 = inlined_call_operand.vmem [shape: f32[1,48], index: 6, kind: input, shape index: {}]   ;;  %s1539_s7 = inlined_call_operand.hbm [shape: f32[4,16,16], index: 7, kind: output, shape index: {0}]   ;;  %s1540_s8 = inlined_call_operand.vmem [shape: f32[16,16], index: 8, kind: output, shape index: {1}]  }
   0x1   :  { %v1154_v0 = vld [vmem:[%s1535_s3] sm:$0xff]   ;;  %1074 = vmatprep.subr.bf16.mxu0 %v1238_v1  ;;  %1080 = vmatprep.subr.bf16.mxu1 %v1238_v1  ;;  %v35_v5 = vld [vmem:[%s1534_s2 + $0x8] sm:$0xff] }
   0x2   :  { %v1155_v2 = vld [vmem:[%s1536_s4] sm:$0xff]   ;;  %1075 = vmatpush3.bf16.msra.mxu0 %v1154_v0  ;;  %1076 = vmatprep.mubr.msk.bf16.mxu0 %vm1239_vm0, %v1238_v1  ;;  %38 = vst.msk [vmem:[#allocation2 + $0x8] sm:$0xff] %vm36_vm1, %v35_v5 }
   0x3   :  { %v1156_v3 = vld [vmem:[%s1532_s0] sm:$0xff]   ;;  %1081 = vmatpush3.bf16.msra.mxu1 %v1155_v2  ;;  %1082 = vmatprep.mubr.msk.bf16.mxu1 %vm1239_vm0, %v1238_v1 }
   0x4   :  { %v34_v4 = vld [vmem:[%s1534_s2] sm:$0xff]  ;;  %1092 = vmatprep.subr.bf16.mxu1 %v1238_v1  ;;  %1086 = vmatprep.subr.bf16.mxu0 %v1238_v1 }
   0x5   :  { %37 = vst.msk [vmem:[#allocation2] sm:$0xff] %vm36_vm1, %v34_v4  ;;  %1077 = vmatmul.mubr.msk.bf16.vlgmr.msra.gmra.mrb[0].mxu0 %vm36_vm1, %v1156_v3 }
   0x6   :  { %1088 = vmatprep.mubr.msk.bf16.mxu0 %vm1239_vm0, %v1238_v1 }
   0x7   :  { %14 = vsyncpa [#allocation4], 0  ;;  %v1240_v13 = vmov 0   ;;  %v1333_v14 = vld [vmem:[%s1538_s6] ss:$0 sm:$0xff]  ;;  %s1241_s18 = smov 96  }
   0x8   :  { %1133 = vset.pattern.permute.xlu1 %v1240_v13  ;;  %1132 = vset.pattern.permute.xlu0 %v1240_v13  ;;  %v1338_v15 = vld [vmem:[%s1533_s1] sm:$0xff]  ;;  %v1356_v35 = vld [vmem:[%s1533_s1 + $0x8] sm:$0xff]  ;;  %s1243_s1 = smov 112   ;;  %s1244_s22 = smov 16  }
   0x9   :  { %v1323_v7 = vld [vmem:[#allocation2 + $0x8] sm:$0xff]  ;;  %vm233_vm2 = vcmp.gt.f32.partialorder %v1338_v15, 0.0  ;;  %v1349_v24 = vld [vmem:[%s1537_s5] ss:$0 sm:$0xff]  ;;  %vm234_vm3 = vcmp.gt.f32.partialorder %v1356_v35, 0.0  ;;  %s1242_s5 = smov 32  }
   0xa   :  { %v1017_v21 = vsel %vm233_vm2, 1.0, %v1238_v1  ;;  %v1018_v41 = vsel %vm234_vm3, 1.0, %v1238_v1  ;;  %v1157_v53 = vld [vmem:[%s1536_s4] sm:$0xff]   ;;  %v1159_v62 = vld [vmem:[%s1532_s0 + $0x8] sm:$0xff]   ;;  %vm472_vm4 = vcmp.gt.f32.partialorder %v1338_v15, 1.0  ;;  %vm473_vm5 = vcmp.gt.f32.partialorder %v1356_v35, 1.0 }
   0xb   :  { %v251_v23 = vsub.f32 1.0, %v1017_v21  ;;  %v252_v43 = vsub.f32 1.0, %v1018_v41  ;;  %v1134_v44 = vpack.i.bf16 %v1018_v41, %v1017_v21  ;;  %v1158_v54 = vld [vmem:[%s1535_s3] sm:$0xff]   ;;  %vm704_vm6 = vcmp.gt.f32.partialorder %v1338_v15, 2.0 }
   0xc   :  { %v1321_v6 = vld [vmem:[#allocation2] sm:$0xff]  ;;  %1087 = vmatpush3.bf16.msra.mxu0 %v1158_v54  ;;  %vm705_vm7 = vcmp.gt.f32.partialorder %v1356_v35, 2.0  ;;  %vm936_vm8 = vcmp.gt.f32.partialorder %v1338_v15, 3.0  ;;  %vm937_vm9 = vcmp.gt.f32.partialorder %v1356_v35, 3.0 }
   0xd   :  { %v109_v8 = vpack.c.bf16 %v1323_v7, %v1321_v6  ;;  %1098 = vmatprep.subr.bf16.mxu0 %v1238_v1 }
   0xf   :  { %1083 = vmatmul.mubr.msk.bf16.vlgmr.msra.gmra.mrb[0].mxu1 %vm36_vm1, %v109_v8  ;;  %1089 = vmatmul.mubr.msk.bf16.vlgmr.msra.gmra.mrb[4].mxu0 %vm36_vm1, %v1159_v62 }
  0x10   :  { %1094 = vmatprep.mubr.msk.bf16.mxu1 %vm1239_vm0, %v1238_v1  ;;  %1093 = vmatpush3.bf16.msra.mxu1 %v1157_v53 }
  0x11   :  { %1104 = vmatprep.subr.bf16.mxu1 %v1238_v1  ;;  %1100 = vmatprep.mubr.msk.bf16.mxu0 %vm1239_vm0, %v1238_v1 }
  0xd8   :  { %v102_v9 = vpop.f32.mrb[0].mxu0 }
  0xd9   :  { %v1078_v10 = vpop.f32.mrb[1].mxu0  ;;  %v103_v25 = vadd.f32 %v1349_v24, %v102_v9 }
  0xda   :  { %v105_v11 = vpop.f32.mrb[2].mxu0 }
  0xdb   :  { %v1079_v12 = vpop.f32.mrb[3].mxu0  ;;  %v106_v27 = vadd.f32 %v1349_v24, %v105_v11 }
  0xe2   :  { %v162_v16 = vpop.f32.mrb[0].mxu1 }
  0xe3   :  { %v163_v17 = vadd.f32 %v1333_v14, %v162_v16  ;;  %v1084_v18 = vpop.f32.mrb[1].mxu1 }
  0xe4   :  { %v165_v19 = vpop.f32.mrb[2].mxu1 }
  0xe5   :  { %185 = vrot.lane.b32.xlu0 %v163_v17, %s1241_s18  ;;  %v1085_v20 = vpop.f32.mrb[3].mxu1  ;;  %v166_v22 = vadd.f32 %v1333_v14, %v165_v19  ;;  %v169_v26 = vadd.f32 %v163_v17, %v103_v25 }
  0xe6   :  { %v346_v20 = vpop.f32.mrb[4].mxu0 }
  0xe7   :  { %v1015_v28 = vmul.f32 -1.442695, %v169_v26  ;;  %v170_v29 = vadd.f32 %v166_v22, %v106_v27  ;;  %v1090_v21 = vpop.f32.mrb[5].mxu0 }
  0xe9   :  { %187 = vrot.lane.b32.xlu0 %v166_v22, %s1241_s18  ;;  %1166 = vpow2.f32 %v1015_v28  ;;  %v1016_v30 = vmul.f32 -1.442695, %v170_v29  ;;  %v349_v22 = vpop.f32.mrb[6].mxu0 }
  0xeb   :  { %1168 = vpow2.f32 %v1016_v30 }
  0xed   :  { %255 = vperm.xlu0 %1132, %v251_v23   ;;  %v1091_v23 = vpop.f32.mrb[7].mxu0 }
  0xf3   :  { %v1167_v31 = vpop.eup %1166 }
  0xf4   :  { %v177_v32 = vadd.f32 1.0, %v1167_v31  ;;  %v347_v31 = vadd.f32 %v1349_v24, %v346_v20 }
  0xf5   :  { %v1169_v33 = vpop.eup %1168 }
  0xf6   :  { %1170 = vrcp.f32 %v177_v32  ;;  %v178_v34 = vadd.f32 1.0, %v1169_v33  ;;  %v350_v32 = vadd.f32 %v1349_v24, %v349_v22 }
  0xf8   :  { %1172 = vrcp.f32 %v178_v34 }
 0x100   :  { %v1171_v36 = vpop.eup %1170 }
 0x101   :  { %v205_v59 = vsub.f32 1.0, %v1171_v36 }
 0x102   :  { %v1173_v39 = vpop.eup %1172 }
 0x103   :  { %v206_v3 = vsub.f32 1.0, %v1173_v39 }
 0x157   :  { %v186_v37 = vpop.permute.xlu0 %185 }
 0x158   :  { %v191_v38 = vmul.f32 %v1171_v36, %v186_v37 }
 0x15a   :  { %195 = vrot.lane.b32.xlu1 %v191_v38, %s1242_s5 }
 0x15b   :  { %v188_v40 = vpop.permute.xlu0 %187 }
 0x15c   :  { %v192_v42 = vmul.f32 %v1173_v39, %v188_v40 }
 0x15e   :  { %197 = vrot.lane.b32.xlu1 %v192_v42, %s1242_s5 }
 0x162   :  { %260 = vperm.xlu1 %1133, %v252_v43  }
 0x166   :  { %1135 = vperm.xlu1 %1133, %v1134_v44   ;;  %v1030_v44 = vsel %vm472_vm4, 1.0, %v1238_v1 }
 0x16c   :  { %v256_v50 = vpop.permute.xlu0 %255 }
 0x16d   :  { %v263_v52 = vmul.f32 %v256_v50, %v1321_v6 }
 0x1cc   :  { %v196_v45 = vpop.permute.xlu1 %195 }
 0x1cd   :  { %v201_v46 = vadd.f32 %v196_v45, %v103_v25  ;;  %v1031_v45 = vsel %vm473_vm5, 1.0, %v1238_v1 }
 0x1ce   :  { %v1139_v50 = vpack.i.bf16 %v1031_v45, %v1030_v44 }
 0x1cf   :  { %1174 = vtanh.f32 %v201_v46 }
 0x1d0   :  { %v198_v47 = vpop.permute.xlu1 %197 }
 0x1d1   :  { %v202_v48 = vadd.f32 %v198_v47, %v106_v27 }
 0x1d3   :  { %1176 = vtanh.f32 %v202_v48 }
 0x1d9   :  { %v1175_v49 = vpop.eup %1174 }
 0x1da   :  { %209 = vrot.lane.b32.xlu0 %v1175_v49, %s1243_s1 }
 0x1dd   :  { %v1177_v51 = vpop.eup %1176 }
 0x1de   :  { %219 = vrot.lane.b32.xlu0 %v1321_v6, %s1244_s22  ;;  %211 = vrot.lane.b32.xlu1 %v1177_v51, %s1243_s1  ;;  %v490_v51 = vsub.f32 1.0, %v1030_v44 }
 0x1e1   :  { %v261_v55 = vpop.permute.xlu1 %260 }
 0x1e2   :  { %v264_v56 = vmul.f32 %v261_v55, %v1323_v7  ;;  %221 = vrot.lane.b32.xlu1 %v1323_v7, %s1244_s22  ;;  %267 = vrot.lane.b32.xlu0 %v263_v52, %s1244_s22  ;;  %v491_v52 = vsub.f32 1.0, %v1031_v45 }
 0x1e5   :  { %v1136_v57 = vpop.permute.xlu1 %1135 }
 0x1e6   :  { %269 = vrot.lane.b32.xlu1 %v264_v56, %s1244_s22  ;;  %v1137_v5 = vunpack.i.l.bf16 %v1136_v57  ;;  %v1138_v8 = vunpack.i.h.bf16 %v1136_v57 }
 0x24c   :  { %v210_v58 = vpop.permute.xlu0 %209 }
 0x24d   :  { %v215_v63 = vmul.f32 %v210_v58, %v205_v59  ;;  %v1160_v58 = vld [vmem:[%s1536_s4] sm:$0xff]  }
 0x24e   :  { %v1161_v59 = vld [vmem:[%s1535_s3] sm:$0xff]  }
 0x24f   :  { %1099 = vmatpush3.bf16.msra.mxu0 %v1161_v59 }
 0x250   :  { %v220_v60 = vpop.permute.xlu0 %219  ;;  %v212_v61 = vpop.permute.xlu1 %211  ;;  %1110 = vmatprep.subr.bf16.mxu0 %v1238_v1 }
 0x251   :  { %v225_v0 = vmul.f32 %v1171_v36, %v220_v60  ;;  %v216_v6 = vmul.f32 %v212_v61, %v206_v3 }
 0x253   :  { %v227_v2 = vadd.f32 %v225_v0, %v215_v63  ;;  %v1162_v0 = vld [vmem:[%s1532_s0 + $0x10] sm:$0xff]  }
 0x254   :  { %v222_v4 = vpop.permute.xlu1 %221  ;;  %v268_v11 = vpop.permute.xlu0 %267  ;;  %1101 = vmatmul.mubr.msk.bf16.vlgmr.msra.gmra.mrb[8].mxu0 %vm36_vm1, %v1162_v0  ;;  %v1163_v0 = vld [vmem:[%s1536_s4] sm:$0xff]  }
 0x255   :  { %v226_v7 = vmul.f32 %v1173_v39, %v222_v4  ;;  %v249_v10 = vmul.f32 %v1137_v5, %v227_v2  ;;  %1112 = vmatprep.mubr.msk.bf16.mxu0 %vm1239_vm0, %v1238_v1 }
 0x257   :  { %v228_v9 = vadd.f32 %v226_v7, %v216_v6  ;;  %v1382_v16 = vadd.f32 %v268_v11, %v249_v10 }
 0x258   :  { %v270_v12 = vpop.permute.xlu1 %269 }
 0x259   :  { %v250_v13 = vmul.f32 %v1138_v8, %v228_v9 }
 0x25b   :  { %v1384_v17 = vadd.f32 %v270_v12, %v250_v13 }
 0x25d   :  { %v353_v18 = vpack.c.bf16 %v1384_v17, %v1382_v16 }
 0x25f   :  { %364 = vrot.lane.b32.xlu0 %v353_v18, %s1243_s1 }
 0x2d1   :  { %v365_v19 = vpop.permute.xlu0 %364 }
 0x2d2   :  { %1095 = vmatmul.mubr.msk.bf16.vlgmr.msra.gmra.mrb[4].mxu1 %vm36_vm1, %v365_v19 }
 0x2d3   :  { %1106 = vmatprep.mubr.msk.bf16.mxu1 %vm1239_vm0, %v1238_v1  ;;  %1105 = vmatpush3.bf16.msra.mxu1 %v1160_v58 }
 0x2d4   :  { %1116 = vmatprep.subr.bf16.mxu1 %v1238_v1 }
 0x3a5   :  { %v409_v25 = vpop.f32.mrb[4].mxu1 }
 0x3a6   :  { %v410_v26 = vadd.f32 %v1333_v14, %v409_v25  ;;  %v1096_v27 = vpop.f32.mrb[5].mxu1 }
 0x3a7   :  { %v412_v28 = vpop.f32.mrb[6].mxu1  ;;  %v578_v27 = vpop.f32.mrb[8].mxu0 }
 0x3a8   :  { %v413_v29 = vadd.f32 %v1333_v14, %v412_v28  ;;  %432 = vrot.lane.b32.xlu1 %v410_v26, %s1241_s18  ;;  %v1097_v30 = vpop.f32.mrb[7].mxu1  ;;  %v416_v33 = vadd.f32 %v410_v26, %v347_v31  ;;  %v1102_v28 = vpop.f32.mrb[9].mxu0 }
 0x3aa   :  { %434 = vrot.lane.b32.xlu0 %v413_v29, %s1241_s18  ;;  %v417_v34 = vadd.f32 %v413_v29, %v350_v32  ;;  %v1028_v36 = vmul.f32 -1.442695, %v416_v33  ;;  %v581_v29 = vpop.f32.mrb[10].mxu0 }
 0x3ab   :  { %v1103_v30 = vpop.f32.mrb[11].mxu0 }
 0x3ac   :  { %v1029_v37 = vmul.f32 -1.442695, %v417_v34  ;;  %1178 = vpow2.f32 %v1028_v36 }
 0x3ae   :  { %1180 = vpow2.f32 %v1029_v37 }
 0x3b6   :  { %v1179_v38 = vpop.eup %1178 }
 0x3b7   :  { %v424_v40 = vadd.f32 1.0, %v1179_v38  ;;  %v579_v38 = vadd.f32 %v1349_v24, %v578_v27 }
 0x3b8   :  { %v1181_v39 = vpop.eup %1180 }
 0x3b9   :  { %v425_v41 = vadd.f32 1.0, %v1181_v39  ;;  %1182 = vrcp.f32 %v424_v40  ;;  %v582_v39 = vadd.f32 %v1349_v24, %v581_v29 }
 0x3bb   :  { %1184 = vrcp.f32 %v425_v41 }
 0x3c3   :  { %v1183_v42 = vpop.eup %1182 }
 0x3c4   :  { %v452_v2 = vsub.f32 1.0, %v1183_v42  ;;  %v464_v4 = vmul.f32 %v1183_v42, %v1382_v16 }
 0x3c5   :  { %v1185_v47 = vpop.eup %1184 }
 0x3c6   :  { %v453_v6 = vsub.f32 1.0, %v1185_v47  ;;  %v465_v10 = vmul.f32 %v1185_v47, %v1384_v17 }
 0x41a   :  { %v433_v43 = vpop.permute.xlu1 %432 }
 0x41b   :  { %v438_v46 = vmul.f32 %v1183_v42, %v433_v43 }
 0x41c   :  { %v435_v48 = vpop.permute.xlu0 %434 }
 0x41d   :  { %v439_v49 = vmul.f32 %v1185_v47, %v435_v48  ;;  %442 = vrot.lane.b32.xlu1 %v438_v46, %s1242_s5 }
 0x41f   :  { %444 = vrot.lane.b32.xlu0 %v439_v49, %s1242_s5 }
 0x421   :  { %1140 = vperm.xlu1 %1133, %v1139_v50   ;;  %v1043_v50 = vsel %vm704_vm6, 1.0, %v1238_v1 }
 0x423   :  { %494 = vperm.xlu0 %1132, %v490_v51   ;;  %v1044_v51 = vsel %vm705_vm7, 1.0, %v1238_v1 }
 0x424   :  { %v723_v58 = vsub.f32 1.0, %v1044_v51 }
 0x425   :  { %499 = vperm.xlu1 %1133, %v491_v52  }
 0x48f   :  { %v443_v53 = vpop.permute.xlu1 %442 }
 0x490   :  { %v448_v54 = vadd.f32 %v443_v53, %v347_v31 }
 0x491   :  { %v445_v55 = vpop.permute.xlu0 %444 }
 0x492   :  { %1186 = vtanh.f32 %v448_v54  ;;  %v449_v56 = vadd.f32 %v445_v55, %v350_v32 }
 0x494   :  { %1188 = vtanh.f32 %v449_v56  ;;  %v1144_v56 = vpack.i.bf16 %v1044_v51, %v1043_v50 }
 0x49c   :  { %v1187_v57 = vpop.eup %1186 }
 0x49d   :  { %456 = vrot.lane.b32.xlu0 %v1187_v57, %s1243_s1  ;;  %v722_v57 = vsub.f32 1.0, %v1043_v50 }
 0x49e   :  { %v1189_v60 = vpop.eup %1188 }
 0x49f   :  { %458 = vrot.lane.b32.xlu1 %v1189_v60, %s1243_s1 }
 0x4a0   :  { %v1141_v61 = vpop.permute.xlu1 %1140 }
 0x4a1   :  { %v1142_v8 = vunpack.i.l.bf16 %v1141_v61  ;;  %v1143_v12 = vunpack.i.h.bf16 %v1141_v61 }
 0x4a2   :  { %v495_v62 = vpop.permute.xlu0 %494 }
 0x4a3   :  { %v502_v19 = vmul.f32 %v495_v62, %v1382_v16 }
 0x4a4   :  { %v500_v63 = vpop.permute.xlu1 %499 }
 0x4a5   :  { %v503_v20 = vmul.f32 %v500_v63, %v1384_v17 }
 0x50f   :  { %v457_v3 = vpop.permute.xlu0 %456 }
 0x510   :  { %v462_v5 = vmul.f32 %v457_v3, %v452_v2  ;;  %v1164_v2 = vld [vmem:[%s1535_s3] sm:$0xff]  }
 0x511   :  { %v459_v7 = vpop.permute.xlu1 %458  ;;  %1111 = vmatpush3.bf16.msra.mxu0 %v1164_v2 }
 0x512   :  { %v466_v9 = vadd.f32 %v464_v4, %v462_v5  ;;  %v463_v11 = vmul.f32 %v459_v7, %v453_v6  ;;  %v1165_v7 = vld [vmem:[%s1532_s0 + $0x18] sm:$0xff]   ;;  %s1245_s0 = smov [#allocation3]  }
 0x513   :  { %s993_s3 = sshll.u32 %s1245_s0, 4  ;;  %s994_s3 = int_to_ptr.vmem [resolvable:$true] %s993_s3 }
 0x514   :  { %v488_v13 = vmul.f32 %v1142_v8, %v466_v9  ;;  %v467_v18 = vadd.f32 %v465_v10, %v463_v11  ;;  %1113 = vmatmul.mubr.msk.bf16.vlgmr.msra.gmra.mrb[12].mxu0 %vm36_vm1, %v1165_v7  ;;  %s1214_s20 = scalar_lea.vmem %s994_s3, 1024  ;;  %p1219_p1 = scmp.lt.s32.totalorder %s994_s3, %s994_s3 }
 0x515   :  { %p1215_p0 = scmp.ne.s32.totalorder %s994_s3, %s1214_s20  ;;  %p1220_p2 = scmp.lt.s32.totalorder %s1214_s20, %s1214_s20 }
 0x516   :  { %v489_v21 = vmul.f32 %v1143_v12, %v467_v18  ;;  %v1424_v22 = vadd.f32 %v502_v19, %v488_v13 }
 0x517   :  { %p1221_p3 = por %p1220_p2, %p1219_p1 }
 0x518   :  { %v1426_v23 = vadd.f32 %v503_v20, %v489_v21 }
 0x519   :  { %p1222_p4 = pnand %p1221_p3, %p1215_p0 }
 0x51a   :  { %v585_v25 = vpack.c.bf16 %v1426_v23, %v1424_v22 }
 0x51c   :  { %596 = vrot.lane.b32.xlu0 %v585_v25, %s1243_s1 }
 0x58e   :  { %v597_v26 = vpop.permute.xlu0 %596 }
 0x58f   :  { %1107 = vmatmul.mubr.msk.bf16.vlgmr.msra.gmra.mrb[8].mxu1 %vm36_vm1, %v597_v26 }
 0x590   :  { %1118 = vmatprep.mubr.msk.bf16.mxu1 %vm1239_vm0, %v1238_v1  ;;  %1117 = vmatpush3.bf16.msra.mxu1 %v1163_v0 }
 0x662   :  { %v641_v31 = vpop.f32.mrb[8].mxu1 }
 0x663   :  { %v642_v32 = vadd.f32 %v1333_v14, %v641_v31  ;;  %v1108_v33 = vpop.f32.mrb[9].mxu1 }
 0x664   :  { %v644_v34 = vpop.f32.mrb[10].mxu1 }
 0x665   :  { %v645_v36 = vadd.f32 %v1333_v14, %v644_v34  ;;  %664 = vrot.lane.b32.xlu1 %v642_v32, %s1241_s18  ;;  %v1109_v37 = vpop.f32.mrb[11].mxu1  ;;  %v648_v40 = vadd.f32 %v642_v32, %v579_v38 }
 0x667   :  { %666 = vrot.lane.b32.xlu0 %v645_v36, %s1241_s18  ;;  %v649_v41 = vadd.f32 %v645_v36, %v582_v39  ;;  %v1041_v42 = vmul.f32 -1.442695, %v648_v40  ;;  %v810_v36 = vpop.f32.mrb[12].mxu0 }
 0x668   :  { %v1114_v37 = vpop.f32.mrb[13].mxu0 }
 0x669   :  { %v1042_v43 = vmul.f32 -1.442695, %v649_v41  ;;  %1190 = vpow2.f32 %v1041_v42 }
 0x66b   :  { %1192 = vpow2.f32 %v1042_v43 }
 0x673   :  { %v1191_v44 = vpop.eup %1190 }
 0x674   :  { %v656_v46 = vadd.f32 1.0, %v1191_v44 }
 0x675   :  { %v1193_v45 = vpop.eup %1192 }
 0x676   :  { %v657_v47 = vadd.f32 1.0, %v1193_v45  ;;  %1194 = vrcp.f32 %v656_v46  ;;  %v811_v46 = vadd.f32 %v1349_v24, %v810_v36 }
 0x678   :  { %1196 = vrcp.f32 %v657_v47 }
 0x680   :  { %v1195_v48 = vpop.eup %1194 }
 0x681   :  { %v684_v8 = vsub.f32 1.0, %v1195_v48  ;;  %v696_v10 = vmul.f32 %v1195_v48, %v1424_v22 }
 0x682   :  { %v1197_v53 = vpop.eup %1196 }
 0x683   :  { %v685_v12 = vsub.f32 1.0, %v1197_v53  ;;  %v697_v20 = vmul.f32 %v1197_v53, %v1426_v23 }
 0x6d7   :  { %v665_v49 = vpop.permute.xlu1 %664 }
 0x6d8   :  { %v670_v52 = vmul.f32 %v1195_v48, %v665_v49 }
 0x6d9   :  { %v667_v54 = vpop.permute.xlu0 %666 }
 0x6da   :  { %v671_v55 = vmul.f32 %v1197_v53, %v667_v54  ;;  %674 = vrot.lane.b32.xlu1 %v670_v52, %s1242_s5 }
 0x6dc   :  { %676 = vrot.lane.b32.xlu0 %v671_v55, %s1242_s5 }
 0x6de   :  { %1145 = vperm.xlu1 %1133, %v1144_v56  }
 0x6e0   :  { %726 = vperm.xlu0 %1132, %v722_v57   ;;  %v1057_v57 = vsel %vm937_vm9, 1.0, %v1238_v1 }
 0x6e1   :  { %v955_v15 = vsub.f32 1.0, %v1057_v57 }
 0x6e2   :  { %731 = vperm.xlu1 %1133, %v723_v58  }
 0x74c   :  { %v675_v59 = vpop.permute.xlu1 %674 }
 0x74d   :  { %v680_v60 = vadd.f32 %v675_v59, %v579_v38  ;;  %v813_v38 = vpop.f32.mrb[14].mxu0 }
 0x74e   :  { %v677_v61 = vpop.permute.xlu0 %676  ;;  %v814_v47 = vadd.f32 %v1349_v24, %v813_v38  ;;  %v1056_v24 = vsel %vm936_vm8, 1.0, %v1238_v1 }
 0x74f   :  { %1198 = vtanh.f32 %v680_v60  ;;  %v681_v62 = vadd.f32 %v677_v61, %v582_v39  ;;  %v1115_v39 = vpop.f32.mrb[15].mxu0 }
 0x751   :  { %1200 = vtanh.f32 %v681_v62  ;;  %v1149_v62 = vpack.i.bf16 %v1057_v57, %v1056_v24 }
 0x759   :  { %v1199_v63 = vpop.eup %1198 }
 0x75a   :  { %688 = vrot.lane.b32.xlu0 %v1199_v63, %s1243_s1  ;;  %v954_v63 = vsub.f32 1.0, %v1056_v24 }
 0x75b   :  { %v1201_v3 = vpop.eup %1200 }
 0x75c   :  { %690 = vrot.lane.b32.xlu1 %v1201_v3, %s1243_s1 }
 0x75d   :  { %v1146_v4 = vpop.permute.xlu1 %1145 }
 0x75e   :  { %v1147_v18 = vunpack.i.l.bf16 %v1146_v4  ;;  %v1148_v25 = vunpack.i.h.bf16 %v1146_v4 }
 0x75f   :  { %v727_v5 = vpop.permute.xlu0 %726 }
 0x760   :  { %v734_v28 = vmul.f32 %v727_v5, %v1424_v22 }
 0x761   :  { %v732_v6 = vpop.permute.xlu1 %731 }
 0x762   :  { %v735_v29 = vmul.f32 %v732_v6, %v1426_v23 }
 0x7cc   :  { %v689_v9 = vpop.permute.xlu0 %688 }
 0x7cd   :  { %v694_v11 = vmul.f32 %v689_v9, %v684_v8 }
 0x7ce   :  { %v691_v13 = vpop.permute.xlu1 %690 }
 0x7cf   :  { %v698_v19 = vadd.f32 %v696_v10, %v694_v11  ;;  %v695_v21 = vmul.f32 %v691_v13, %v685_v12 }
 0x7d1   :  { %v720_v26 = vmul.f32 %v1147_v18, %v698_v19  ;;  %v699_v27 = vadd.f32 %v697_v20, %v695_v21 }
 0x7d3   :  { %v721_v30 = vmul.f32 %v1148_v25, %v699_v27  ;;  %v1462_v31 = vadd.f32 %v734_v28, %v720_v26 }
 0x7d5   :  { %v1464_v32 = vadd.f32 %v735_v29, %v721_v30 }
 0x7d7   :  { %v817_v33 = vpack.c.bf16 %v1464_v32, %v1462_v31 }
 0x7d9   :  { %828 = vrot.lane.b32.xlu0 %v817_v33, %s1243_s1 }
 0x84b   :  { %v829_v34 = vpop.permute.xlu0 %828 }
 0x84c   :  { %1119 = vmatmul.mubr.msk.bf16.vlgmr.msra.gmra.mrb[12].mxu1 %vm36_vm1, %v829_v34 }
 0x91f   :  { %v873_v40 = vpop.f32.mrb[12].mxu1 }
 0x920   :  { %v874_v41 = vadd.f32 %v1333_v14, %v873_v40  ;;  %v1120_v42 = vpop.f32.mrb[13].mxu1 }
 0x921   :  { %v876_v43 = vpop.f32.mrb[14].mxu1 }
 0x922   :  { %v877_v44 = vadd.f32 %v1333_v14, %v876_v43  ;;  %896 = vrot.lane.b32.xlu1 %v874_v41, %s1241_s18  ;;  %v1121_v45 = vpop.f32.mrb[15].mxu1  ;;  %v880_v48 = vadd.f32 %v874_v41, %v811_v46 }
 0x924   :  { %898 = vrot.lane.b32.xlu0 %v877_v44, %s1241_s18  ;;  %v881_v49 = vadd.f32 %v877_v44, %v814_v47  ;;  %v1054_v50 = vmul.f32 -1.442695, %v880_v48 }
 0x926   :  { %v1055_v51 = vmul.f32 -1.442695, %v881_v49  ;;  %1202 = vpow2.f32 %v1054_v50 }
 0x928   :  { %1204 = vpow2.f32 %v1055_v51 }
 0x930   :  { %v1203_v52 = vpop.eup %1202 }
 0x931   :  { %v888_v54 = vadd.f32 1.0, %v1203_v52 }
 0x932   :  { %v1205_v53 = vpop.eup %1204 }
 0x933   :  { %v889_v55 = vadd.f32 1.0, %v1205_v53  ;;  %1206 = vrcp.f32 %v888_v54 }
 0x935   :  { %1208 = vrcp.f32 %v889_v55 }
 0x93d   :  { %v1207_v14 = vpop.eup %1206 }
 0x93e   :  { %v916_v8 = vsub.f32 1.0, %v1207_v14  ;;  %v928_v9 = vmul.f32 %v1207_v14, %v1462_v31 }
 0x93f   :  { %v1209_v59 = vpop.eup %1208 }
 0x940   :  { %v917_v10 = vsub.f32 1.0, %v1209_v59 }
 0x994   :  { %v897_v56 = vpop.permute.xlu1 %896 }
 0x995   :  { %v902_v58 = vmul.f32 %v1207_v14, %v897_v56 }
 0x996   :  { %v899_v60 = vpop.permute.xlu0 %898 }
 0x997   :  { %v903_v61 = vmul.f32 %v1209_v59, %v899_v60  ;;  %906 = vrot.lane.b32.xlu1 %v902_v58, %s1242_s5 }
 0x999   :  { %908 = vrot.lane.b32.xlu0 %v903_v61, %s1242_s5 }
 0x99b   :  { %1150 = vperm.xlu1 %1133, %v1149_v62  }
 0x99d   :  { %958 = vperm.xlu0 %1132, %v954_v63  }
 0x99f   :  { %963 = vperm.xlu1 %1133, %v955_v15  }
 0xa09   :  { %v907_v35 = vpop.permute.xlu1 %906 }
 0xa0a   :  { %v912_v0 = vadd.f32 %v907_v35, %v811_v46 }
 0xa0b   :  { %v909_v2 = vpop.permute.xlu0 %908 }
 0xa0c   :  { %1210 = vtanh.f32 %v912_v0  ;;  %v913_v3 = vadd.f32 %v909_v2, %v814_v47 }
 0xa0e   :  { %1212 = vtanh.f32 %v913_v3 }
 0xa16   :  { %v1211_v1 = vpop.eup %1210 }
 0xa17   :  { %920 = vrot.lane.b32.xlu0 %v1211_v1, %s1243_s1 }
 0xa18   :  { %v1213_v4 = vpop.eup %1212 }
 0xa19   :  { %922 = vrot.lane.b32.xlu1 %v1213_v4, %s1243_s1 }
 0xa1a   :  { %v1151_v5 = vpop.permute.xlu1 %1150 }
 0xa1b   :  { %277 = vrot.lane.b32.xlu0 %v1382_v16, %s1243_s1  ;;  %v1153_v19 = vunpack.i.h.bf16 %v1151_v5 }
 0xa1c   :  { %v959_v6 = vpop.permute.xlu0 %958 }
 0xa1d   :  { %279 = vrot.lane.b32.xlu1 %v1384_v17, %s1243_s1  ;;  %v966_v20 = vmul.f32 %v959_v6, %v1462_v31 }
 0xa1e   :  { %v964_v7 = vpop.permute.xlu1 %963 }
 0xa1f   :  { %508 = vrot.lane.b32.xlu0 %v1424_v22, %s1243_s1  ;;  %v1152_v22 = vunpack.i.l.bf16 %v1151_v5  ;;  %v967_v27 = vmul.f32 %v964_v7, %v1464_v32 }
 0xa21   :  { %510 = vrot.lane.b32.xlu1 %v1426_v23, %s1243_s1  ;;  %v929_v23 = vmul.f32 %v1209_v59, %v1464_v32 }
 0xa23   :  { %740 = vrot.lane.b32.xlu0 %v1462_v31, %s1243_s1 }
 0xa25   :  { %742 = vrot.lane.b32.xlu1 %v1464_v32, %s1243_s1 }
 0xa89   :  { %v921_v16 = vpop.permute.xlu0 %920 }
 0xa8a   :  { %v926_v17 = vmul.f32 %v921_v16, %v916_v8 }
 0xa8b   :  { %v923_v11 = vpop.permute.xlu1 %922 }
 0xa8c   :  { %v930_v12 = vadd.f32 %v928_v9, %v926_v17  ;;  %v927_v13 = vmul.f32 %v923_v11, %v917_v10 }
 0xa8d   :  { %v278_v18 = vpop.permute.xlu0 %277 }
 0xa8e   :  { %v952_v21 = vmul.f32 %v1152_v22, %v930_v12  ;;  %v931_v25 = vadd.f32 %v929_v23, %v927_v13  ;;  %283 = vst.msk [vmem:[#allocation3] sm:$0xff] %vm36_vm1, %v278_v18 }
 0xa8f   :  { %v280_v26 = vpop.permute.xlu1 %279 }
 0xa90   :  { %v953_v28 = vmul.f32 %v1153_v19, %v931_v25  ;;  %284 = vst.msk [vmem:[#allocation3 + $0x8] sm:$0xff] %vm36_vm1, %v280_v26  ;;  %v968_v29 = vadd.f32 %v966_v20, %v952_v21 }
 0xa91   :  { %v509_v30 = vpop.permute.xlu0 %508 }
 0xa92   :  { %515 = vst.msk [vmem:[#allocation3 + $0x10] sm:$0xff] %vm36_vm1, %v509_v30  ;;  %972 = vrot.lane.b32.xlu0 %v968_v29, %s1243_s1  ;;  %v969_v33 = vadd.f32 %v967_v27, %v953_v28 }
 0xa93   :  { %v511_v34 = vpop.permute.xlu1 %510 }
 0xa94   :  { %516 = vst.msk [vmem:[#allocation3 + $0x18] sm:$0xff] %vm36_vm1, %v511_v34  ;;  %974 = vrot.lane.b32.xlu1 %v969_v33, %s1243_s1 }
 0xa95   :  { %v741_v31 = vpop.permute.xlu0 %740 }
 0xa96   :  { %747 = vst.msk [vmem:[#allocation3 + $0x20] sm:$0xff] %vm36_vm1, %v741_v31 }
 0xa97   :  { %v743_v36 = vpop.permute.xlu1 %742 }
 0xa98   :  { %748 = vst.msk [vmem:[#allocation3 + $0x28] sm:$0xff] %vm36_vm1, %v743_v36 }
 0xb04   :  { %v973_v32 = vpop.permute.xlu0 %972 }
 0xb05   :  { %979 = vst.msk [vmem:[#allocation3 + $0x30] sm:$0xff] %vm36_vm1, %v973_v32  ;;  %981 = vst.msk [vmem:[#allocation2] sm:$0xff] %vm36_vm1, %v973_v32 }
 0xb06   :  { %986 = vst.msk [vmem:[%s1540_s8] sm:$0xff] %vm36_vm1, %v973_v32  ;;  %v975_v37 = vpop.permute.xlu1 %974 }
 0xb07   :  { %980 = vst.msk [vmem:[#allocation3 + $0x38] sm:$0xff] %vm36_vm1, %v975_v37  ;;  %982 = vst.msk [vmem:[#allocation2 + $0x8] sm:$0xff] %vm36_vm1, %v975_v37 }
 0xb08   :  { %987 = vst.msk [vmem:[%s1540_s8 + $0x8] sm:$0xff] %vm36_vm1, %v975_v37 }
 0xb09   :  { %1225 = shalt.err (!%p1222_p4)
}
 0xb0a   :  { %s1226_s1 = scalar_lea.hbm %s1539_s7, 1024 }
 0xb0b   :  { %p1227_p5 = scmp.ne.s32.totalorder %s1539_s7, %s1226_s1  ;;  %p1230_p6 = scmp.lt.u32.totalorder %s1226_s1, %s1539_s7 }
 0xb0d   :  { %p1232_p7 = pnand %p1230_p6, %p1227_p5 }
 0xb0f   :  { %1235 = shalt.err (!%p1232_p7)
}
 0xb10   :  { %s1246_s8 = smov 128   ;;  %s1247_s26 = smov 8  }
 0xb11   :  { %999 = dma.vmem_to_hbm [thread:$0]  %s994_s3, 1024, %s1539_s7, [#allocation4], %s1246_s8, %s1246_s8, %s1247_s26  }
 0xb12   :  { %1236 = dma.done.wait [#allocation4], 1024  }
 0xb13   :  { %1237 = vsyncadd [#allocation4], 4294966272 }
 0xb14   :  { %1007 = vsyncpa [#allocation4], 1 }

// kernel: seq2seq_multi_forward.6
= control target key start
LH: loop header
LB: loop body
LE: loop exit
PB: predicated region body
PF: predicated region fallthrough
CT: control target
= control target key end

     0   :  { %s1307_s27 = smov 0   ;;  %s1486_s0 = inlined_call_operand.vmem [shape: bf16[8,2,16], index: 0, kind: input, shape index: {}]   ;;  %s1487_s1 = inlined_call_operand.vmem [shape: f32[2,1], index: 1, kind: input, shape index: {}]   ;;  %s1488_s2 = inlined_call_operand.vmem [shape: f32[2,16], index: 2, kind: input, shape index: {}]   ;;  %s1489_s3 = inlined_call_operand.vmem [shape: bf16[16,48], index: 3, kind: input, shape index: {}]   ;;  %s1490_s4 = inlined_call_operand.vmem [shape: bf16[16,48], index: 4, kind: input, shape index: {}]   ;;  %s1491_s5 = inlined_call_operand.vmem [shape: f32[1,48], index: 5, kind: input, shape index: {}]   ;;  %s1492_s6 = inlined_call_operand.vmem [shape: f32[1,48], index: 6, kind: input, shape index: {}]   ;;  %s1493_s7 = inlined_call_operand.vmem [shape: f32[8,2,16], index: 7, kind: output, shape index: {0}]   ;;  %s1494_s8 = inlined_call_operand.vmem [shape: f32[2,16], index: 8, kind: output, shape index: {1}]  }
   0x1 LB: > { %s1313_s28 = sadd.s32 4294967295, %s1253_s27   ;;  %p1087_p0 = scmp.ge.s32.totalorder %s1253_s27, 1  ;;  %s1253_s27 = sphi %s1307_s27, %s19_s27  }
   0x2   : > { %p260_p1 = scmp.lt.s32.totalorder %s1253_s27, 3 }
   0x4   : > { %p261_p2 = pnand %p1087_p0, %p260_p1 }
   0x5   : > { %s1318_s29 = sshll.u32 (!%p261_p2), %s1313_s28, 2  ;;  %p1091_p4 = scmp.ne.s32.totalorder (!%p261_p2), %s1313_s28, 0 }
   0x6   : > { %264 = sbr.rel (%p261_p2) target bundleno = 2823 (0xb07), region = 48  ;;  %p294_p3 = scmp.lt.s32.totalorder (!%p261_p2), %s1318_s29, 7 }
   0xd   : > { %s295_s30 = scalar_select %p294_p3, %s1318_s29, 7 }
   0xe   : > { %308 = sbr.rel (%p1091_p4) target bundleno = 21 (0x15), region = 52  ;;  %v309_v0 = vld [vmem:[%s1488_s2] sm:$0x3] (!%p1091_p4)  ;;  %vm310_vm0 = vcmask (!%p1091_p4), 123904  }
   0xf   : > { %s1325_s11 = scalar_lea.vmem %s1486_s0, %s295_s30  ;;  %s1090_s12 = sshll.u32 %s295_s30, 1  ;;  %311 = vst.msk [vmem:[#allocation2] sm:$0x3] (!%p1091_p4), %vm310_vm0, %v309_v0 }
  0x10   : > { %s1330_s15 = scalar_lea.vmem %s1493_s7, %s1090_s12 }
  0x15 PF: > { %v1215_v1 = vld [vmem:[%s1489_s3] sm:$0xff]   ;;  %s464_s20 = scvt.s32.f32 %s1318_s29  ;;  %v1255_v2 = vmov 0.0   ;;  %vm1256_vm1 = vmmov 0   ;;  %vm330_vm2 = vcmask 130048   ;;  %v1257_v9 = vmov 0   ;;  %s1258_s25 = smov 16  }
  0x16   : > { %1150 = vmatprep.subr.bf16.mxu0 %v1255_v2  ;;  %1156 = vmatprep.subr.bf16.mxu1 %v1255_v2  ;;  %v1216_v3 = vld [vmem:[%s1490_s4] sm:$0xff]   ;;  %s1259_s9 = smov 96   ;;  %s1260_s13 = smov 32   ;;  %vm491_vm7 = vcmask 123904  }
  0x17   : > { %1151 = vmatpush3.bf16.msra.mxu0 %v1215_v1  ;;  %1152 = vmatprep.mubr.msk.bf16.mxu0 %vm1256_vm1, %v1255_v2  ;;  %v314_v4 = vld [vmem:[%s1325_s11] sm:$0x1]  ;;  %v465_v6 = vstv %s464_s20  ;;  %s1261_s19 = smov 112   ;;  %v1101_v39 = vld [vmem:[%s1325_s11 + $0x1] sm:$0x1]  ;;  %s493_s20 = sadd.s32 1, %s1318_s29 }
  0x18   : > { %v312_v5 = vld [vmem:[#allocation2] sm:$0x3]  ;;  %1157 = vmatpush3.bf16.msra.mxu1 %v1216_v3  ;;  %1158 = vmatprep.mubr.msk.bf16.mxu1 %vm1256_vm1, %v1255_v2  ;;  %s643_s21 = scvt.s32.f32 %s493_s20  ;;  %s668_s10 = sadd.s32 2, %s1318_s29 }
  0x19   : > { %v374_v7 = vpack.c.bf16 %v312_v5, %v312_v5  ;;  %v463_v8 = vld [vmem:[%s1487_s1] sm:$0x3]  ;;  %1213 = vset.pattern.permute.xlu1 %v1257_v9  ;;  %1168 = vmatprep.subr.bf16.mxu1 %v1255_v2  ;;  %s818_s12 = scvt.s32.f32 %s668_s10  ;;  %p1131_p5 = scmp.ne.s32.totalorder %s1313_s28, 1 }
  0x1a   : > { %vm466_vm3 = vcmp.gt.f32.partialorder %v463_v8, %v465_v6  ;;  %1153 = vmatmul.mubr.msk.bf16.vlgmr.msra.gmra.mrb[0].mxu0 %vm330_vm2, %v314_v4  ;;  %1162 = vmatprep.subr.bf16.mxu0 %v1255_v2  ;;  %v1366_v12 = vld [vmem:[%s1492_s6] ss:$0 sm:$0xff]  ;;  %v644_v57 = vstv %s643_s21 }
  0x1b   : > { %v1100_v10 = vsel %vm466_vm3, 1.0, %v1255_v2  ;;  %1159 = vmatmul.mubr.msk.bf16.vlgmr.msra.gmra.mrb[0].mxu1 %vm330_vm2, %v374_v7  ;;  %1164 = vmatprep.mubr.msk.bf16.mxu0 %vm1256_vm1, %v1255_v2  ;;  %v1373_v22 = vld [vmem:[%s1491_s5] ss:$0 sm:$0xff] }
  0x1c   : > { %v475_v11 = vsub.f32 1.0, %v1100_v10  ;;  %1170 = vmatprep.mubr.msk.bf16.mxu1 %vm1256_vm1, %v1255_v2  ;;  %1214 = vset.pattern.permute.xlu0 %v1257_v9  ;;  %v1217_v33 = vld [vmem:[%s1490_s4] sm:$0xff]  }
  0x1d   : > { %v1218_v34 = vld [vmem:[%s1489_s3] sm:$0xff]   ;;  %1169 = vmatpush3.bf16.msra.mxu1 %v1217_v33 }
  0x1e   : > { %478 = vperm.xlu1 %1213, %v475_v11   ;;  %1163 = vmatpush3.bf16.msra.mxu0 %v1218_v34  ;;  %v642_v56 = vld [vmem:[%s1487_s1] sm:$0x3]  ;;  %v819_v34 = vstv %s818_s12 }
  0x1f   : > { %1180 = vmatprep.subr.bf16.mxu1 %v1255_v2  ;;  %1174 = vmatprep.subr.bf16.mxu0 %v1255_v2  ;;  %vm645_vm4 = vcmp.gt.f32.partialorder %v642_v56, %v644_v57  ;;  %v1219_v11 = vld [vmem:[%s1490_s4] sm:$0xff]  }
  0x20   : > { %v1109_v62 = vsel %vm645_vm4, 1.0, %v1255_v2  ;;  %v817_v33 = vld [vmem:[%s1487_s1] sm:$0x3]  ;;  %v1121_v57 = vld [vmem:[%s1325_s11 + $0x3] sm:$0x1] }
  0x21   : > { %v654_v8 = vsub.f32 1.0, %v1109_v62  ;;  %vm820_vm5 = vcmp.gt.f32.partialorder %v817_v33, %v819_v34 }
  0x22   : > { %471 = vperm.xlu1 %1213, %v1100_v10   ;;  %1165 = vmatmul.mubr.msk.bf16.vlgmr.msra.gmra.mrb[4].mxu0 %vm330_vm2, %v1101_v39 }
  0x23   : > { %1176 = vmatprep.mubr.msk.bf16.mxu0 %vm1256_vm1, %v1255_v2 }
  0x26   : > { %458 = vrot.lane.b32.xlu1 %v312_v5, %s1258_s25 }
  0x9d   : > { %v479_v36 = vpop.permute.xlu1 %478 }
  0x9e   : > { %v481_v37 = vmul.f32 %v479_v36, %v312_v5 }
  0xa1   : > { %v472_v38 = vpop.permute.xlu1 %471 }
  0xa5   : > { %v459_v40 = vpop.permute.xlu1 %458 }
  0xed   : > { %v368_v13 = vpop.f32.mrb[0].mxu0 }
  0xee   : > { %v427_v14 = vpop.f32.mrb[0].mxu1  ;;  %v1154_v15 = vpop.f32.mrb[1].mxu0  ;;  %v369_v23 = vadd.f32 %v1373_v22, %v368_v13  ;;  %v1220_v13 = vld [vmem:[%s1489_s3] sm:$0xff]  }
  0xef   : > { %v428_v16 = vadd.f32 %v1366_v12, %v427_v14  ;;  %v1160_v17 = vpop.f32.mrb[1].mxu1  ;;  %v371_v18 = vpop.f32.mrb[2].mxu0  ;;  %1175 = vmatpush3.bf16.msra.mxu0 %v1220_v13 }
  0xf0   : > { %v430_v19 = vpop.f32.mrb[2].mxu1  ;;  %v1155_v20 = vpop.f32.mrb[3].mxu0  ;;  %1186 = vmatprep.subr.bf16.mxu0 %v1255_v2 }
  0xf1   : > { %441 = vrot.lane.b32.xlu0 %v428_v16, %s1259_s9  ;;  %v1161_v21 = vpop.f32.mrb[3].mxu1  ;;  %v433_v24 = vadd.f32 %v428_v16, %v369_v23  ;;  %v1111_v16 = vld [vmem:[%s1325_s11 + $0x2] sm:$0x1]  ;;  %s843_s11 = sadd.s32 3, %s1318_s29 }
  0xf2   : > { %1177 = vmatmul.mubr.msk.bf16.vlgmr.msra.gmra.mrb[8].mxu0 %vm330_vm2, %v1111_v16  ;;  %s993_s22 = scvt.s32.f32 %s843_s11 }
  0xf3   : > { %v1099_v25 = vmul.f32 -1.442695, %v433_v24  ;;  %1188 = vmatprep.mubr.msk.bf16.mxu0 %vm1256_vm1, %v1255_v2 }
  0xf5   : > { %1223 = vpow2.f32 %v1099_v25  ;;  %v548_v51 = vpop.f32.mrb[4].mxu0 }
  0xf6   : > { %v1166_v52 = vpop.f32.mrb[5].mxu0  ;;  %v549_v63 = vadd.f32 %v1373_v22, %v548_v51 }
  0xf7   : > { %v551_v53 = vpop.f32.mrb[6].mxu0 }
  0xf8   : > { %v1167_v54 = vpop.f32.mrb[7].mxu0  ;;  %v1221_v53 = vld [vmem:[%s1490_s4] sm:$0xff]  }
  0xf9   : > { %v1222_v54 = vld [vmem:[%s1489_s3] sm:$0xff]  }
  0xfa   : > { %1187 = vmatpush3.bf16.msra.mxu0 %v1222_v54 }
  0xfd   : > { %1189 = vmatmul.mubr.msk.bf16.vlgmr.msra.gmra.mrb[12].mxu0 %vm330_vm2, %v1121_v57 }
  0xff   : > { %v1224_v26 = vpop.eup %1223 }
 0x100   : > { %v437_v27 = vadd.f32 1.0, %v1224_v26 }
 0x102   : > { %1225 = vrcp.f32 %v437_v27 }
 0x10c   : > { %v1226_v28 = vpop.eup %1225 }
 0x10d   : > { %v451_v41 = vsub.f32 1.0, %v1226_v28  ;;  %v461_v43 = vmul.f32 %v1226_v28, %v459_v40  ;;  %v1119_v40 = vsel %vm820_vm5, 1.0, %v1255_v2 }
 0x163   : > { %v442_v29 = vpop.permute.xlu0 %441 }
 0x164   : > { %v444_v30 = vmul.f32 %v1226_v28, %v442_v29 }
 0x166   : > { %446 = vrot.lane.b32.xlu0 %v444_v30, %s1260_s13 }
 0x1c5   : > { %v723_v29 = vpop.f32.mrb[8].mxu0 }
 0x1c6   : > { %v1178_v30 = vpop.f32.mrb[9].mxu0 }
 0x1d8   : > { %v447_v31 = vpop.permute.xlu0 %446 }
 0x1d9   : > { %v449_v32 = vadd.f32 %v447_v31, %v369_v23  ;;  %v726_v31 = vpop.f32.mrb[10].mxu0 }
 0x1db   : > { %1227 = vtanh.f32 %v449_v32  ;;  %v1179_v32 = vpop.f32.mrb[11].mxu0 }
 0x1e5   : > { %v1228_v35 = vpop.eup %1227 }
 0x1e6   : > { %453 = vrot.lane.b32.xlu0 %v1228_v35, %s1261_s19 }
 0x1ea   : > { %483 = vrot.lane.b32.xlu0 %v481_v37, %s1258_s25 }
 0x258   : > { %v454_v42 = vpop.permute.xlu0 %453 }
 0x259   : > { %v456_v44 = vmul.f32 %v454_v42, %v451_v41  ;;  %v724_v41 = vadd.f32 %v1373_v22, %v723_v29 }
 0x25b   : > { %v462_v45 = vadd.f32 %v461_v43, %v456_v44 }
 0x25c   : > { %v484_v46 = vpop.permute.xlu0 %483 }
 0x25d   : > { %v474_v47 = vmul.f32 %v472_v38, %v462_v45 }
 0x25f   : > { %v1391_v48 = vadd.f32 %v484_v46, %v474_v47 }
 0x261   : > { %v554_v49 = vpack.c.bf16 %v1391_v48, %v1391_v48 }
 0x263   : > { %565 = vrot.lane.b32.xlu1 %v554_v49, %s1261_s19 }
 0x2d5   : > { %v566_v50 = vpop.permute.xlu1 %565 }
 0x2d6   : > { %1171 = vmatmul.mubr.msk.bf16.vlgmr.msra.gmra.mrb[4].mxu1 %vm330_vm2, %v566_v50  ;;  %v829_v50 = vsub.f32 1.0, %v1119_v40 }
 0x2d7   : > { %1182 = vmatprep.mubr.msk.bf16.mxu1 %vm1256_vm1, %v1255_v2  ;;  %1181 = vmatpush3.bf16.msra.mxu1 %v1219_v11  ;;  %v994_v11 = vstv %s993_s22 }
 0x2d8   : > { %1192 = vmatprep.subr.bf16.mxu1 %v1255_v2 }
 0x3a9   : > { %v610_v55 = vpop.f32.mrb[4].mxu1 }
 0x3aa   : > { %v611_v58 = vadd.f32 %v1366_v12, %v610_v55  ;;  %v1172_v59 = vpop.f32.mrb[5].mxu1 }
 0x3ab   : > { %v613_v60 = vpop.f32.mrb[6].mxu1 }
 0x3ac   : > { %624 = vrot.lane.b32.xlu0 %v611_v58, %s1259_s9  ;;  %v1173_v61 = vpop.f32.mrb[7].mxu1  ;;  %v616_v0 = vadd.f32 %v611_v58, %v549_v63 }
 0x3ae   : > { %v1108_v1 = vmul.f32 -1.442695, %v616_v0 }
 0x3b0   : > { %650 = vperm.xlu0 %1214, %v1109_v62   ;;  %1229 = vpow2.f32 %v1108_v1 }
 0x3ba   : > { %v1230_v3 = vpop.eup %1229 }
 0x3bb   : > { %v620_v4 = vadd.f32 1.0, %v1230_v3 }
 0x3bd   : > { %1231 = vrcp.f32 %v620_v4 }
 0x3c7   : > { %v1232_v5 = vpop.eup %1231 }
 0x3c8   : > { %v634_v17 = vsub.f32 1.0, %v1232_v5  ;;  %v640_v20 = vmul.f32 %v1232_v5, %v1391_v48 }
 0x41e   : > { %v625_v6 = vpop.permute.xlu0 %624 }
 0x41f   : > { %v627_v7 = vmul.f32 %v1232_v5, %v625_v6  ;;  %v898_v6 = vpop.f32.mrb[12].mxu0 }
 0x421   : > { %629 = vrot.lane.b32.xlu1 %v627_v7, %s1260_s13  ;;  %v1190_v7 = vpop.f32.mrb[13].mxu0 }
 0x425   : > { %657 = vperm.xlu1 %1213, %v654_v8   ;;  %v901_v8 = vpop.f32.mrb[14].mxu0 }
 0x42f   : > { %v651_v21 = vpop.permute.xlu0 %650 }
 0x493   : > { %v630_v9 = vpop.permute.xlu1 %629 }
 0x494   : > { %v632_v10 = vadd.f32 %v630_v9, %v549_v63  ;;  %v1191_v9 = vpop.f32.mrb[15].mxu0 }
 0x496   : > { %1233 = vtanh.f32 %v632_v10  ;;  %v992_v10 = vld [vmem:[%s1487_s1] sm:$0x3] }
 0x497   : > { %vm995_vm6 = vcmp.gt.f32.partialorder %v992_v10, %v994_v11 }
 0x4a0   : > { %v1234_v14 = vpop.eup %1233 }
 0x4a1   : > { %636 = vrot.lane.b32.xlu1 %v1234_v14, %s1261_s19 }
 0x4a4   : > { %v658_v15 = vpop.permute.xlu1 %657 }
 0x4a5   : > { %v660_v24 = vmul.f32 %v658_v15, %v1391_v48 }
 0x513   : > { %v637_v18 = vpop.permute.xlu1 %636 }
 0x514   : > { %v639_v19 = vmul.f32 %v637_v18, %v634_v17  ;;  %v1129_v18 = vsel %vm995_vm6, 1.0, %v1255_v2 }
 0x516   : > { %v641_v23 = vadd.f32 %v640_v20, %v639_v19  ;;  %v899_v19 = vadd.f32 %v1373_v22, %v898_v6 }
 0x518   : > { %v653_v25 = vmul.f32 %v651_v21, %v641_v23 }
 0x51a   : > { %v1423_v26 = vadd.f32 %v660_v24, %v653_v25 }
 0x51c   : > { %v729_v27 = vpack.c.bf16 %v1423_v26, %v1423_v26 }
 0x51e   : > { %740 = vrot.lane.b32.xlu0 %v729_v27, %s1261_s19 }
 0x590   : > { %v741_v28 = vpop.permute.xlu0 %740 }
 0x591   : > { %1183 = vmatmul.mubr.msk.bf16.vlgmr.msra.gmra.mrb[8].mxu1 %vm330_vm2, %v741_v28  ;;  %v1004_v28 = vsub.f32 1.0, %v1129_v18 }
 0x592   : > { %1194 = vmatprep.mubr.msk.bf16.mxu1 %vm1256_vm1, %v1255_v2  ;;  %1193 = vmatpush3.bf16.msra.mxu1 %v1221_v53 }
 0x664   : > { %v785_v35 = vpop.f32.mrb[8].mxu1 }
 0x665   : > { %v786_v36 = vadd.f32 %v1366_v12, %v785_v35  ;;  %v1184_v37 = vpop.f32.mrb[9].mxu1 }
 0x666   : > { %v788_v38 = vpop.f32.mrb[10].mxu1 }
 0x667   : > { %799 = vrot.lane.b32.xlu1 %v786_v36, %s1259_s9  ;;  %v1185_v39 = vpop.f32.mrb[11].mxu1  ;;  %v791_v42 = vadd.f32 %v786_v36, %v724_v41 }
 0x669   : > { %v1118_v43 = vmul.f32 -1.442695, %v791_v42 }
 0x66b   : > { %825 = vperm.xlu1 %1213, %v1119_v40   ;;  %1235 = vpow2.f32 %v1118_v43 }
 0x675   : > { %v1236_v44 = vpop.eup %1235 }
 0x676   : > { %v795_v45 = vadd.f32 1.0, %v1236_v44 }
 0x678   : > { %1237 = vrcp.f32 %v795_v45 }
 0x682   : > { %v1238_v46 = vpop.eup %1237 }
 0x683   : > { %v809_v58 = vsub.f32 1.0, %v1238_v46  ;;  %v815_v60 = vmul.f32 %v1238_v46, %v1423_v26 }
 0x6d9   : > { %v800_v47 = vpop.permute.xlu1 %799 }
 0x6da   : > { %v802_v49 = vmul.f32 %v1238_v46, %v800_v47 }
 0x6dc   : > { %804 = vrot.lane.b32.xlu0 %v802_v49, %s1260_s13 }
 0x6e0   : > { %832 = vperm.xlu0 %1214, %v829_v50  }
 0x6ea   : > { %v826_v56 = vpop.permute.xlu1 %825 }
 0x74e   : > { %v805_v51 = vpop.permute.xlu0 %804 }
 0x74f   : > { %v807_v52 = vadd.f32 %v805_v51, %v724_v41 }
 0x751   : > { %1239 = vtanh.f32 %v807_v52 }
 0x75b   : > { %v1240_v55 = vpop.eup %1239 }
 0x75c   : > { %811 = vrot.lane.b32.xlu1 %v1240_v55, %s1261_s19 }
 0x75f   : > { %v833_v62 = vpop.permute.xlu0 %832 }
 0x760   : > { %v835_v0 = vmul.f32 %v833_v62, %v1423_v26 }
 0x7ce   : > { %v812_v59 = vpop.permute.xlu1 %811 }
 0x7cf   : > { %v814_v61 = vmul.f32 %v812_v59, %v809_v58 }
 0x7d1   : > { %v816_v63 = vadd.f32 %v815_v60, %v814_v61 }
 0x7d3   : > { %v828_v1 = vmul.f32 %v826_v56, %v816_v63 }
 0x7d5   : > { %v836_v3 = vadd.f32 %v835_v0, %v828_v1 }
 0x7d7   : > { %v904_v4 = vpack.c.bf16 %v836_v3, %v836_v3 }
 0x7d9   : > { %915 = vrot.lane.b32.xlu0 %v904_v4, %s1261_s19 }
 0x84b   : > { %v916_v5 = vpop.permute.xlu0 %915 }
 0x84c   : > { %1195 = vmatmul.mubr.msk.bf16.vlgmr.msra.gmra.mrb[12].mxu1 %vm330_vm2, %v916_v5 }
 0x91f   : > { %v960_v13 = vpop.f32.mrb[12].mxu1 }
 0x920   : > { %v961_v14 = vadd.f32 %v1366_v12, %v960_v13  ;;  %v1196_v15 = vpop.f32.mrb[13].mxu1 }
 0x921   : > { %v963_v16 = vpop.f32.mrb[14].mxu1 }
 0x922   : > { %974 = vrot.lane.b32.xlu1 %v961_v14, %s1259_s9  ;;  %v1197_v17 = vpop.f32.mrb[15].mxu1  ;;  %v966_v20 = vadd.f32 %v961_v14, %v899_v19 }
 0x924   : > { %v1128_v21 = vmul.f32 -1.442695, %v966_v20 }
 0x926   : > { %1000 = vperm.xlu1 %1213, %v1129_v18   ;;  %1241 = vpow2.f32 %v1128_v21 }
 0x930   : > { %v1242_v23 = vpop.eup %1241 }
 0x931   : > { %v970_v24 = vadd.f32 1.0, %v1242_v23 }
 0x933   : > { %1243 = vrcp.f32 %v970_v24 }
 0x93d   : > { %v1244_v25 = vpop.eup %1243 }
 0x93e   : > { %v984_v32 = vsub.f32 1.0, %v1244_v25  ;;  %v990_v34 = vmul.f32 %v1244_v25, %v836_v3 }
 0x994   : > { %v975_v27 = vpop.permute.xlu1 %974 }
 0x995   : > { %v977_v12 = vmul.f32 %v1244_v25, %v975_v27 }
 0x997   : > { %979 = vrot.lane.b32.xlu0 %v977_v12, %s1260_s13 }
 0x99b   : > { %1007 = vperm.xlu0 %1214, %v1004_v28  }
 0x99f   : > { %488 = vrot.lane.b32.xlu0 %v1391_v48, %s1261_s19 }
 0x9a3   : > { %838 = vrot.lane.b32.xlu0 %v836_v3, %s1261_s19 }
 0x9a5   : > { %v1001_v48 = vpop.permute.xlu1 %1000 }
 0xa09   : > { %v980_v2 = vpop.permute.xlu0 %979 }
 0xa0a   : > { %v982_v22 = vadd.f32 %v980_v2, %v899_v19 }
 0xa0c   : > { %1245 = vtanh.f32 %v982_v22 }
 0xa16   : > { %v1246_v29 = vpop.eup %1245 }
 0xa17   : > { %986 = vrot.lane.b32.xlu1 %v1246_v29, %s1261_s19 }
 0xa1a   : > { %v1008_v30 = vpop.permute.xlu0 %1007 }
 0xa1b   : > { %663 = vrot.lane.b32.xlu1 %v1423_v26, %s1261_s19  ;;  %v1010_v38 = vmul.f32 %v1008_v30, %v836_v3 }
 0xa1e   : > { %v489_v31 = vpop.permute.xlu0 %488 }
 0xa1f   : > { %492 = vst.msk [vmem:[%s1330_s15] sm:$0x3] %vm491_vm7, %v489_v31 }
 0xa22   : > { %v839_v39 = vpop.permute.xlu0 %838 }
 0xa23   : > { %1120 = vst.msk [vmem:[%s1330_s15 + $0x4] sm:$0x3] %vm491_vm7, %v839_v39 }
 0xa89   : > { %v987_v33 = vpop.permute.xlu1 %986 }
 0xa8a   : > { %v989_v35 = vmul.f32 %v987_v33, %v984_v32 }
 0xa8c   : > { %v991_v36 = vadd.f32 %v990_v34, %v989_v35 }
 0xa8d   : > { %v664_v37 = vpop.permute.xlu1 %663 }
 0xa8e   : > { %v1003_v40 = vmul.f32 %v1001_v48, %v991_v36  ;;  %1110 = vst.msk [vmem:[%s1330_s15 + $0x2] sm:$0x3] %vm491_vm7, %v664_v37 }
 0xa90   : > { %v1011_v26 = vadd.f32 %v1010_v38, %v1003_v40 }
 0xa92   : > { %1013 = vrot.lane.b32.xlu1 %v1011_v26, %s1261_s19 }
 0xaff   : > { %1022 = sbr.rel (%p1131_p5) target bundleno = 2823 (0xb07), region = 56 }
 0xb04   : > { %v1014_v41 = vpop.permute.xlu1 %1013 }
 0xb05   : > { %1130 = vst.msk [vmem:[%s1330_s15 + $0x6] sm:$0x3] %vm491_vm7, %v1014_v41  ;;  %1018 = vst.msk [vmem:[#allocation2] sm:$0x3] %vm491_vm7, %v1014_v41 }
 0xb06   : > { %1023 = vst.msk [vmem:[%s1494_s8] sm:$0x3] %vm491_vm7, %v1014_v41 }
 0xb07 PF: > { %s19_s27 = sadd.s32 1, %s1253_s27  }
 0xb08   : > { %p16_p6 = scmp.ge.s32.totalorder %s19_s27, 4  }
 0xb0a   :  { %18 = sbr.rel (!%p16_p6) target bundleno = 1 (0x1), region = 100 }

// kernel: seq2seq_multi_forward.7
= control target key start
LH: loop header
LB: loop body
LE: loop exit
PB: predicated region body
PF: predicated region fallthrough
CT: control target
= control target key end

     0   :  { %s2104_s0 = inlined_call_operand.vmem [shape: s32[7], index: 0, kind: input, shape index: {}]   ;;  %s2105_s1 = inlined_call_operand.vmem [shape: f32[2,16], index: 1, kind: input, shape index: {}]   ;;  %s2106_s2 = inlined_call_operand.vmem [shape: bf16[16,16], index: 2, kind: input, shape index: {}]   ;;  %s2107_s3 = inlined_call_operand.vmem [shape: bf16[2,6,16], index: 3, kind: input, shape index: {}]   ;;  %s2108_s4 = inlined_call_operand.vmem [shape: f32[2,1,6], index: 4, kind: input, shape index: {}]   ;;  %s2109_s5 = inlined_call_operand.vmem [shape: f32[2,8], index: 5, kind: input, shape index: {}]   ;;  %s2110_s6 = inlined_call_operand.vmem [shape: f32[2,8], index: 6, kind: input, shape index: {}]   ;;  %s2111_s7 = inlined_call_operand.vmem [shape: bf16[8,2,16], index: 7, kind: input, shape index: {}]   ;;  %s2112_s8 = inlined_call_operand.vmem [shape: bf16[16,48], index: 8, kind: input, shape index: {}]   ;;  %s2113_s9 = inlined_call_operand.vmem [shape: f32[1,48], index: 9, kind: input, shape index: {}]   ;;  %s2114_s10 = inlined_call_operand.vmem [shape: bf16[16,48], index: 10, kind: input, shape index: {}]   ;;  %s2115_s11 = inlined_call_operand.vmem [shape: bf16[16,48], index: 11, kind: input, shape index: {}]   ;;  %s2116_s12 = inlined_call_operand.vmem [shape: f32[1,48], index: 12, kind: input, shape index: {}]   ;;  %s2117_s13 = inlined_call_operand.vmem [shape: f32[1,48], index: 13, kind: input, shape index: {}]   ;;  %s2118_s14 = inlined_call_operand.vmem [shape: bf16[16,16], index: 14, kind: input, shape index: {}]   ;;  %s2119_s15 = inlined_call_operand.vmem [shape: bf16[16,16], index: 15, kind: input, shape index: {}]   ;;  %s2120_s16 = inlined_call_operand.vmem [shape: f32[1,16], index: 16, kind: input, shape index: {}]   ;;  %s2121_s17 = inlined_call_operand.vmem [shape: bf16[16,1], index: 17, kind: input, shape index: {}]   ;;  %s2122_s18 = inlined_call_operand.vmem [shape: bf16[16,1], index: 18, kind: input, shape index: {}]   ;;  %s2123_s20 = inlined_call_operand.vmem [shape: f32[7,2,16], index: 20, kind: output, shape index: {0}]   ;;  %s2124_s21 = inlined_call_operand.vmem [shape: f32[7,2,1], index: 21, kind: output, shape index: {1}]   ;;  %s2125_s19 = inlined_call_operand.<no memory space> [shape: f32[1,1], index: 19, kind: input, shape index: {}]  }
   0x1   :  { %2128 = sst [smem:[#allocation9_spill]] %s2104_s0  ;;  %v31_v0 = vstv %s2125_s19 }
   0x2   :  { %2129 = sst [smem:[#allocation10_spill]] %s2105_s1  ;;  %s2135_s26 = sld [smem:[#allocation9_spill]]  ;;  %32 = vst [vmem:[#allocation7] sm:$0x1] %v31_v0 }
   0x3   :  { %2130 = sst [smem:[#allocation11_spill]] %s2106_s2 }
   0x4   :  { %2131 = sst [smem:[#allocation12_spill]] %s2107_s3 }
   0x5   :  { %2132 = sst [smem:[#allocation13_spill]] %s2108_s4 }
   0x6   :  { %2133 = sst [smem:[#allocation14_spill]] %s2109_s5 }
   0x7   :  { %2134 = sst [smem:[#allocation15_spill]] %s2118_s14 }
   0x8   :  { %s27_s14 = sshll.u32 %s2135_s26, 4  ;;  %s28_s14 = int_to_ptr.vmem [resolvable:$true] %s27_s14 }
   0x9   :  { %s1759_s28 = scalar_lea.vmem %s28_s14, 16  ;;  %p1764_p1 = scmp.lt.s32.totalorder %s28_s14, %s28_s14 }
   0xa   :  { %p1760_p0 = scmp.ne.s32.totalorder %s28_s14, %s1759_s28  ;;  %p1765_p2 = scmp.lt.s32.totalorder %s1759_s28, %s1759_s28 }
   0xc   :  { %p1766_p3 = por %p1765_p2, %p1764_p1 }
   0xe   :  { %p1767_p4 = pnand %p1766_p3, %p1760_p0 }
  0x10   :  { %1770 = shalt.err (!%p1767_p4)  }
  0x11   :  { %s1781_s29 = smov [#allocation6]  }
  0x12   :  { %30 = dma.vmem_to_smem %s28_s14, 16, %s1781_s29, [#allocation5] }
  0x13   :  { %1775 = dma.done.wait [#allocation5], 16 }
  0x14   :  { %1776 = vsyncadd [#allocation5], 4294967280 }
  0x15   :  { %34 = sfence }
  0x16   :  { %s1908_s0 = smov 0  }
  0x17 LB: > { %s1914_s19 = sadd.s32 4294967295, %s1779_s0   ;;  %p1574_p5 = scmp.ge.s32.totalorder %s1779_s0, 1  ;;  %s1779_s0 = sphi %s1908_s0, %s40_s0  }
  0x18   : > { %p576_p6 = scmp.lt.s32.totalorder %s1779_s0, 8 }
  0x1a   : > { %p577_p7 = pnand %p1574_p5, %p576_p6 }
  0x1b   : > { %s1919_s14 = sadd.s32 (!%p577_p7), 1, %s1914_s19  ;;  %p641_p8 = scmp.lt.s32.totalorder (!%p577_p7), %s1914_s19, 6  ;;  %v650_v1 = vlaneseq (!%p577_p7) }
  0x1c   : > { %580 = sbr.rel (%p577_p7) target bundleno = 2483 (0x9b3), region = 96  ;;  %p637_p9 = scmp.lt.s32.totalorder (!%p577_p7), %s1919_s14, 7 }
  0x1d   : > { %v1924_v2 = vand.u32 (!%p577_p7), 127, %v650_v1  ;;  %p1577_p10 = scmp.ne.s32.totalorder (!%p577_p7), %s1914_s19, 0 }
  0x1f   : > { %v1930_v3 = vcvt.s32.f32 (!%p577_p7), %v1924_v2 }
  0x23   : > { %s642_s4 = scalar_select %p641_p8, %s1914_s19, 6 }
  0x24   : > { %s1927_s30 = scalar_select %p637_p9, %s1919_s14, 7 }
  0x25   : > { %s1575_s5 = sshll.u32 %s642_s4, 1  ;;  %656 = sbr.rel (%p1577_p10) target bundleno = 179 (0xb3), region = 100  ;;  %v1782_v5 = vmov (!%p1577_p10), 0   ;;  %vm658_vm0 = vcmask (!%p1577_p10), 123904   ;;  %v672_v7 = vld [vmem:[%s2110_s6] sm:$0x3] (!%p1577_p10) }
  0x26   : > { %s1939_s25 = scalar_lea.vmem %s2123_s20, %s1575_s5  ;;  %s1944_s3 = scalar_lea.vmem %s2124_s21, %s1575_s5  ;;  %1727 = vset.pattern.permute.xlu0 (!%p1577_p10), %v1782_v5  ;;  %vm673_vm1 = vcmask (!%p1577_p10), 1024   ;;  %vm670_vm3 = vcmask (!%p1577_p10), 122880   ;;  %v1783_v9 = vmov (!%p1577_p10), 0.0  }
  0x27   : > { %s2136_s4 = sld [smem:[#allocation14_spill]] (!%p1577_p10)  ;;  %s2137_s24 = sld [smem:[#allocation10_spill]] (!%p1577_p10)  ;;  %674 = vst.msk [vmem:[#allocation4] sm:$0x3] (!%p1577_p10), %vm673_vm1, %v672_v7 }
  0x2d   : > { %v660_v4 = vld [vmem:[%s2136_s4] sm:$0x3] }
  0x2e   : > { %663 = vperm.xlu0 %1727, %v660_v4   ;;  %v657_v6 = vld [vmem:[%s2137_s24] sm:$0x3] }
  0x2f   : > { %659 = vst.msk [vmem:[#allocation2] sm:$0x3] %vm658_vm0, %v657_v6 }
  0xad   : > { %v664_v8 = vpop.permute.xlu0 %663 }
  0xae   : > { %vm666_vm2 = vcmp.eq.f32.partialorder %v1930_v3, %v664_v8 }
  0xaf   : > { %v1578_v10 = vsel %vm666_vm2, 1.0, %v1783_v9 }
  0xb0   : > { %v669_v11 = vpack.c.bf16 %v1578_v10, %v1578_v10 }
  0xb2   : > { %671 = vst.msk [vmem:[#allocation3] sm:$0x1] %vm670_vm3, %v669_v11 }
  0xb3 PF: > { %s2138_s27 = sld [smem:[#allocation12_spill]]  ;;  %vm701_vm4 = vcmask 130048   ;;  %v1784_v13 = vmov 0.0   ;;  %v1966_v16 = vld [vmem:[#allocation2] sm:$0x3]  ;;  %vm1785_vm5 = vmmov 0  }
  0xb4   : > { %1636 = vmatprep.subr.bf16.mxu0 %v1784_v13  ;;  %1642 = vmatprep.subr.bf16.mxu1 %v1784_v13  ;;  %v1786_v18 = vmov 1966171168   ;;  %v684_v20 = vshrl.u32 %v650_v1, 7  ;;  %v1977_v21 = vpack.c.bf16 %v1966_v16, %v1966_v16  ;;  %vm834_vm6 = vcmask 1042432   ;;  %s2139_s22 = sld [smem:[#allocation13_spill]]  ;;  %s2140_s26 = sld [smem:[#allocation11_spill]] }
  0xb5   : > { %1638 = vmatprep.mubr.msk.bf16.mxu0 %vm1785_vm5, %v1784_v13  ;;  %v681_v19 = vunpack.c.l.s4 %v1786_v18  ;;  %1644 = vmatprep.mubr.msk.bf16.mxu1 %vm1785_vm5, %v1784_v13  ;;  %vm805_vm8 = vcmask 40960   ;;  %vm830_vm10 = vcmask 48128   ;;  %v1730_v6 = vld [vmem:[%s2112_s8] sm:$0xff]   ;;  %v1787_v9 = vmov 0   ;;  %s1788_s24 = smov 96   ;;  %s2141_s29 = sld [smem:[#allocation15_spill]] }
  0xb6   : > { %v699_v26 = vsub.s32 0, %v684_v20  ;;  %v1731_v7 = vld [vmem:[%s2114_s10] sm:$0xff]   ;;  %1728 = vset.pattern.permute.xlu0 %v1787_v9  ;;  %vm1049_vm11 = vcmask 1041409   ;;  %s1790_s4 = smov 112   ;;  %s1791_s23 = smov 16   ;;  %vm1309_vm12 = vcmask 123904  }
  0xb7   : > { %v682_v22 = vunpack.c.0.s8 %v681_v19  ;;  %v979_v8 = vld [vmem:[#allocation4] sm:$0x3]  ;;  %vm1435_vm13 = vcmask 1024   ;;  %vm1455_vm15 = vcmask 58368   ;;  %vm1478_vm3 = vcmask 122880  }
  0xb9   : > { %v677_v12 = vld [vmem:[%s2138_s27] sm:$0x7]  ;;  %v678_v15 = vld [vmem:[%s2138_s27 + $0x4] sm:$0x7]  ;;  %v685_v23 = vsub.s32 %v682_v22, %v684_v20 }
  0xba   : > { %v706_v14 = vsel %vm701_vm4, %v677_v12, 0  ;;  %v757_v17 = vsel %vm701_vm4, %v678_v15, 0  ;;  %v835_v29 = vsel %vm834_vm6, %v677_v12, 0  ;;  %v880_v32 = vsel %vm834_vm6, %v678_v15, 0  ;;  %v799_v34 = vld [vmem:[%s2139_s22] sm:$0x1] }
  0xbb   : > { %1637 = vmatpush3.bf16.xpose.msra.mxu0 %v706_v14  ;;  %1643 = vmatpush3.bf16.xpose.msra.mxu1 %v757_v17  ;;  %v686_v24 = vrot.slane %v1977_v21, %v685_v23  ;;  %v800_v35 = vld [vmem:[%s2139_s22 + $0x1] sm:$0x1]  ;;  %vm801_vm7 = vcmp.gt.f32.partialorder %v799_v34, 0.0  ;;  %v924_v5 = vld [vmem:[#allocation3] sm:$0x1] }
  0xbc   : > { %1648 = vmatprep.subr.bf16.mxu0 %v1784_v13  ;;  %1654 = vmatprep.subr.bf16.mxu1 %v1784_v13  ;;  %vm802_vm9 = vcmp.gt.f32.partialorder %v800_v35, 0.0  ;;  %v1729_v62 = vld [vmem:[%s2140_s26] sm:$0xff]   ;;  %s1789_s26 = smov 32  }
  0xbd   : > { %v693_v25 = vrot.slane %v686_v24, %v685_v23  ;;  %v1734_v35 = vld [vmem:[%s2122_s18] sm:$0xff]  }
  0xbf   : > { %v1579_v27 = vpack.i.b16 %v693_v25, %v693_v25  ;;  %v695_v28 = vunpack.i.h.s16 %v693_v25  ;;  %v1732_v25 = vld [vmem:[%s2115_s11] sm:$0xff]  }
  0xc1   : > { %v700_v30 = vrot.slane %v1579_v27, %v699_v26  ;;  %v748_v31 = vpack.i.b16 %v695_v28, %v695_v28 }
  0xc3   : > { %1639 = vmatmul.mubr.msk.bf16.vlgmr.msra.gmra.mrb[0].mxu0 %vm701_vm4, %v700_v30  ;;  %v752_v33 = vrot.slane %v748_v31, %v699_v26 }
  0xc4   : > { %1649 = vmatpush3.bf16.msra.mxu0 %v835_v29  ;;  %1650 = vmatprep.mubr.msk.bf16.mxu0 %vm1785_vm5, %v1784_v13 }
  0xc5   : > { %1645 = vmatmul.mubr.msk.bf16.vlgmr.msra.gmra.mrb[0].mxu1 %vm701_vm4, %v752_v33  ;;  %1660 = vmatprep.subr.bf16.mxu0 %v1784_v13  ;;  %v1733_v33 = vld [vmem:[%s2119_s15] sm:$0xff]  }
  0xc6   : > { %1655 = vmatpush3.bf16.msra.mxu1 %v880_v32  ;;  %1656 = vmatprep.mubr.msk.bf16.mxu1 %vm1785_vm5, %v1784_v13 }
  0xc7   : > { %1666 = vmatprep.subr.bf16.mxu1 %v1784_v13 }
 0x196   : > { %v742_v36 = vpop.f32.mrb[0].mxu0 }
 0x197   : > { %v803_v37 = vsel %vm801_vm7, %v742_v36, -1e+09  ;;  %v1640_v38 = vpop.f32.mrb[1].mxu0  ;;  %v1586_v36 = vld [vmem:[%s2113_s9] ss:$0 sm:$0xff] }
 0x198   : > { %v745_v39 = vpop.f32.mrb[2].mxu0  ;;  %v806_v40 = vsel %vm805_vm8, %v803_v37, -inf  ;;  %v793_v41 = vpop.f32.mrb[0].mxu1 }
 0x199   : > { %807 = vmax.xlane.f32.xlu0 %v806_v40  ;;  %v1641_v42 = vpop.f32.mrb[3].mxu0  ;;  %v804_v43 = vsel %vm802_vm9, %v793_v41, -1e+09  ;;  %v1646_v44 = vpop.f32.mrb[1].mxu1 }
 0x19a   : > { %v809_v45 = vsel %vm805_vm8, %v804_v43, -inf  ;;  %v796_v46 = vpop.f32.mrb[2].mxu1 }
 0x19b   : > { %v1647_v47 = vpop.f32.mrb[3].mxu1 }
 0x19d   : > { %810 = vmax.xlane.f32.xlu0 %v809_v45 }
 0x1b3   : > { %983 = vperm.xlu0 %1728, %v979_v8  }
 0x226   : > { %v808_v48 = vpop.xlane.xlu0 %807 }
 0x227   : > { %v812_v49 = vsub.f32 %v803_v37, %v808_v48  ;;  %v1592_v48 = vld [vmem:[%s2117_s13] ss:$0 sm:$0xff] }
 0x229   : > { %v814_v50 = vmul.f32 1.442695, %v812_v49 }
 0x22a   : > { %v811_v51 = vpop.xlane.xlu0 %810 }
 0x22b   : > { %1737 = vpow2.f32 %v814_v50  ;;  %v813_v52 = vsub.f32 %v804_v43, %v811_v51 }
 0x22d   : > { %v816_v53 = vmul.f32 1.442695, %v813_v52 }
 0x22f   : > { %1739 = vpow2.f32 %v816_v53 }
 0x235   : > { %v1738_v54 = vpop.eup %1737 }
 0x236   : > { %v818_v55 = vsel %vm805_vm8, %v1738_v54, 0.0 }
 0x237   : > { %819 = vadd.xlane.f32.xlu1 %v818_v55 }
 0x239   : > { %v1740_v56 = vpop.eup %1739 }
 0x23a   : > { %v821_v57 = vsel %vm805_vm8, %v1740_v56, 0.0 }
 0x23b   : > { %822 = vadd.xlane.f32.xlu1 %v821_v57 }
 0x2c4   : > { %v820_v58 = vpop.xlane.xlu1 %819 }
 0x2c5   : > { %1741 = vrcp.f32 %v820_v58 }
 0x2c8   : > { %v823_v59 = vpop.xlane.xlu1 %822 }
 0x2c9   : > { %1743 = vrcp.f32 %v823_v59 }
 0x2cf   : > { %v1742_v60 = vpop.eup %1741 }
 0x2d0   : > { %v826_v61 = vmul.f32 %v1742_v60, %v1738_v54 }
 0x2d2   : > { %v828_v63 = vpack.c.bf16 %v826_v61, %v826_v61 }
 0x2d3   : > { %v1744_v0 = vpop.eup %1743 }
 0x2d4   : > { %v827_v1 = vmul.f32 %v1744_v0, %v1740_v56  ;;  %1651 = vmatmul.mubr.msk.bf16.vlgmr.msra.gmra.mrb[4].mxu0 %vm830_vm10, %v828_v63 }
 0x2d5   : > { %1661 = vmatpush3.bf16.msra.mxu0 %v1729_v62  ;;  %1662 = vmatprep.mubr.msk.bf16.mxu0 %vm1785_vm5, %v1784_v13  ;;  %v1591_v62 = vld [vmem:[%s2116_s12] ss:$0 sm:$0xff] }
 0x2d6   : > { %v829_v4 = vpack.c.bf16 %v827_v1, %v827_v1  ;;  %1672 = vmatprep.subr.bf16.mxu0 %v1784_v13 }
 0x2d8   : > { %1657 = vmatmul.mubr.msk.bf16.vlgmr.msra.gmra.mrb[4].mxu1 %vm830_vm10, %v829_v4 }
 0x2d9   : > { %1668 = vmatprep.mubr.msk.bf16.mxu1 %vm1785_vm5, %v1784_v13  ;;  %1667 = vmatpush3.bf16.msra.mxu1 %v1730_v6 }
 0x2da   : > { %1678 = vmatprep.subr.bf16.mxu1 %v1784_v13 }
 0x2dc   : > { %1663 = vmatmul.mubr.msk.bf16.vlgmr.msra.gmra.mrb[8].mxu0 %vm701_vm4, %v924_v5 }
 0x2dd   : > { %1674 = vmatprep.mubr.msk.bf16.mxu0 %vm1785_vm5, %v1784_v13  ;;  %1673 = vmatpush3.bf16.msra.mxu0 %v1731_v7 }
 0x2de   : > { %1684 = vmatprep.subr.bf16.mxu0 %v1784_v13 }
 0x3a7   : > { %v871_v10 = vpop.f32.mrb[4].mxu0 }
 0x3a8   : > { %v1652_v11 = vpop.f32.mrb[5].mxu0  ;;  %v922_v17 = vpack.c.bf16 %v871_v10, %v871_v10 }
 0x3a9   : > { %v874_v12 = vpop.f32.mrb[6].mxu0  ;;  %v1735_v11 = vld [vmem:[%s2141_s29] sm:$0xff]   ;;  %s2142_s29 = sld [smem:[#allocation14_spill]] }
 0x3aa   : > { %v1653_v14 = vpop.f32.mrb[7].mxu0  ;;  %v1046_v26 = vunpack.c.l.b16 %v922_v17 }
 0x3ab   : > { %v916_v15 = vpop.f32.mrb[4].mxu1 }
 0x3ac   : > { %v923_v18 = vpack.c.bf16 %v916_v15, %v916_v15  ;;  %v1658_v19 = vpop.f32.mrb[5].mxu1 }
 0x3ad   : > { %v919_v20 = vpop.f32.mrb[6].mxu1 }
 0x3ae   : > { %v1047_v22 = vunpack.c.l.b16 %v923_v18  ;;  %v1659_v23 = vpop.f32.mrb[7].mxu1 }
 0x3af   : > { %v970_v24 = vpop.f32.mrb[8].mxu0  ;;  %v1736_v23 = vld [vmem:[%s2121_s17] sm:$0xff]  }
 0x3b0   : > { %v1048_v27 = vrot.slane %v1047_v22, 7  ;;  %v976_v28 = vpack.c.bf16 %v970_v24, %v970_v24  ;;  %v1664_v29 = vpop.f32.mrb[9].mxu0 }
 0x3b1   : > { %v973_v30 = vpop.f32.mrb[10].mxu0 }
 0x3b2   : > { %v1050_v31 = vsel %vm1049_vm11, %v1048_v27, %v1046_v26  ;;  %v1665_v32 = vpop.f32.mrb[11].mxu0  ;;  %1669 = vmatmul.mubr.msk.bf16.vlgmr.msra.gmra.mrb[8].mxu1 %vm701_vm4, %v976_v28 }
 0x3b3   : > { %v1051_v34 = vpack.c.b16 %v1050_v31, %v1050_v31  ;;  %1679 = vmatpush3.bf16.msra.mxu1 %v1732_v25  ;;  %1680 = vmatprep.mubr.msk.bf16.mxu1 %vm1785_vm5, %v1784_v13  ;;  %v1600_v25 = vld [vmem:[%s2120_s16] ss:$0 sm:$0xff] }
 0x3b4   : > { %1690 = vmatprep.subr.bf16.mxu1 %v1784_v13 }
 0x3b5   : > { %1675 = vmatmul.mubr.msk.bf16.vlgmr.msra.gmra.mrb[12].mxu0 %vm701_vm4, %v1051_v34 }
 0x3b6   : > { %1685 = vmatpush3.bf16.msra.mxu0 %v1733_v33  ;;  %1686 = vmatprep.mubr.msk.bf16.mxu0 %vm1785_vm5, %v1784_v13  ;;  %v1605_v33 = vld [vmem:[#allocation7] ss:$0 sm:$0xff] }
 0x3b7   : > { %1696 = vmatprep.subr.bf16.mxu0 %v1784_v13 }
 0x3ba   : > { %1681 = vmatmul.mubr.msk.bf16.vlgmr.msra.gmra.mrb[12].mxu1 %vm701_vm4, %v1977_v21  ;;  %v984_v21 = vpop.permute.xlu0 %983 }
 0x3bb   : > { %1692 = vmatprep.mubr.msk.bf16.mxu1 %vm1785_vm5, %v1784_v13  ;;  %v992_v37 = vmul.f32 %v1586_v36, %v984_v21  ;;  %1691 = vmatpush3.bf16.msra.mxu1 %v1735_v11 }
 0x3bc   : > { %1702 = vmatprep.subr.bf16.mxu1 %v1784_v13 }
 0x3bd   : > { %1687 = vmatmul.mubr.msk.bf16.vlgmr.msra.gmra.mrb[16].mxu0 %vm701_vm4, %v1051_v34 }
 0x3be   : > { %1697 = vmatpush3.bf16.msra.mxu0 %v1734_v35  ;;  %1698 = vmatprep.mubr.msk.bf16.mxu0 %vm1785_vm5, %v1784_v13 }
 0x3c5   : > { %1699 = vmatmul.mubr.msk.bf16.vlgmr.msra.gmra.mrb[20].mxu0 %vm701_vm4, %v1051_v34 }
 0x485   : > { %v1036_v38 = vpop.f32.mrb[8].mxu1 }
 0x486   : > { %v1037_v39 = vadd.f32 %v1036_v38, %v992_v37  ;;  %v1670_v40 = vpop.f32.mrb[9].mxu1 }
 0x487   : > { %v1039_v41 = vpop.f32.mrb[10].mxu1 }
 0x488   : > { %v1671_v42 = vpop.f32.mrb[11].mxu1  ;;  %v1095_v43 = vpop.f32.mrb[12].mxu0 }
 0x489   : > { %v1101_v44 = vadd.f32 %v1095_v43, %v1037_v39  ;;  %v1676_v45 = vpop.f32.mrb[13].mxu0 }
 0x48a   : > { %v1098_v46 = vpop.f32.mrb[14].mxu0  ;;  %v1449_v45 = vstv %s1919_s14 }
 0x48b   : > { %v1677_v47 = vpop.f32.mrb[15].mxu0  ;;  %v1109_v63 = vadd.f32 %v1591_v62, %v1101_v44  ;;  %vm1450_vm14 = vcmp.eq.s32.totalorder %v1924_v2, %v1449_v45 }
 0x48c   : > { %v1608_v46 = vsel %vm1450_vm14, 1.0, %v1784_v13  ;;  %v1453_v47 = vld [vmem:[%s2142_s29] sm:$0x3] }
 0x48d   : > { %v1162_v49 = vpop.f32.mrb[12].mxu1 }
 0x48e   : > { %v1163_v50 = vadd.f32 %v1592_v48, %v1162_v49  ;;  %v1682_v51 = vpop.f32.mrb[13].mxu1  ;;  %v1454_v48 = vmul.f32 %v1608_v46, %v1453_v47 }
 0x48f   : > { %v1165_v52 = vpop.f32.mrb[14].mxu1 }
 0x490   : > { %v1243_v53 = vpop.f32.mrb[16].mxu0  ;;  %1176 = vrot.lane.b32.xlu1 %v1163_v50, %s1788_s24  ;;  %v1683_v54 = vpop.f32.mrb[15].mxu1  ;;  %v1168_v0 = vadd.f32 %v1163_v50, %v1109_v63  ;;  %v1456_v51 = vsel %vm1455_vm15, %v1454_v48, 0.0 }
 0x491   : > { %v1688_v55 = vpop.f32.mrb[17].mxu0 }
 0x492   : > { %v1246_v56 = vpop.f32.mrb[18].mxu0  ;;  %v1595_v1 = vmul.f32 -1.442695, %v1168_v0 }
 0x493   : > { %v1689_v57 = vpop.f32.mrb[19].mxu0 }
 0x494   : > { %1745 = vpow2.f32 %v1595_v1 }
 0x498   : > { %v1368_v58 = vpop.f32.mrb[20].mxu0 }
 0x499   : > { %v1700_v59 = vpop.f32.mrb[21].mxu0 }
 0x49a   : > { %v1371_v60 = vpop.f32.mrb[22].mxu0 }
 0x49b   : > { %v1701_v61 = vpop.f32.mrb[23].mxu0  ;;  %v1459_v60 = vld [vmem:[%s2110_s6] sm:$0x3] }
 0x49c   : > { %v1460_v62 = vmul.f32 %v1608_v46, %v1459_v60 }
 0x49e   : > { %v1746_v4 = vpop.eup %1745  ;;  %v1461_v1 = vsel %vm1455_vm15, %v1460_v62, 0.0 }
 0x49f   : > { %v1172_v5 = vadd.f32 1.0, %v1746_v4 }
 0x4a1   : > { %1747 = vrcp.f32 %v1172_v5 }
 0x4ab   : > { %v1748_v6 = vpop.eup %1747 }
 0x4ac   : > { %v1186_v15 = vsub.f32 1.0, %v1748_v6 }
 0x502   : > { %v1177_v7 = vpop.permute.xlu1 %1176 }
 0x503   : > { %v1179_v8 = vmul.f32 %v1748_v6, %v1177_v7 }
 0x505   : > { %1181 = vrot.lane.b32.xlu1 %v1179_v8, %s1789_s26 }
 0x577   : > { %v1182_v9 = vpop.permute.xlu1 %1181 }
 0x578   : > { %v1184_v10 = vadd.f32 %v1182_v9, %v1109_v63 }
 0x57a   : > { %1749 = vtanh.f32 %v1184_v10 }
 0x584   : > { %v1750_v12 = vpop.eup %1749 }
 0x585   : > { %1188 = vrot.lane.b32.xlu1 %v1750_v12, %s1790_s4 }
 0x589   : > { %1193 = vrot.lane.b32.xlu1 %v1966_v16, %s1791_s23  ;;  %s2143_s23 = scalar_lea.vmem %s2111_s7, %s1927_s30  ;;  %s1467_s30 = sld [smem:[#allocation6 + %s1914_s19]] }
 0x58f   : > { %p1468_p11 = scmp.gt.s32.totalorder %s1467_s30, 0 }
 0x591   : > { %s1469_s2 = scalar_select %p1468_p11, 1, 0 }
 0x5f7   : > { %v1189_v14 = vpop.permute.xlu1 %1188 }
 0x5f8   : > { %v1191_v18 = vmul.f32 %v1189_v14, %v1186_v15 }
 0x5fb   : > { %v1194_v17 = vpop.permute.xlu1 %1193 }
 0x5fc   : > { %v1196_v19 = vmul.f32 %v1748_v6, %v1194_v17 }
 0x5fe   : > { %v1197_v20 = vadd.f32 %v1196_v19, %v1191_v18 }
 0x600   : > { %v1198_v22 = vpack.c.bf16 %v1197_v20, %v1197_v20 }
 0x602   : > { %1250 = vrot.lane.b32.xlu1 %v1198_v22, %s1790_s4 }
 0x674   : > { %v1251_v24 = vpop.permute.xlu1 %1250 }
 0x675   : > { %1693 = vmatmul.mubr.msk.bf16.vlgmr.msra.gmra.mrb[16].mxu1 %vm701_vm4, %v1251_v24 }
 0x676   : > { %1703 = vmatpush3.bf16.msra.mxu1 %v1736_v23  ;;  %1704 = vmatprep.mubr.msk.bf16.mxu1 %vm1785_vm5, %v1784_v13 }
 0x67d   : > { %1705 = vmatmul.mubr.msk.bf16.vlgmr.msra.gmra.mrb[20].mxu1 %vm701_vm4, %v1251_v24 }
 0x748   : > { %v1295_v16 = vpop.f32.mrb[16].mxu1 }
 0x749   : > { %v1296_v26 = vadd.f32 %v1295_v16, %v1243_v53  ;;  %v1694_v27 = vpop.f32.mrb[17].mxu1  ;;  %v1321_v53 = vld [vmem:[%s2143_s23] sm:$0x1] }
 0x74a   : > { %v1298_v28 = vpop.f32.mrb[18].mxu1  ;;  %v1322_v55 = vunpack.c.l.bf16 %v1321_v53 }
 0x74b   : > { %v1695_v29 = vpop.f32.mrb[19].mxu1  ;;  %v1308_v30 = vadd.f32 %v1600_v25, %v1296_v26 }
 0x74d   : > { %v1310_v31 = vsel %vm1309_vm12, %v1308_v30, -inf }
 0x74e   : > { %1311 = vmax.xlane.f32.xlu1 %v1310_v31 }
 0x750   : > { %v1414_v32 = vpop.f32.mrb[20].mxu1 }
 0x751   : > { %v1415_v34 = vadd.f32 %v1414_v32, %v1368_v58  ;;  %v1706_v35 = vpop.f32.mrb[21].mxu1 }
 0x752   : > { %v1417_v36 = vpop.f32.mrb[22].mxu1 }
 0x753   : > { %v1427_v21 = vadd.f32 %v1605_v33, %v1415_v34  ;;  %v1707_v37 = vpop.f32.mrb[23].mxu1 }
 0x755   : > { %v1606_v38 = vmul.f32 -1.442695, %v1427_v21 }
 0x757   : > { %1751 = vpow2.f32 %v1606_v38 }
 0x761   : > { %v1752_v39 = vpop.eup %1751 }
 0x762   : > { %v1431_v40 = vadd.f32 1.0, %v1752_v39 }
 0x764   : > { %1753 = vrcp.f32 %v1431_v40 }
 0x76e   : > { %v1754_v41 = vpop.eup %1753 }
 0x76f   : > { %1436 = vst.msk [vmem:[%s1944_s3] sm:$0x3] %vm1435_vm13, %v1754_v41 }
 0x7db   : > { %v1312_v42 = vpop.xlane.xlu1 %1311 }
 0x7dc   : > { %v1313_v43 = vsub.f32 %v1308_v30, %v1312_v42 }
 0x7de   : > { %v1314_v44 = vmul.f32 1.442695, %v1313_v43 }
 0x7e0   : > { %1755 = vpow2.f32 %v1314_v44 }
 0x7ea   : > { %v1756_v49 = vpop.eup %1755 }
 0x7eb   : > { %v1316_v50 = vsel %vm1309_vm12, %v1756_v49, 0.0 }
 0x7ec   : > { %1317 = vadd.xlane.f32.xlu0 %v1316_v50 }
 0x7f0   : > { %1457 = vadd.xlane.f32.xlu0 %v1456_v51 }
 0x806   : > { %1485 = vrot.lane.b32.xlu0 %v1197_v20, %s1790_s4 }
 0x879   : > { %v1318_v52 = vpop.xlane.xlu0 %1317 }
 0x87a   : > { %1757 = vrcp.f32 %v1318_v52 }
 0x87d   : > { %v1458_v2 = vpop.xlane.xlu0 %1457 }
 0x87e   : > { %vm1464_vm1 = vcmp.eq.f32.partialorder %v1930_v3, %v1458_v2 }
 0x87f   : > { %v1609_v4 = vsel %vm1464_vm1, 1.0, %v1784_v13 }
 0x881   : > { %v1486_v54 = vpop.permute.xlu0 %1485 }
 0x882   : > { %1488 = vst.msk [vmem:[#allocation2] sm:$0x3] %vm1309_vm12, %v1486_v54 }
 0x884   : > { %v1758_v56 = vpop.eup %1757 }
 0x885   : > { %v1320_v57 = vmul.f32 %v1758_v56, %v1756_v49 }
 0x887   : > { %v1323_v58 = vmul.f32 %v1322_v55, %v1320_v57 }
 0x889   : > { %v1437_v59 = vsel %vm1309_vm12, %v1323_v58, -inf  ;;  %1434 = vst.msk [vmem:[%s1939_s25] sm:$0x3] %vm1309_vm12, %v1323_v58  ;;  %s1470_s25 = scvt.s32.f32 %s1469_s2 }
 0x88a   : > { %1438 = vmax.xlane.f32.xlu1 %v1437_v59 }
 0x88b   : > { %s1473_s5 = ssub.f32 1.0, %s1470_s25  ;;  %v1471_v5 = vstv %s1470_s25 }
 0x88c   : > { %v1472_v7 = vmul.f32 %v1609_v4, %v1471_v5 }
 0x88d   : > { %v1474_v8 = vstv %s1473_s5 }
 0x88e   : > { %v1481_v15 = vmul.f32 %v1754_v41, %v1474_v8 }
 0x917   : > { %v1439_v61 = vpop.xlane.xlu1 %1438 }
 0x918   : > { %vm1440_vm0 = vcmp.ge.f32.partialorder %v1323_v58, %v1439_v61 }
 0x919   : > { %v1441_v63 = vsel %vm1440_vm0, %v1930_v3, 16.0 }
 0x91a   : > { %v1442_v0 = vsel %vm1309_vm12, %v1441_v63, inf }
 0x91b   : > { %1443 = vmin.xlane.f32.xlu1 %v1442_v0 }
 0x91f   : > { %1462 = vadd.xlane.f32.xlu1 %v1461_v1 }
 0x9a8   : > { %v1444_v6 = vpop.xlane.xlu1 %1443 }
 0x9a9   : > { %vm1445_vm2 = vcmp.eq.f32.partialorder %v1930_v3, %v1444_v6 }
 0x9aa   : > { %v1607_v9 = vsel %vm1445_vm2, 1.0, %v1784_v13 }
 0x9ab   : > { %v1475_v10 = vmul.f32 %v1607_v9, %v1474_v8 }
 0x9ac   : > { %v1463_v11 = vpop.xlane.xlu1 %1462 }
 0x9ad   : > { %v1476_v12 = vadd.f32 %v1475_v10, %v1472_v7  ;;  %v1480_v14 = vmul.f32 %v1471_v5, %v1463_v11 }
 0x9af   : > { %v1477_v17 = vpack.c.bf16 %v1476_v12, %v1476_v12  ;;  %v1482_v18 = vadd.f32 %v1481_v15, %v1480_v14 }
 0x9b1   : > { %1479 = vst.msk [vmem:[#allocation3] sm:$0x1] %vm1478_vm3, %v1477_v17 }
 0x9b2   : > { %1483 = vst.msk [vmem:[#allocation4] sm:$0x3] %vm1435_vm13, %v1482_v18 }
 0x9b3 PF: > { %s40_s0 = sadd.s32 1, %s1779_s0  }
 0x9b4   : > { %p37_p12 = scmp.ge.s32.totalorder %s40_s0, 9  }
 0x9b6   :  { %39 = sbr.rel (!%p37_p12) target bundleno = 23 (0x17), region = 142 }

</bundles_post_ra>
